<compile_context>
chip_gen: v5e
topology: v5e:2x2
jax: 0.10.0
libtpu: 0.0.40
codegen_flags: <defaults>
</compile_context>

<pallas_src>
import jax
import jax.numpy as jnp
from jax.experimental import pallas as pl
from jax.experimental.pallas import tpu as pltpu


LANE_PAD = 128  # lane-dense padded width of the actor head output


def network_kernel(compass_ref, image_ref,
                   w1_ref, b1_ref, w2_ref, b2_ref,
                   c1_ref, cb1_ref, c2_ref, cb2_ref, c3_ref, cb3_ref,
                   wac_ref, wai_ref, ba_ref,
                   out_ref):
    f32 = jnp.float32
    bf16 = jnp.bfloat16

    # ---- mlp branch (compass): Linear -> Tanh -> Linear -> Tanh (f32 nonlinearity) ----
    c = compass_ref[...].astype(bf16)
    h = jnp.tanh(jnp.dot(c, w1_ref[...], preferred_element_type=f32) + b1_ref[...])
    h = jnp.tanh(jnp.dot(h.astype(bf16), w2_ref[...], preferred_element_type=f32) + b2_ref[...])

    # ---- cnn branch (flat 960): 3x (Linear -> ReLU) ----
    x = image_ref[...].astype(bf16)
    g = jnp.maximum(jnp.dot(x, c1_ref[...], preferred_element_type=f32) + cb1_ref[...], 0.0)
    g = jnp.maximum(jnp.dot(g.astype(bf16), c2_ref[...], preferred_element_type=f32) + cb2_ref[...], 0.0)
    g = jnp.maximum(jnp.dot(g.astype(bf16), c3_ref[...], preferred_element_type=f32) + cb3_ref[...], 0.0)

    # ---- actor head: split-weight accumulation replaces concatenate + single matmul ----
    logits = (jnp.dot(h.astype(bf16), wac_ref[...], preferred_element_type=f32)
              + jnp.dot(g.astype(bf16), wai_ref[...], preferred_element_type=f32)
              + ba_ref[...])                                   # [TB, 128] (padded cols = -1e30)

    # ---- numerically stable softmax; padded columns underflow to exactly 0 ----
    m = jnp.max(logits, axis=-1, keepdims=True)
    e = jnp.exp(logits - m)
    denom = jnp.sum(e, axis=-1, keepdims=True)
    out_ref[...] = e * pl.reciprocal(denom, approx=False)


def network_forward(compass, image, params, *, tb=128):
    """compass: [B, state_dim] f32, image: [B, 960] f32 -> [B, action_dim] softmax probs."""
    B, state_dim = compass.shape
    action_dim = params["wa"].shape[1]

    # Batch tile: multiple of 8 sublanes; keep it modest so double-buffered image tiles
    # fit comfortably in VMEM on all generations (v7x has only 64 MiB).
    tb = min(tb, max(8, pl.cdiv(B, 8) * 8))
    Bp = pl.cdiv(B, tb) * tb
    if Bp != B:
        compass = jnp.pad(compass, ((0, Bp - B), (0, 0)))
        image = jnp.pad(image, ((0, Bp - B), (0, 0)))

    bf = lambda a: a.astype(jnp.bfloat16)

    # Split the actor weight along its input axis (64 compass rows | 64 image rows) and
    # pad the output axis to 128 lanes. Padded bias columns get -1e30 -> softmax weight 0.
    wa = params["wa"]                                           # [128, action_dim]
    pad_cols = LANE_PAD - action_dim
    wac = jnp.pad(wa[:64, :], ((0, 0), (0, pad_cols)))
    wai = jnp.pad(wa[64:, :], ((0, 0), (0, pad_cols)))
    ba = jnp.pad(params["ba"], ((0, 0), (0, pad_cols)), constant_values=-1e30)

    args = (compass, image,
            bf(params["w1"]), params["b1"], bf(params["w2"]), params["b2"],
            bf(params["c1"]), params["cb1"], bf(params["c2"]), params["cb2"],
            bf(params["c3"]), params["cb3"],
            bf(wac), bf(wai), ba)

    grid = (Bp // tb,)

    def batch_spec(feat):
        return pl.BlockSpec((tb, feat), lambda i: (i, 0))

    def resident(shape):
        # Same block index every grid step -> weights stay VMEM-resident (no re-DMA).
        return pl.BlockSpec(shape, lambda i: (0, 0))

    in_specs = [
        batch_spec(state_dim),                 # compass
        batch_spec(960),                       # image
        resident((state_dim, 64)), resident((1, 64)),      # w1, b1
        resident((64, 64)),        resident((1, 64)),      # w2, b2
        resident((960, 256)),      resident((1, 256)),     # c1, cb1
        resident((256, 128)),      resident((1, 128)),     # c2, cb2
        resident((128, 64)),       resident((1, 64)),      # c3, cb3
        resident((64, LANE_PAD)),                          # wa (compass half)
        resident((64, LANE_PAD)),                          # wa (image half)
        resident((1, LANE_PAD)),                           # ba (padded with -1e30)
    ]

    out = pl.pallas_call(
        network_kernel,
        out_shape=jax.ShapeDtypeStruct((Bp, LANE_PAD), jnp.float32),
        grid=grid,
        in_specs=in_specs,
        out_specs=pl.BlockSpec((tb, LANE_PAD), lambda i: (i, 0)),
        compiler_params=pltpu.CompilerParams(
            dimension_semantics=("parallel",),       # shard batch axis across TCs (v7x)
            vmem_limit_bytes=64 * 1024 * 1024),
    )(*args)

    return out[:B, :action_dim]


def init_params(key, state_dim, action_dim):
    """Deterministic init mimicking nn.Linear (uniform +-1/sqrt(fan_in)), stored f32."""
    def linear(k, fan_in, fan_out):
        kw, kb = jax.random.split(k)
        bound = 1.0 / jnp.sqrt(float(fan_in))
        w = jax.random.uniform(kw, (fan_in, fan_out), jnp.float32, -bound, bound)
        b = jax.random.uniform(kb, (1, fan_out), jnp.float32, -bound, bound)
        return w, b

    keys = jax.random.split(key, 6)
    p = {}
    p["w1"], p["b1"] = linear(keys[0], state_dim, 64)
    p["w2"], p["b2"] = linear(keys[1], 64, 64)
    p["c1"], p["cb1"] = linear(keys[2], 960, 256)
    p["c2"], p["cb2"] = linear(keys[3], 256, 128)
    p["c3"], p["cb3"] = linear(keys[4], 128, 64)
    p["wa"], p["ba"] = linear(keys[5], 128, action_dim)   # out_size = 64 + 64 (mixed)
    return p


def reference_forward(compass, image, p, *, use_bf16):
    """Pure-JAX reference. use_bf16=True mirrors the kernel's precision path."""
    cast = (lambda a: a.astype(jnp.bfloat16)) if use_bf16 else (lambda a: a)

    def dot(a, w):
        return jnp.dot(cast(a), cast(w), preferred_element_type=jnp.float32)

    h = jnp.tanh(dot(compass, p["w1"]) + p["b1"])
    h = jnp.tanh(dot(h, p["w2"]) + p["b2"])
    g = jnp.maximum(dot(image, p["c1"]) + p["cb1"], 0.0)
    g = jnp.maximum(dot(g, p["c2"]) + p["cb2"], 0.0)
    g = jnp.maximum(dot(g, p["c3"]) + p["cb3"], 0.0)
    logits = dot(jnp.concatenate([h, g], axis=1), p["wa"]) + p["ba"]
    return jax.nn.softmax(logits, axis=-1)


if __name__ == "__main__":
    B, state_dim, action_dim = 200, 8, 4   # B=200 exercises both grid steps and padding

    key = jax.random.PRNGKey(0)
    k_params, k_compass, k_image = jax.random.split(key, 3)

    params = init_params(k_params, state_dim, action_dim)
    compass = jax.random.normal(k_compass, (B, state_dim), jnp.float32)
    image = jax.random.normal(k_image, (B, 960), jnp.float32)  # flat 960-dim image features

    out = network_forward(compass, image, params)
    out = jax.block_until_ready(out)
    assert out.shape == (B, action_dim)

    # Check against a reference that mirrors the kernel's bf16-weight / f32-accumulate path.
    ref_bf16 = reference_forward(compass, image, params, use_bf16=True)
    assert jnp.allclose(out, ref_bf16, atol=2e-3, rtol=2e-3), "mismatch vs bf16-path reference"

    # Sanity vs the full-f32 reference (bf16 weights introduce ~1e-2 level deviations).
    ref_f32 = reference_forward(compass, image, params, use_bf16=False)
    assert jnp.allclose(out, ref_f32, atol=5e-2, rtol=5e-2), "mismatch vs f32 reference"

    # Rows must be valid probability distributions (padded lanes contributed nothing).
    assert jnp.allclose(jnp.sum(out, axis=-1), 1.0, atol=1e-5)

    print("KERNEL_OK")
</pallas_src>

<mosaic_0001>
module attributes {stable_mosaic.version = 11 : i64} {
  func.func @network_kernel(%arg0: i32, %arg1: memref<128x8xf32, #tpu.memory_space<vmem>>, %arg2: memref<128x960xf32, #tpu.memory_space<vmem>>, %arg3: memref<8x64xbf16, #tpu.memory_space<vmem>>, %arg4: memref<1x64xf32, #tpu.memory_space<vmem>>, %arg5: memref<64x64xbf16, #tpu.memory_space<vmem>>, %arg6: memref<1x64xf32, #tpu.memory_space<vmem>>, %arg7: memref<960x256xbf16, #tpu.memory_space<vmem>>, %arg8: memref<1x256xf32, #tpu.memory_space<vmem>>, %arg9: memref<256x128xbf16, #tpu.memory_space<vmem>>, %arg10: memref<1x128xf32, #tpu.memory_space<vmem>>, %arg11: memref<128x64xbf16, #tpu.memory_space<vmem>>, %arg12: memref<1x64xf32, #tpu.memory_space<vmem>>, %arg13: memref<64x128xbf16, #tpu.memory_space<vmem>>, %arg14: memref<64x128xbf16, #tpu.memory_space<vmem>>, %arg15: memref<1x128xf32, #tpu.memory_space<vmem>>, %arg16: memref<128x128xf32, #tpu.memory_space<vmem>>) attributes {dimension_semantics = [#tpu.dimension_semantics<parallel>], iteration_bounds = array<i64: 2>, scalar_prefetch = 0 : i64, scratch_operands = 0 : i64, tpu.core_type = #tpu.core_type<tc>, window_params = [{transform_indices = @transform_0, window_bounds = array<i64: 128, 8>}, {transform_indices = @transform_1, window_bounds = array<i64: 128, 960>}, {pipeline_mode = #tpu.pipeline_mode<synchronous>, transform_indices = @transform_2, window_bounds = array<i64: 8, 64>}, {pipeline_mode = #tpu.pipeline_mode<synchronous>, transform_indices = @transform_3, window_bounds = array<i64: 1, 64>}, {pipeline_mode = #tpu.pipeline_mode<synchronous>, transform_indices = @transform_4, window_bounds = array<i64: 64, 64>}, {pipeline_mode = #tpu.pipeline_mode<synchronous>, transform_indices = @transform_5, window_bounds = array<i64: 1, 64>}, {pipeline_mode = #tpu.pipeline_mode<synchronous>, transform_indices = @transform_6, window_bounds = array<i64: 960, 256>}, {pipeline_mode = #tpu.pipeline_mode<synchronous>, transform_indices = @transform_7, window_bounds = array<i64: 1, 256>}, {pipeline_mode = #tpu.pipeline_mode<synchronous>, transform_indices = @transform_8, window_bounds = array<i64: 256, 128>}, {pipeline_mode = #tpu.pipeline_mode<synchronous>, transform_indices = @transform_9, window_bounds = array<i64: 1, 128>}, {pipeline_mode = #tpu.pipeline_mode<synchronous>, transform_indices = @transform_10, window_bounds = array<i64: 128, 64>}, {pipeline_mode = #tpu.pipeline_mode<synchronous>, transform_indices = @transform_11, window_bounds = array<i64: 1, 64>}, {pipeline_mode = #tpu.pipeline_mode<synchronous>, transform_indices = @transform_12, window_bounds = array<i64: 64, 128>}, {pipeline_mode = #tpu.pipeline_mode<synchronous>, transform_indices = @transform_13, window_bounds = array<i64: 64, 128>}, {pipeline_mode = #tpu.pipeline_mode<synchronous>, transform_indices = @transform_14, window_bounds = array<i64: 1, 128>}, {transform_indices = @transform_15, window_bounds = array<i64: 128, 128>}]} {
    %c0 = arith.constant 0 : index
    %c0_0 = arith.constant 0 : index
    %0 = vector.load %arg1[%c0, %c0_0] : memref<128x8xf32, #tpu.memory_space<vmem>>, vector<128x8xf32>
    %1 = arith.truncf %0 : vector<128x8xf32> to vector<128x8xbf16>
    %c0_1 = arith.constant 0 : index
    %c0_2 = arith.constant 0 : index
    %2 = vector.load %arg3[%c0_1, %c0_2] : memref<8x64xbf16, #tpu.memory_space<vmem>>, vector<8x64xbf16>
    %cst = arith.constant dense<0.000000e+00> : vector<128x64xf32>
    %3 = tpu.matmul %1, %2, %cst {dimension_numbers = #tpu.dot_dimension_numbers<[1], [0], [0], [1], [0, 0, 1, 1], [], []>} : vector<128x8xbf16>, vector<8x64xbf16>, vector<128x64xf32> -> vector<128x64xf32>
    %c0_3 = arith.constant 0 : index
    %c0_4 = arith.constant 0 : index
    %4 = vector.load %arg4[%c0_3, %c0_4] : memref<1x64xf32, #tpu.memory_space<vmem>>, vector<1x64xf32>
    %5 = vector.broadcast %4 : vector<1x64xf32> to vector<128x64xf32>
    %6 = arith.addf %3, %5 : vector<128x64xf32>
    %7 = math.tanh %6 : vector<128x64xf32>
    %8 = arith.truncf %7 : vector<128x64xf32> to vector<128x64xbf16>
    %c0_5 = arith.constant 0 : index
    %c0_6 = arith.constant 0 : index
    %9 = vector.load %arg5[%c0_5, %c0_6] : memref<64x64xbf16, #tpu.memory_space<vmem>>, vector<64x64xbf16>
    %cst_7 = arith.constant dense<0.000000e+00> : vector<128x64xf32>
    %10 = tpu.matmul %8, %9, %cst_7 {dimension_numbers = #tpu.dot_dimension_numbers<[1], [0], [0], [1], [0, 0, 1, 1], [], []>} : vector<128x64xbf16>, vector<64x64xbf16>, vector<128x64xf32> -> vector<128x64xf32>
    %c0_8 = arith.constant 0 : index
    %c0_9 = arith.constant 0 : index
    %11 = vector.load %arg6[%c0_8, %c0_9] : memref<1x64xf32, #tpu.memory_space<vmem>>, vector<1x64xf32>
    %12 = vector.broadcast %11 : vector<1x64xf32> to vector<128x64xf32>
    %13 = arith.addf %10, %12 : vector<128x64xf32>
    %14 = math.tanh %13 : vector<128x64xf32>
    %c0_10 = arith.constant 0 : index
    %c0_11 = arith.constant 0 : index
    %15 = vector.load %arg2[%c0_10, %c0_11] : memref<128x960xf32, #tpu.memory_space<vmem>>, vector<128x960xf32>
    %16 = arith.truncf %15 : vector<128x960xf32> to vector<128x960xbf16>
    %c0_12 = arith.constant 0 : index
    %c0_13 = arith.constant 0 : index
    %17 = vector.load %arg7[%c0_12, %c0_13] : memref<960x256xbf16, #tpu.memory_space<vmem>>, vector<960x256xbf16>
    %cst_14 = arith.constant dense<0.000000e+00> : vector<128x256xf32>
    %18 = tpu.matmul %16, %17, %cst_14 {dimension_numbers = #tpu.dot_dimension_numbers<[1], [0], [0], [1], [0, 0, 1, 1], [], []>} : vector<128x960xbf16>, vector<960x256xbf16>, vector<128x256xf32> -> vector<128x256xf32>
    %c0_15 = arith.constant 0 : index
    %c0_16 = arith.constant 0 : index
    %19 = vector.load %arg8[%c0_15, %c0_16] : memref<1x256xf32, #tpu.memory_space<vmem>>, vector<1x256xf32>
    %20 = vector.broadcast %19 : vector<1x256xf32> to vector<128x256xf32>
    %21 = arith.addf %18, %20 : vector<128x256xf32>
    %cst_17 = arith.constant 0.000000e+00 : f32
    %22 = vector.broadcast %cst_17 : f32 to vector<128x256xf32>
    %23 = arith.maximumf %21, %22 : vector<128x256xf32>
    %24 = arith.truncf %23 : vector<128x256xf32> to vector<128x256xbf16>
    %c0_18 = arith.constant 0 : index
    %c0_19 = arith.constant 0 : index
    %25 = vector.load %arg9[%c0_18, %c0_19] : memref<256x128xbf16, #tpu.memory_space<vmem>>, vector<256x128xbf16>
    %cst_20 = arith.constant dense<0.000000e+00> : vector<128x128xf32>
    %26 = tpu.matmul %24, %25, %cst_20 {dimension_numbers = #tpu.dot_dimension_numbers<[1], [0], [0], [1], [0, 0, 1, 1], [], []>} : vector<128x256xbf16>, vector<256x128xbf16>, vector<128x128xf32> -> vector<128x128xf32>
    %c0_21 = arith.constant 0 : index
    %c0_22 = arith.constant 0 : index
    %27 = vector.load %arg10[%c0_21, %c0_22] : memref<1x128xf32, #tpu.memory_space<vmem>>, vector<1x128xf32>
    %28 = vector.broadcast %27 : vector<1x128xf32> to vector<128x128xf32>
    %29 = arith.addf %26, %28 : vector<128x128xf32>
    %cst_23 = arith.constant 0.000000e+00 : f32
    %30 = vector.broadcast %cst_23 : f32 to vector<128x128xf32>
    %31 = arith.maximumf %29, %30 : vector<128x128xf32>
    %32 = arith.truncf %31 : vector<128x128xf32> to vector<128x128xbf16>
    %c0_24 = arith.constant 0 : index
    %c0_25 = arith.constant 0 : index
    %33 = vector.load %arg11[%c0_24, %c0_25] : memref<128x64xbf16, #tpu.memory_space<vmem>>, vector<128x64xbf16>
    %cst_26 = arith.constant dense<0.000000e+00> : vector<128x64xf32>
    %34 = tpu.matmul %32, %33, %cst_26 {dimension_numbers = #tpu.dot_dimension_numbers<[1], [0], [0], [1], [0, 0, 1, 1], [], []>} : vector<128x128xbf16>, vector<128x64xbf16>, vector<128x64xf32> -> vector<128x64xf32>
    %c0_27 = arith.constant 0 : index
    %c0_28 = arith.constant 0 : index
    %35 = vector.load %arg12[%c0_27, %c0_28] : memref<1x64xf32, #tpu.memory_space<vmem>>, vector<1x64xf32>
    %36 = vector.broadcast %35 : vector<1x64xf32> to vector<128x64xf32>
    %37 = arith.addf %34, %36 : vector<128x64xf32>
    %cst_29 = arith.constant 0.000000e+00 : f32
    %38 = vector.broadcast %cst_29 : f32 to vector<128x64xf32>
    %39 = arith.maximumf %37, %38 : vector<128x64xf32>
    %40 = arith.truncf %14 : vector<128x64xf32> to vector<128x64xbf16>
    %c0_30 = arith.constant 0 : index
    %c0_31 = arith.constant 0 : index
    %41 = vector.load %arg13[%c0_30, %c0_31] : memref<64x128xbf16, #tpu.memory_space<vmem>>, vector<64x128xbf16>
    %cst_32 = arith.constant dense<0.000000e+00> : vector<128x128xf32>
    %42 = tpu.matmul %40, %41, %cst_32 {dimension_numbers = #tpu.dot_dimension_numbers<[1], [0], [0], [1], [0, 0, 1, 1], [], []>} : vector<128x64xbf16>, vector<64x128xbf16>, vector<128x128xf32> -> vector<128x128xf32>
    %43 = arith.truncf %39 : vector<128x64xf32> to vector<128x64xbf16>
    %c0_33 = arith.constant 0 : index
    %c0_34 = arith.constant 0 : index
    %44 = vector.load %arg14[%c0_33, %c0_34] : memref<64x128xbf16, #tpu.memory_space<vmem>>, vector<64x128xbf16>
    %cst_35 = arith.constant dense<0.000000e+00> : vector<128x128xf32>
    %45 = tpu.matmul %43, %44, %cst_35 {dimension_numbers = #tpu.dot_dimension_numbers<[1], [0], [0], [1], [0, 0, 1, 1], [], []>} : vector<128x64xbf16>, vector<64x128xbf16>, vector<128x128xf32> -> vector<128x128xf32>
    %46 = arith.addf %42, %45 : vector<128x128xf32>
    %c0_36 = arith.constant 0 : index
    %c0_37 = arith.constant 0 : index
    %47 = vector.load %arg15[%c0_36, %c0_37] : memref<1x128xf32, #tpu.memory_space<vmem>>, vector<1x128xf32>
    %48 = vector.broadcast %47 : vector<1x128xf32> to vector<128x128xf32>
    %49 = arith.addf %46, %48 : vector<128x128xf32>
    %cst_38 = arith.constant dense<0xFF800000> : vector<128xf32>
    %50 = vector.multi_reduction <maximumf>, %49, %cst_38 [1] : vector<128x128xf32> to vector<128xf32>
    %51 = vector.shape_cast %50 : vector<128xf32> to vector<128x1xf32>
    %52 = vector.broadcast %51 : vector<128x1xf32> to vector<128x128xf32>
    %53 = arith.subf %49, %52 : vector<128x128xf32>
    %54 = math.exp %53 : vector<128x128xf32>
    %cst_39 = arith.constant dense<0.000000e+00> : vector<128xf32>
    %55 = vector.multi_reduction <add>, %54, %cst_39 [1] : vector<128x128xf32> to vector<128xf32>
    %56 = vector.shape_cast %55 : vector<128xf32> to vector<128x1xf32>
    %57 = tpu.reciprocal %56 : vector<128x1xf32> -> vector<128x1xf32>
    %58 = vector.broadcast %57 : vector<128x1xf32> to vector<128x128xf32>
    %59 = arith.mulf %54, %58 : vector<128x128xf32>
    %c0_40 = arith.constant 0 : index
    %c0_41 = arith.constant 0 : index
    %60 = vector.load %arg16[%c0_40, %c0_41] : memref<128x128xf32, #tpu.memory_space<vmem>>, vector<128x128xf32>
    tpu.vector_store %arg16[%c0_40, %c0_41], %59 {strides = array<i32>} : memref<128x128xf32, #tpu.memory_space<vmem>>, vector<128x128xf32>,
    return
  }
  func.func @transform_0(%arg0: i32) -> (i32, i32) {
    %c0_i32 = arith.constant 0 : i32
    %c0_i32_0 = arith.constant 0 : i32
    return %arg0, %c0_i32 : i32, i32
  }
  func.func @transform_1(%arg0: i32) -> (i32, i32) {
    %c0_i32 = arith.constant 0 : i32
    %c0_i32_0 = arith.constant 0 : i32
    return %arg0, %c0_i32 : i32, i32
  }
  func.func @transform_2(%arg0: i32) -> (i32, i32) {
    %c0_i32 = arith.constant 0 : i32
    %c0_i32_0 = arith.constant 0 : i32
    %c0_i32_1 = arith.constant 0 : i32
    return %c0_i32, %c0_i32_0 : i32, i32
  }
  func.func @transform_3(%arg0: i32) -> (i32, i32) {
    %c0_i32 = arith.constant 0 : i32
    %c0_i32_0 = arith.constant 0 : i32
    %c0_i32_1 = arith.constant 0 : i32
    return %c0_i32, %c0_i32_0 : i32, i32
  }
  func.func @transform_4(%arg0: i32) -> (i32, i32) {
    %c0_i32 = arith.constant 0 : i32
    %c0_i32_0 = arith.constant 0 : i32
    %c0_i32_1 = arith.constant 0 : i32
    return %c0_i32, %c0_i32_0 : i32, i32
  }
  func.func @transform_5(%arg0: i32) -> (i32, i32) {
    %c0_i32 = arith.constant 0 : i32
    %c0_i32_0 = arith.constant 0 : i32
    %c0_i32_1 = arith.constant 0 : i32
    return %c0_i32, %c0_i32_0 : i32, i32
  }
  func.func @transform_6(%arg0: i32) -> (i32, i32) {
    %c0_i32 = arith.constant 0 : i32
    %c0_i32_0 = arith.constant 0 : i32
    %c0_i32_1 = arith.constant 0 : i32
    return %c0_i32, %c0_i32_0 : i32, i32
  }
  func.func @transform_7(%arg0: i32) -> (i32, i32) {
    %c0_i32 = arith.constant 0 : i32
    %c0_i32_0 = arith.constant 0 : i32
    %c0_i32_1 = arith.constant 0 : i32
    return %c0_i32, %c0_i32_0 : i32, i32
  }
  func.func @transform_8(%arg0: i32) -> (i32, i32) {
    %c0_i32 = arith.constant 0 : i32
    %c0_i32_0 = arith.constant 0 : i32
    %c0_i32_1 = arith.constant 0 : i32
    return %c0_i32, %c0_i32_0 : i32, i32
  }
  func.func @transform_9(%arg0: i32) -> (i32, i32) {
    %c0_i32 = arith.constant 0 : i32
    %c0_i32_0 = arith.constant 0 : i32
    %c0_i32_1 = arith.constant 0 : i32
    return %c0_i32, %c0_i32_0 : i32, i32
  }
  func.func @transform_10(%arg0: i32) -> (i32, i32) {
    %c0_i32 = arith.constant 0 : i32
    %c0_i32_0 = arith.constant 0 : i32
    %c0_i32_1 = arith.constant 0 : i32
    return %c0_i32, %c0_i32_0 : i32, i32
  }
  func.func @transform_11(%arg0: i32) -> (i32, i32) {
    %c0_i32 = arith.constant 0 : i32
    %c0_i32_0 = arith.constant 0 : i32
    %c0_i32_1 = arith.constant 0 : i32
    return %c0_i32, %c0_i32_0 : i32, i32
  }
  func.func @transform_12(%arg0: i32) -> (i32, i32) {
    %c0_i32 = arith.constant 0 : i32
    %c0_i32_0 = arith.constant 0 : i32
    %c0_i32_1 = arith.constant 0 : i32
    return %c0_i32, %c0_i32_0 : i32, i32
  }
  func.func @transform_13(%arg0: i32) -> (i32, i32) {
    %c0_i32 = arith.constant 0 : i32
    %c0_i32_0 = arith.constant 0 : i32
    %c0_i32_1 = arith.constant 0 : i32
    return %c0_i32, %c0_i32_0 : i32, i32
  }
  func.func @transform_14(%arg0: i32) -> (i32, i32) {
    %c0_i32 = arith.constant 0 : i32
    %c0_i32_0 = arith.constant 0 : i32
    %c0_i32_1 = arith.constant 0 : i32
    return %c0_i32, %c0_i32_0 : i32, i32
  }
  func.func @transform_15(%arg0: i32) -> (i32, i32) {
    %c0_i32 = arith.constant 0 : i32
    %c0_i32_0 = arith.constant 0 : i32
    return %arg0, %c0_i32 : i32, i32
  }
}

</mosaic_0001>

<bundles_post_ra>
// kernel: tpu_custom_call.1
= control target key start
LH: loop header
LB: loop body
LE: loop exit
PB: predicated region body
PF: predicated region fallthrough
CT: control target
= control target key end

     0   :  { %s6956_s0 = inlined_call_operand.vmem [shape: f32[256,8], index: 0, kind: input, shape index: {}]   ;;  %s6957_s1 = inlined_call_operand.vmem [shape: f32[256,960], index: 1, kind: input, shape index: {}]   ;;  %s6958_s2 = inlined_call_operand.vmem [shape: bf16[8,64], index: 2, kind: input, shape index: {}]   ;;  %s6959_s3 = inlined_call_operand.vmem [shape: f32[1,64], index: 3, kind: input, shape index: {}]   ;;  %s6960_s4 = inlined_call_operand.vmem [shape: bf16[64,64], index: 4, kind: input, shape index: {}]   ;;  %s6961_s5 = inlined_call_operand.vmem [shape: f32[1,64], index: 5, kind: input, shape index: {}]   ;;  %s6962_s6 = inlined_call_operand.vmem [shape: bf16[960,256], index: 6, kind: input, shape index: {}]   ;;  %s6963_s7 = inlined_call_operand.vmem [shape: f32[1,256], index: 7, kind: input, shape index: {}]   ;;  %s6964_s8 = inlined_call_operand.vmem [shape: bf16[256,128], index: 8, kind: input, shape index: {}]   ;;  %s6965_s9 = inlined_call_operand.vmem [shape: f32[1,128], index: 9, kind: input, shape index: {}]   ;;  %s6966_s10 = inlined_call_operand.vmem [shape: bf16[128,64], index: 10, kind: input, shape index: {}]   ;;  %s6967_s11 = inlined_call_operand.vmem [shape: f32[1,64], index: 11, kind: input, shape index: {}]   ;;  %s6968_s12 = inlined_call_operand.vmem [shape: bf16[64,128], index: 12, kind: input, shape index: {}]   ;;  %s6969_s13 = inlined_call_operand.vmem [shape: bf16[64,128], index: 13, kind: input, shape index: {}]   ;;  %s6970_s14 = inlined_call_operand.vmem [shape: f32[1,128], index: 14, kind: input, shape index: {}]   ;;  %s6971_s15 = inlined_call_operand.hbm [shape: f32[256,128], index: 15, kind: output, shape index: {}]  }
   0x1   :  { %7017 = sst [smem:[#allocation54_spill]] %s6956_s0 }
   0x2   :  { %7018 = sst [smem:[#allocation55_spill]] %s6958_s2 }
   0x3   :  { %20 = vsyncpa [#allocation3], 0 }
   0x4   :  { %22 = vsyncpa [#allocation3 + $0x1], 0  ;;  %s4822_s18 = smov 0   ;;  %s4824_s19 = smov 0  }
   0x5   :  { %s4826_s20 = smov 0   ;;  %s4828_s21 = smov 0  }
   0x6 LB: > { %7019 = sst [smem:[#allocation5_spill]] %s4734_s20  ;;  %s4843_s22 = sadd.s32 4294967295, %s4738_s21   ;;  %s4738_s21 = sphi %s4828_s21, %s7126_s21   ;;  %s4734_s20 = sphi %s4826_s20, %s7128_s20   ;;  %s4730_s19 = sphi %s4824_s19, %s7130_s19   ;;  %s4726_s18 = sphi %s4822_s18, %s7129_s18  }
   0x7   : > { %s3644_s23 = sadd.s32 4294967294, %s4738_s21   ;;  %s4847_s24 = sadd.s32 1, %s4738_s21  }
   0x8   : > { %7020 = sst [smem:[#allocation6_spill]] %s4847_s24  ;;  %s360_s25 = sadd.s32 1, %s4734_s20 }
   0x9   : > { %s357_s26 = ssub.s32 %s4738_s21, %s4847_s24  ;;  %p370_p0 = scmp.ne.s32.totalorder %s4734_s20, %s4730_s19 }
   0xa   : > { %p358_p1 = scmp.eq.s32.totalorder %s357_s26, 0  ;;  %p371_p2 = scmp.eq.s32.totalorder %s4843_s22, 1 }
   0xb   : > { %p376_p3 = scmp.ne.s32.totalorder %s4730_s19, %s4726_s18  ;;  %p377_p4 = scmp.eq.s32.totalorder %s3644_s23, 1 }
   0xc   : > { %s4858_s27 = scalar_select %p358_p1, %s4734_s20, %s360_s25  }
   0xd   : > { %p4860_p5 = por %p371_p2, %p370_p0  ;;  %p4864_p6 = por %p377_p4, %p376_p3 }
   0xe   : > { %7021 = sst [smem:[#allocation7_spill]] %s4858_s27  ;;  %p3647_p7 = scmp.ge.s32.totalorder %s4738_s21, 1 }
   0xf   : > { %s7023_s29 = scalar_select %p4864_p6, 1, 0 }
  0x10   : > { %p453_p8 = scmp.lt.s32.totalorder %s4738_s21, 3 }
  0x11   : > { %7024 = sst [smem:[#allocation8_spill]] %s7023_s29 }
  0x12   : > { %p454_p9 = pnand %p3647_p7, %p453_p8 }
  0x14   : > { %457 = sbr.rel (%p454_p9) target bundleno = 1769 (0x6e9), region = 80 }
  0x19   : > { %s7025_s2 = sld [smem:[#allocation55_spill]]  ;;  %vm576_vm0 = vcmask 1043456   ;;  %s3649_s17 = sshll.u32 %s4843_s22, 4  ;;  %v3744_v2 = vld [vmem:[%s6962_s6 + $0x70] sm:$0xf]  ;;  %vm551_vm1 = vcmask 64512  }
  0x1a   : > { %p508_p10 = scmp.lt.s32.totalorder %s3649_s17, 31  ;;  %v4351_v3 = vld [vmem:[%s6962_s6 + $0x74] sm:$0xf0]  ;;  %v3736_v5 = vld [vmem:[%s6962_s6 + $0x60] sm:$0xf]  ;;  %s7026_s0 = sld [smem:[#allocation54_spill]] }
  0x1b   : > { %v3745_v4 = vor.u32 %v4351_v3, %v3744_v2  ;;  %v4349_v6 = vld [vmem:[%s6962_s6 + $0x64] sm:$0xf0]  ;;  %v3728_v8 = vld [vmem:[%s6962_s6 + $0x50] sm:$0xf]  ;;  %v4347_v9 = vld [vmem:[%s6962_s6 + $0x54] sm:$0xf0] }
  0x1c   : > { %s7132_s17 = smov (!%p508_p10, %s3649_s17), 31  ;;  %v3737_v7 = vor.u32 %v4349_v6, %v3736_v5  ;;  %v3729_v13 = vor.u32 %v4347_v9, %v3728_v8  ;;  %v3720_v14 = vld [vmem:[%s6962_s6 + $0x40] sm:$0xf]  ;;  %v4345_v15 = vld [vmem:[%s6962_s6 + $0x44] sm:$0xf0]  ;;  %vm689_vm2 = vcmask 523264  }
  0x1d   : > { %4489 = vmatpush.bf16.msra.mxu3 %v3745_v4  ;;  %1721 = vmatpush.bf16.msra.mxu2 %v3745_v4  ;;  %s3650_s23 = sshll.u32 %s7132_s17, 3  ;;  %v3721_v16 = vor.u32 %v4345_v15, %v3720_v14  ;;  %v3712_v17 = vld [vmem:[%s6962_s6 + $0x30] sm:$0xf]  ;;  %v4343_v18 = vld [vmem:[%s6962_s6 + $0x34] sm:$0xf0] }
  0x1e   : > { %v3713_v19 = vor.u32 %v4343_v18, %v3712_v17  ;;  %v3704_v20 = vld [vmem:[%s6962_s6 + $0x20] sm:$0xf]  ;;  %v4341_v21 = vld [vmem:[%s6962_s6 + $0x24] sm:$0xf0]  ;;  %v3696_v25 = vld [vmem:[%s6962_s6 + $0x10] sm:$0xf] }
  0x1f   : > { %v546_v0 = vld [vmem:[%s7025_s2] sm:$0xf]  ;;  %v3705_v24 = vor.u32 %v4341_v21, %v3704_v20  ;;  %v4339_v26 = vld [vmem:[%s6962_s6 + $0x14] sm:$0xf0]  ;;  %v4337_v30 = vld [vmem:[%s6962_s6 + $0x4] sm:$0xf0] }
  0x20   : > { %v578_v1 = vsel %vm576_vm0, %v546_v0, 0  ;;  %s4898_s30 = scalar_lea.vmem %s7026_s0, %s3650_s23  ;;  %s4331_s0 = sshll.u32 %s7132_s17, 6  ;;  %v3697_v28 = vor.u32 %v4339_v26, %v3696_v25  ;;  %v3688_v29 = vld [vmem:[%s6962_s6] sm:$0xf]  ;;  %v3808_v50 = vld [vmem:[%s6962_s6 + $0xf0] sm:$0xf] }
  0x21   : > { %587 = vmatpush.bf16.msra.mxu0 %v578_v1  ;;  %v522_v10 = vld [vmem:[%s4898_s30] sm:$0xff]  ;;  %v523_v11 = vld [vmem:[%s4898_s30 + $0x8] sm:$0xff]  ;;  %4490 = vmatpush.bf16.msra.mxu3 %v3737_v7  ;;  %v524_v22 = vld [vmem:[%s4898_s30 + $0x10] sm:$0xff]  ;;  %s4933_s2 = scalar_lea.vmem %s6957_s1, %s4331_s0  ;;  %v3689_v31 = vor.u32 %v4337_v30, %v3688_v29  ;;  %s504_s23 = sand.u32 1, %s4730_s19  }
  0x22   : > { %v538_v12 = vpack.c.bf16 %v523_v11, %v522_v10  ;;  %1722 = vmatpush.bf16.msra.mxu2 %v3737_v7  ;;  %v525_v23 = vld [vmem:[%s4898_s30 + $0x18] sm:$0xff]  ;;  %v811_v32 = vld [vmem:[%s4933_s2 + $0x100] sm:$0xff]  ;;  %v527_v36 = vld [vmem:[%s4898_s30 + $0x28] sm:$0xff]  ;;  %s3648_s26 = sshll.u32 %s504_s23, 7  ;;  %s4488_s0 = sshll.u32 %s4843_s22, 7 }
  0x23   : > { %v539_v27 = vpack.c.bf16 %v525_v23, %v524_v22  ;;  %v819_v33 = vld [vmem:[%s4933_s2 + $0x140] sm:$0xff]  ;;  %v528_v41 = vld [vmem:[%s4898_s30 + $0x30] sm:$0xff]  ;;  %v529_v42 = vld [vmem:[%s4898_s30 + $0x38] sm:$0xff]  ;;  %s3555_s24 = scalar_lea.sflag [#allocation3], %s504_s23 }
  0x24   : > { %3654 = vmatmul.msk.bf16.vlgmr.msra.gmra.mxu0 %vm551_vm1, %v538_v12  ;;  %v4944_v34 = vpack.c.bf16 %v819_v33, %v811_v32  ;;  %v526_v35 = vld [vmem:[%s4898_s30 + $0x20] sm:$0xff]  ;;  %v541_v43 = vpack.c.bf16 %v529_v42, %v528_v41  ;;  %v531_v48 = vld [vmem:[%s4898_s30 + $0x48] sm:$0xff]  ;;  %v4367_v51 = vld [vmem:[%s6962_s6 + $0xf4] sm:$0xf0] }
  0x25   : > { %4491 = vmatpush.bf16.msra.mxu3 %v3729_v13  ;;  %v540_v37 = vpack.c.bf16 %v527_v36, %v526_v35  ;;  %v827_v38 = vld [vmem:[%s4933_s2 + $0x180] sm:$0xff]  ;;  %v3809_v52 = vor.u32 %v4367_v51, %v3808_v50  ;;  %v4365_v54 = vld [vmem:[%s6962_s6 + $0xe4] sm:$0xf0]  ;;  %v3872_v55 = vld [vmem:[%s6962_s6 + $0x170] sm:$0xf] }
  0x26   : > { %1723 = vmatpush.bf16.msra.mxu2 %v3729_v13  ;;  %v835_v39 = vld [vmem:[%s4933_s2 + $0x1c0] sm:$0xff]  ;;  %v4383_v56 = vld [vmem:[%s6962_s6 + $0x174] sm:$0xf0]  ;;  %v3792_v62 = vld [vmem:[%s6962_s6 + $0xd0] sm:$0xf] }
  0x27   : > { %v4952_v40 = vpack.c.bf16 %v835_v39, %v827_v38  ;;  %v843_v44 = vld [vmem:[%s4933_s2 + $0x200] sm:$0xff]  ;;  %v3873_v60 = vor.u32 %v4383_v56, %v3872_v55  ;;  %v4363_v63 = vld [vmem:[%s6962_s6 + $0xd4] sm:$0xf0]  ;;  %v4381_v0 = vld [vmem:[%s6962_s6 + $0x164] sm:$0xf0] }
  0x28   : > { %v851_v45 = vld [vmem:[%s4933_s2 + $0x240] sm:$0xff]  ;;  %v3793_v3 = vor.u32 %v4363_v63, %v3792_v62  ;;  %v4361_v5 = vld [vmem:[%s6962_s6 + $0xc4] sm:$0xf0]  ;;  %v532_v6 = vld [vmem:[%s4898_s30 + $0x50] sm:$0xff] }
  0x29   : > { %4492 = vmatpush.bf16.msra.mxu3 %v3721_v16  ;;  %v4960_v46 = vpack.c.bf16 %v851_v45, %v843_v44  ;;  %v530_v47 = vld [vmem:[%s4898_s30 + $0x40] sm:$0xff]  ;;  %1819 = vmatpush.bf16.msrb.mxu0 %v3873_v60  ;;  %v533_v7 = vld [vmem:[%s4898_s30 + $0x58] sm:$0xff]  ;;  %v3776_v10 = vld [vmem:[%s6962_s6 + $0xb0] sm:$0xf] }
  0x2a   : > { %1724 = vmatpush.bf16.msra.mxu2 %v3721_v16  ;;  %v542_v49 = vpack.c.bf16 %v531_v48, %v530_v47  ;;  %v3800_v53 = vld [vmem:[%s6962_s6 + $0xe0] sm:$0xf]  ;;  %v543_v9 = vpack.c.bf16 %v533_v7, %v532_v6  ;;  %v4359_v11 = vld [vmem:[%s6962_s6 + $0xb4] sm:$0xf0]  ;;  %v3856_v12 = vld [vmem:[%s6962_s6 + $0x150] sm:$0xf] }
  0x2b   : > { %v859_v57 = vld [vmem:[%s4933_s2 + $0x280] sm:$0xff]  ;;  %v3801_v59 = vor.u32 %v4365_v54, %v3800_v53  ;;  %v3777_v13 = vor.u32 %v4359_v11, %v3776_v10  ;;  %v4379_v14 = vld [vmem:[%s6962_s6 + $0x154] sm:$0xf0]  ;;  %v4357_v16 = vld [vmem:[%s6962_s6 + $0xa4] sm:$0xf0] }
  0x2c   : > { %v867_v58 = vld [vmem:[%s4933_s2 + $0x2c0] sm:$0xff]  ;;  %v3857_v17 = vor.u32 %v4379_v14, %v3856_v12  ;;  %v4355_v25 = vld [vmem:[%s6962_s6 + $0x94] sm:$0xf0]  ;;  %v3840_v26 = vld [vmem:[%s6962_s6 + $0x130] sm:$0xf] }
  0x2d   : > { %4493 = vmatpush.bf16.msra.mxu3 %v3713_v19  ;;  %v3864_v61 = vld [vmem:[%s6962_s6 + $0x160] sm:$0xf]  ;;  %v4998_v2 = vpack.c.bf16 %v867_v58, %v859_v57  ;;  %v535_v32 = vld [vmem:[%s4898_s30 + $0x68] sm:$0xff]  ;;  %v4000_v44 = vld [vmem:[%s6962_s6 + $0x270] sm:$0xf] }
  0x2e   : > { %1725 = vmatpush.bf16.msra.mxu2 %v3713_v19  ;;  %v3865_v1 = vor.u32 %v4381_v0, %v3864_v61  ;;  %v3784_v4 = vld [vmem:[%s6962_s6 + $0xc0] sm:$0xf]  ;;  %v4377_v19 = vld [vmem:[%s6962_s6 + $0x144] sm:$0xf0]  ;;  %v4415_v45 = vld [vmem:[%s6962_s6 + $0x274] sm:$0xf0] }
  0x2f   : > { %v3785_v8 = vor.u32 %v4361_v5, %v3784_v4  ;;  %v3768_v15 = vld [vmem:[%s6962_s6 + $0xa0] sm:$0xf]  ;;  %v4353_v38 = vld [vmem:[%s6962_s6 + $0x84] sm:$0xf0]  ;;  %v4001_v48 = vor.u32 %v4415_v45, %v4000_v44  ;;  %v4371_v50 = vld [vmem:[%s6962_s6 + $0x114] sm:$0xf0] }
  0x30   : > { %1820 = vmatpush.bf16.msrb.mxu0 %v3865_v1  ;;  %v3848_v18 = vld [vmem:[%s6962_s6 + $0x140] sm:$0xf]  ;;  %v3769_v22 = vor.u32 %v4357_v16, %v3768_v15  ;;  %v4413_v54 = vld [vmem:[%s6962_s6 + $0x264] sm:$0xf0]  ;;  %v3984_v60 = vld [vmem:[%s6962_s6 + $0x250] sm:$0xf] }
  0x31   : > { %4494 = vmatpush.bf16.msra.mxu3 %v3705_v24  ;;  %v875_v20 = vld [vmem:[%s4933_s2 + $0x300] sm:$0xff]  ;;  %v3849_v23 = vor.u32 %v4377_v19, %v3848_v18  ;;  %v4334_v61 = vld [vmem:[%s6960_s4 + $0x10] sm:$0xff]  ;;  %v4411_v63 = vld [vmem:[%s6962_s6 + $0x254] sm:$0xf0] }
  0x32   : > { %1726 = vmatpush.bf16.msra.mxu2 %v3705_v24  ;;  %v883_v21 = vld [vmem:[%s4933_s2 + $0x340] sm:$0xff]  ;;  %v3760_v24 = vld [vmem:[%s6962_s6 + $0x90] sm:$0xf]  ;;  %v3985_v1 = vor.u32 %v4411_v63, %v3984_v60  ;;  %v4409_v4 = vld [vmem:[%s6962_s6 + $0x244] sm:$0xf0] }
  0x33   : > { %v3761_v29 = vor.u32 %v4355_v25, %v3760_v24  ;;  %v779_v33 = vld [vmem:[%s4933_s2] sm:$0xff]  ;;  %v4333_v5 = vld [vmem:[%s6960_s4 + $0x8] sm:$0xff]  ;;  %v536_v7 = vld [vmem:[%s4898_s30 + $0x70] sm:$0xff] }
  0x34   : > { %3655 = vmatmul.msk.bf16.gmra.mxu0 %vm551_vm1, %v539_v27  ;;  %v4375_v27 = vld [vmem:[%s6962_s6 + $0x134] sm:$0xf0]  ;;  %v787_v35 = vld [vmem:[%s4933_s2 + $0x40] sm:$0xff]  ;;  %v3968_v12 = vld [vmem:[%s6962_s6 + $0x230] sm:$0xf] }
  0x35   : > { %4495 = vmatpush.bf16.msra.mxu3 %v3697_v28  ;;  %1821 = vmatpush.bf16.msrb.mxu0 %v3857_v17  ;;  %v3841_v30 = vor.u32 %v4375_v27, %v3840_v26  ;;  %v5055_v36 = vpack.c.bf16 %v787_v35, %v779_v33  ;;  %v3832_v39 = vld [vmem:[%s6962_s6 + $0x120] sm:$0xf]  ;;  %v4405_v18 = vld [vmem:[%s6962_s6 + $0x224] sm:$0xf0]  ;;  %v3952_v25 = vld [vmem:[%s6962_s6 + $0x210] sm:$0xf] }
  0x36   : > { %1727 = vmatpush.bf16.msra.mxu2 %v3697_v28  ;;  %v5048_v28 = vpack.c.bf16 %v883_v21, %v875_v20  ;;  %v3992_v51 = vld [vmem:[%s6962_s6 + $0x260] sm:$0xf]  ;;  %v3936_v20 = vld [vmem:[%s6962_s6 + $0x1f0] sm:$0xf]  ;;  %v4399_v21 = vld [vmem:[%s6962_s6 + $0x1f4] sm:$0xf0] }
  0x37   : > { %v3993_v55 = vor.u32 %v4413_v54, %v3992_v51  ;;  %v891_v56 = vld [vmem:[%s4933_s2 + $0x380] sm:$0xff]  ;;  %v3937_v24 = vor.u32 %v4399_v21, %v3936_v20  ;;  %v4403_v26 = vld [vmem:[%s6962_s6 + $0x214] sm:$0xf0]  ;;  %v781_v33 = vld [vmem:[%s4933_s2 + $0x10] sm:$0xff] }
  0x38   : > { %v899_v57 = vld [vmem:[%s4933_s2 + $0x3c0] sm:$0xff]  ;;  %v3953_v27 = vor.u32 %v4403_v26, %v3952_v25  ;;  %v789_v35 = vld [vmem:[%s4933_s2 + $0x50] sm:$0xff]  ;;  %v4397_v45 = vld [vmem:[%s6962_s6 + $0x1e4] sm:$0xf0] }
  0x39   : > { %4496 = vmatpush.bf16.msra.mxu3 %v3689_v31  ;;  %1822 = vmatpush.bf16.msrb.mxu0 %v3849_v23  ;;  %v3816_v58 = vld [vmem:[%s6962_s6 + $0x100] sm:$0xf]  ;;  %v5109_v0 = vpack.c.bf16 %v899_v57, %v891_v56  ;;  %v788_v23 = vld [vmem:[%s4933_s2 + $0x48] sm:$0xff]  ;;  %v797_v54 = vld [vmem:[%s4933_s2 + $0x90] sm:$0xff] }
  0x3a   : > { %1728 = vmatpush.bf16.msra.mxu2 %v3689_v31  ;;  %v534_v31 = vld [vmem:[%s4898_s30 + $0x60] sm:$0xff]  ;;  %v828_v25 = vld [vmem:[%s4933_s2 + $0x188] sm:$0xff] }
  0x3b   : > { %v544_v41 = vpack.c.bf16 %v535_v32, %v534_v31  ;;  %v803_v10 = vld [vmem:[%s4933_s2 + $0xc0] sm:$0xff]  ;;  %v4401_v31 = vld [vmem:[%s6962_s6 + $0x204] sm:$0xf0] }
  0x3c   : > { %1739 = vmatmul.bf16.vlgmr.msra.gmra.mxu3 %v4944_v34  ;;  %v4332_v15 = vld [vmem:[%s6960_s4] sm:$0xff]  ;;  %v836_v26 = vld [vmem:[%s4933_s2 + $0x1c8] sm:$0xff] }
  0x3d   : > { %1770 = vmatpush.bf16.msrb.mxu3 %v3809_v52  ;;  %1823 = vmatpush.bf16.msrb.mxu0 %v3841_v30  ;;  %v4335_v52 = vld [vmem:[%s6960_s4 + $0x18] sm:$0xff]  ;;  %v3960_v17 = vld [vmem:[%s6962_s6 + $0x220] sm:$0xf] }
  0x3e   : > { %1729 = vmatmul.bf16.vlgmr.msra.gmra.mxu2 %v5055_v36  ;;  %718 = vmatpush.bf16.msra.mxu1 %v4335_v52  ;;  %v3961_v19 = vor.u32 %v4405_v18, %v3960_v17  ;;  %v3944_v30 = vld [vmem:[%s6962_s6 + $0x200] sm:$0xf] }
  0x3f   : > { %1917 = vmatpush.bf16.msrb.mxu2 %v4001_v48  ;;  %v3945_v32 = vor.u32 %v4401_v31, %v3944_v30  ;;  %v3928_v44 = vld [vmem:[%s6962_s6 + $0x1e0] sm:$0xf]  ;;  %v804_v48 = vld [vmem:[%s4933_s2 + $0xc8] sm:$0xff] }
  0x40   : > { %v799_v56 = vld [vmem:[%s4933_s2 + $0xa0] sm:$0xff] }
  0x41   : > { %1771 = vmatpush.bf16.msrb.mxu3 %v3801_v59  ;;  %v4369_v59 = vld [vmem:[%s6962_s6 + $0x104] sm:$0xf0]  ;;  %v807_v57 = vld [vmem:[%s4933_s2 + $0xe0] sm:$0xff] }
  0x42   : > { %v3817_v62 = vor.u32 %v4369_v59, %v3816_v58  ;;  %719 = vmatpush.bf16.msra.mxu1 %v4334_v61  ;;  %v5199_v58 = vpack.c.bf16 %v807_v57, %v799_v56  ;;  %v844_v56 = vld [vmem:[%s4933_s2 + $0x208] sm:$0xff] }
  0x43   : > { %1918 = vmatpush.bf16.msrb.mxu2 %v3993_v55  ;;  %v805_v55 = vld [vmem:[%s4933_s2 + $0xd0] sm:$0xff]  ;;  %v852_v57 = vld [vmem:[%s4933_s2 + $0x248] sm:$0xff] }
  0x44   : > { %3656 = vmatmul.msk.bf16.gmra.mxu0 %vm551_vm1, %v540_v37  ;;  %v3752_v37 = vld [vmem:[%s6962_s6 + $0x80] sm:$0xf]  ;;  %v5201_v59 = vpack.c.bf16 %v805_v55, %v797_v54  ;;  %v3904_v54 = vld [vmem:[%s6962_s6 + $0x1b0] sm:$0xf]  ;;  %v4391_v55 = vld [vmem:[%s6962_s6 + $0x1b4] sm:$0xf0] }
  0x45   : > { %1772 = vmatpush.bf16.msrb.mxu3 %v3793_v3  ;;  %v3753_v42 = vor.u32 %v4353_v38, %v3752_v37  ;;  %v3976_v3 = vld [vmem:[%s6962_s6 + $0x240] sm:$0xf] }
  0x46   : > { %v3977_v6 = vor.u32 %v4409_v4, %v3976_v3  ;;  %720 = vmatpush.bf16.msra.mxu1 %v4333_v5  ;;  %v783_v37 = vld [vmem:[%s4933_s2 + $0x20] sm:$0xff]  ;;  %v4395_v3 = vld [vmem:[%s6962_s6 + $0x1d4] sm:$0xf0]  ;;  %v812_v4 = vld [vmem:[%s4933_s2 + $0x108] sm:$0xff] }
  0x47   : > { %1919 = vmatpush.bf16.msrb.mxu2 %v3985_v1  ;;  %v791_v38 = vld [vmem:[%s4933_s2 + $0x60] sm:$0xff]  ;;  %v3920_v1 = vld [vmem:[%s6962_s6 + $0x1d0] sm:$0xf]  ;;  %v820_v5 = vld [vmem:[%s4933_s2 + $0x148] sm:$0xff] }
  0x49   : > { %1773 = vmatpush.bf16.msrb.mxu3 %v3785_v8  ;;  %v537_v8 = vld [vmem:[%s4898_s30 + $0x78] sm:$0xff]  ;;  %s6889_s30 = scalar_lea.vmem [#allocation2], %s3648_s26 }
  0x4a   : > { %v545_v14 = vpack.c.bf16 %v537_v8, %v536_v7  ;;  %721 = vmatpush.bf16.msra.mxu1 %v4332_v15  ;;  %v823_v15 = vld [vmem:[%s4933_s2 + $0x160] sm:$0xff]  ;;  %s3567_s20 = sshll.u32 %s6889_s30, 4  ;;  %s3568_s20 = int_to_ptr.vmem [resolvable:$true] %s3567_s20 }
  0x4b   : > { %1920 = vmatpush.bf16.msrb.mxu2 %v3977_v6  ;;  %v3921_v6 = vor.u32 %v4395_v3, %v3920_v1  ;;  %v5271_v1 = vpack.c.bf16 %v852_v57, %v844_v56 }
  0x4c   : > { %1744 = vmatmul.bf16.gmra.mxu3 %v4952_v40 }
  0x4d   : > { %1774 = vmatpush.bf16.msrb.mxu3 %v3777_v13  ;;  %v4407_v13 = vld [vmem:[%s6962_s6 + $0x234] sm:$0xf0] }
  0x4e   : > { %v3969_v16 = vor.u32 %v4407_v13, %v3968_v12  ;;  %1868 = vmatpush.bf16.msrb.mxu1 %v3937_v24  ;;  %v813_v12 = vld [vmem:[%s4933_s2 + $0x110] sm:$0xff]  ;;  %v4393_v24 = vld [vmem:[%s6962_s6 + $0x1c4] sm:$0xf0] }
  0x4f   : > { %v821_v13 = vld [vmem:[%s4933_s2 + $0x150] sm:$0xff] }
  0x50   : > { %1921 = vmatpush.bf16.msrb.mxu2 %v3969_v16  ;;  %v5227_v18 = vpack.c.bf16 %v821_v13, %v813_v12 }
  0x51   : > { %1775 = vmatpush.bf16.msrb.mxu3 %v3769_v22  ;;  %v780_v22 = vld [vmem:[%s4933_s2 + $0x8] sm:$0xff] }
  0x54   : > { %3657 = vmatmul.msk.bf16.gmra.mxu0 %vm551_vm1, %v541_v43  ;;  %v4373_v43 = vld [vmem:[%s6962_s6 + $0x124] sm:$0xf0]  ;;  %1922 = vmatpush.bf16.msrb.mxu2 %v3961_v19 }
  0x55   : > { %1776 = vmatpush.bf16.msrb.mxu3 %v3761_v29  ;;  %v3833_v47 = vor.u32 %v4373_v43, %v3832_v39  ;;  %v5158_v29 = vpack.c.bf16 %v788_v23, %v780_v22  ;;  %v5171_v39 = vpack.c.bf16 %v791_v38, %v783_v37  ;;  %v5179_v43 = vld [vmem:[%s6959_s3] ss:$0 sm:$0xff]  ;;  %v829_v37 = vld [vmem:[%s4933_s2 + $0x190] sm:$0xff] }
  0x56   : > { %v3912_v23 = vld [vmem:[%s6962_s6 + $0x1c0] sm:$0xf]  ;;  %v837_v38 = vld [vmem:[%s4933_s2 + $0x1d0] sm:$0xff] }
  0x57   : > { %1824 = vmatpush.bf16.msrb.mxu0 %v3833_v47  ;;  %v796_v47 = vld [vmem:[%s4933_s2 + $0x88] sm:$0xff] }
  0x58   : > { %1923 = vmatpush.bf16.msrb.mxu2 %v3953_v27  ;;  %v5191_v52 = vpack.c.bf16 %v804_v48, %v796_v47  ;;  %v3913_v27 = vor.u32 %v4393_v24, %v3912_v23  ;;  %v5255_v48 = vpack.c.bf16 %v837_v38, %v829_v37  ;;  %v868_v23 = vld [vmem:[%s4933_s2 + $0x2c8] sm:$0xff]  ;;  %v869_v37 = vld [vmem:[%s4933_s2 + $0x2d0] sm:$0xff]  ;;  %v863_v38 = vld [vmem:[%s4933_s2 + $0x2a0] sm:$0xff] }
  0x59   : > { %1777 = vmatpush.bf16.msrb.mxu3 %v3753_v42 }
  0x5c   : > { %1749 = vmatmul.bf16.gmra.mxu3 %v4960_v46  ;;  %1924 = vmatpush.bf16.msrb.mxu2 %v3945_v32 }
  0x64   : > { %3658 = vmatmul.msk.bf16.gmra.mxu0 %vm551_vm1, %v542_v49  ;;  %v3824_v49 = vld [vmem:[%s6962_s6 + $0x110] sm:$0xf] }
  0x65   : > { %v3825_v53 = vor.u32 %v4371_v50, %v3824_v49  ;;  %v3929_v49 = vor.u32 %v4397_v45, %v3928_v44  ;;  %v839_v44 = vld [vmem:[%s4933_s2 + $0x1e0] sm:$0xff] }
  0x67   : > { %1825 = vmatpush.bf16.msrb.mxu0 %v3825_v53  ;;  %1869 = vmatpush.bf16.msrb.mxu1 %v3929_v49 }
  0x6b   : > { %1826 = vmatpush.bf16.msrb.mxu0 %v3817_v62  ;;  %1870 = vmatpush.bf16.msrb.mxu1 %v3921_v6  ;;  %v847_v6 = vld [vmem:[%s4933_s2 + $0x220] sm:$0xff] }
  0x6c   : > { %1754 = vmatmul.bf16.gmra.mxu3 %v4998_v2 }
  0x6f   : > { %1871 = vmatpush.bf16.msrb.mxu1 %v3913_v27 }
  0x74   : > { %3659 = vmatmul.msk.bf16.gmra.mxu0 %vm551_vm1, %v543_v9  ;;  %v795_v9 = vld [vmem:[%s4933_s2 + $0x80] sm:$0xff] }
  0x75   : > { %v5125_v11 = vpack.c.bf16 %v803_v10, %v795_v9  ;;  %v5215_v9 = vpack.c.bf16 %v820_v5, %v812_v4  ;;  %v845_v4 = vld [vmem:[%s4933_s2 + $0x210] sm:$0xff] }
  0x76   : > { %v853_v5 = vld [vmem:[%s4933_s2 + $0x250] sm:$0xff] }
  0x77   : > { %1734 = vmatmul.bf16.gmra.mxu2 %v5125_v11  ;;  %v5283_v12 = vpack.c.bf16 %v853_v5, %v845_v4  ;;  %v876_v4 = vld [vmem:[%s4933_s2 + $0x308] sm:$0xff] }
  0x78   : > { %v884_v5 = vld [vmem:[%s4933_s2 + $0x348] sm:$0xff] }
  0x7c   : > { %1759 = vmatmul.bf16.gmra.mxu3 %v5048_v28 }
  0x84   : > { %3660 = vmatmul.msk.bf16.gmra.mxu0 %vm551_vm1, %v544_v41  ;;  %v5173_v41 = vpack.c.bf16 %v789_v35, %v781_v33  ;;  %v5243_v33 = vpack.c.bf16 %v836_v26, %v828_v25 }
  0x87   : > { %1925 = vmatmul.bf16.vlgmr.msrb.gmra.mxu2 %v5171_v39 }
  0x8c   : > { %1764 = vmatmul.bf16.gmra.mxu3 %v5109_v0 }
  0x94   : > { %3661 = vmatmul.msk.bf16.gmra.mxu0 %vm551_vm1, %v545_v14  ;;  %v815_v14 = vld [vmem:[%s4933_s2 + $0x120] sm:$0xff] }
  0x95   : > { %v5223_v16 = vpack.c.bf16 %v823_v15, %v815_v14 }
  0x97   : > { %1930 = vmatmul.bf16.gmra.mxu2 %v5199_v58 }
  0x9c   : > { %1778 = vmatmul.bf16.vlgmr.msrb.gmra.mxu3 %v5158_v29 }
  0xa1   : > { %v589_v42 = vpop.f32.mrf.mxu0 }
  0xa2   : > { %v590_v50 = vadd.f32 %v5179_v43, %v589_v42  ;;  %v831_v42 = vld [vmem:[%s4933_s2 + $0x1a0] sm:$0xff] }
  0xa3   : > { %v5251_v45 = vpack.c.bf16 %v839_v44, %v831_v42  ;;  %v871_v42 = vld [vmem:[%s4933_s2 + $0x2e0] sm:$0xff] }
  0xa4   : > { %1827 = vmatmul.bf16.vlgmr.msrb.gmra.mxu0 %v5173_v41  ;;  %4547 = vtanh.f32 %v590_v50  ;;  %v5307_v44 = vpack.c.bf16 %v871_v42, %v863_v38  ;;  %v4040_v38 = vld [vmem:[%s6962_s6 + $0x2c0] sm:$0xf]  ;;  %v4425_v42 = vld [vmem:[%s6962_s6 + $0x2c4] sm:$0xf0] }
  0xa7   : > { %1935 = vmatmul.bf16.gmra.mxu2 %v5223_v16 }
  0xa9   : > { %v591_v51 = vpop.f32.mrf.mxu0 }
  0xaa   : > { %v592_v53 = vadd.f32 %v5179_v43, %v591_v51  ;;  %v4548_v60 = vpop.eup %4547 }
  0xac   : > { %4549 = vtanh.f32 %v592_v53  ;;  %1783 = vmatmul.bf16.gmra.mxu3 %v5191_v52 }
  0xb1   : > { %v594_v61 = vpop.f32.mrf.mxu0 }
  0xb2   : > { %v4550_v62 = vpop.eup %4549  ;;  %v595_v7 = vadd.f32 %v5179_v43, %v594_v61 }
  0xb3   : > { %v645_v63 = vpack.c.bf16 %v4550_v62, %v4548_v60  ;;  %v3905_v60 = vor.u32 %v4391_v55, %v3904_v54  ;;  %v4064_v54 = vld [vmem:[%s6962_s6 + $0x2f0] sm:$0xf]  ;;  %v4431_v55 = vld [vmem:[%s6962_s6 + $0x2f4] sm:$0xf0] }
  0xb4   : > { %1832 = vmatmul.bf16.gmra.mxu0 %v5201_v59  ;;  %4551 = vtanh.f32 %v595_v7  ;;  %v855_v7 = vld [vmem:[%s4933_s2 + $0x260] sm:$0xff]  ;;  %v4065_v57 = vor.u32 %v4431_v55, %v4064_v54 }
  0xb5   : > { %3678 = vmatmul.msk.bf16.vlgmr.msra.gmra.mxu1 %vm689_vm2, %v645_v63  ;;  %v879_v54 = vld [vmem:[%s4933_s2 + $0x320] sm:$0xff] }
  0xb6   : > { %1872 = vmatpush.bf16.msrb.mxu1 %v3905_v60  ;;  %1966 = vmatpush.bf16.msra.mxu3 %v4065_v57  ;;  %v887_v55 = vld [vmem:[%s4933_s2 + $0x360] sm:$0xff] }
  0xb7   : > { %1940 = vmatmul.bf16.gmra.mxu2 %v5251_v45 }
  0xb9   : > { %v596_v8 = vpop.f32.mrf.mxu0 }
  0xba   : > { %v597_v10 = vadd.f32 %v5179_v43, %v596_v8  ;;  %v4552_v19 = vpop.eup %4551  ;;  %v5279_v8 = vpack.c.bf16 %v855_v7, %v847_v6  ;;  %v4429_v7 = vld [vmem:[%s6962_s6 + $0x2e4] sm:$0xf0] }
  0xbc   : > { %4553 = vtanh.f32 %v597_v10  ;;  %1788 = vmatmul.bf16.gmra.mxu3 %v5215_v9 }
  0xbf   : > { %v5225_v17 = vpop.f32.mrf.mxu3 }
  0xc1   : > { %v599_v20 = vpop.f32.mrf.mxu0 }
  0xc2   : > { %v4554_v21 = vpop.eup %4553  ;;  %v600_v30 = vadd.f32 %v5179_v43, %v599_v20  ;;  %v3896_v20 = vld [vmem:[%s6962_s6 + $0x1a0] sm:$0xf] }
  0xc3   : > { %v646_v22 = vpack.c.bf16 %v4554_v21, %v4552_v19  ;;  %v4389_v21 = vld [vmem:[%s6962_s6 + $0x1a4] sm:$0xf0] }
  0xc4   : > { %1837 = vmatmul.bf16.gmra.mxu0 %v5227_v18  ;;  %4555 = vtanh.f32 %v600_v30  ;;  %v3897_v24 = vor.u32 %v4389_v21, %v3896_v20  ;;  %v5339_v20 = vpack.c.bf16 %v884_v5, %v876_v4  ;;  %v4048_v21 = vld [vmem:[%s6962_s6 + $0x2d0] sm:$0xf]  ;;  %v4423_v5 = vld [vmem:[%s6962_s6 + $0x2b4] sm:$0xf0] }
  0xc5   : > { %3679 = vmatmul.msk.bf16.gmra.mxu1 %vm689_vm2, %v646_v22  ;;  %v860_v22 = vld [vmem:[%s4933_s2 + $0x288] sm:$0xff] }
  0xc6   : > { %1873 = vmatpush.bf16.msrb.mxu1 %v3897_v24  ;;  %v5299_v30 = vpack.c.bf16 %v868_v23, %v860_v22  ;;  %v4427_v22 = vld [vmem:[%s6962_s6 + $0x2d4] sm:$0xf0]  ;;  %v4128_v23 = vld [vmem:[%s6962_s6 + $0x370] sm:$0xf] }
  0xc7   : > { %v5241_v31 = vpop.f32.mrf.mxu3  ;;  %1945 = vmatmul.bf16.gmra.mxu2 %v5279_v8 }
  0xc9   : > { %v601_v32 = vpop.f32.mrf.mxu0 }
  0xca   : > { %v602_v35 = vadd.f32 %v5179_v43, %v601_v32  ;;  %v4556_v49 = vpop.eup %4555 }
  0xcc   : > { %4557 = vtanh.f32 %v602_v35  ;;  %1793 = vmatmul.bf16.gmra.mxu3 %v5243_v33  ;;  %v861_v35 = vld [vmem:[%s4933_s2 + $0x290] sm:$0xff] }
  0xcf   : > { %v5253_v47 = vpop.f32.mrf.mxu3 }
  0xd1   : > { %v604_v50 = vpop.f32.mrf.mxu0 }
  0xd2   : > { %v4558_v51 = vpop.eup %4557  ;;  %v605_v61 = vadd.f32 %v5179_v43, %v604_v50  ;;  %v5311_v50 = vpack.c.bf16 %v869_v37, %v861_v35  ;;  %v885_v35 = vld [vmem:[%s4933_s2 + $0x350] sm:$0xff] }
  0xd3   : > { %v647_v53 = vpack.c.bf16 %v4558_v51, %v4556_v49 }
  0xd4   : > { %1842 = vmatmul.bf16.gmra.mxu0 %v5255_v48  ;;  %4559 = vtanh.f32 %v605_v61  ;;  %v3888_v61 = vld [vmem:[%s6962_s6 + $0x190] sm:$0xf] }
  0xd5   : > { %3680 = vmatmul.msk.bf16.gmra.mxu1 %vm689_vm2, %v647_v53 }
  0xd7   : > { %v5269_v62 = vpop.f32.mrf.mxu3  ;;  %1950 = vmatmul.bf16.gmra.mxu2 %v5307_v44 }
  0xd9   : > { %v606_v63 = vpop.f32.mrf.mxu0 }
  0xda   : > { %v607_v3 = vadd.f32 %v5179_v43, %v606_v63  ;;  %v4560_v13 = vpop.eup %4559  ;;  %v4387_v63 = vld [vmem:[%s6962_s6 + $0x194] sm:$0xf0] }
  0xdb   : > { %v3889_v6 = vor.u32 %v4387_v63, %v3888_v61  ;;  %v4350_v61 = vld [vmem:[%s6962_s6 + $0x74] sm:$0xf]  ;;  %v3746_v63 = vld [vmem:[%s6962_s6 + $0x78] sm:$0xf0] }
  0xdc   : > { %4561 = vtanh.f32 %v607_v3  ;;  %1798 = vmatmul.bf16.gmra.mxu3 %v5271_v1  ;;  %v4056_v3 = vld [vmem:[%s6962_s6 + $0x2e0] sm:$0xf]  ;;  %v3749_v4 = vor.u32 %v4350_v61, %v3746_v63  ;;  %v4441_v61 = vld [vmem:[%s6962_s6 + $0x344] sm:$0xf0] }
  0xdd   : > { %1874 = vmatpush.bf16.msrb.mxu1 %v3889_v6  ;;  %v4112_v6 = vld [vmem:[%s6962_s6 + $0x350] sm:$0xf] }
  0xde   : > { %2113 = vmatpush.bf16.msra.mxu2 %v3749_v4 }
  0xdf   : > { %v5281_v10 = vpop.f32.mrf.mxu3 }
  0xe1   : > { %v609_v14 = vpop.f32.mrf.mxu0 }
  0xe2   : > { %v4562_v15 = vpop.eup %4561  ;;  %v610_v25 = vadd.f32 %v5179_v43, %v609_v14  ;;  %v4057_v14 = vor.u32 %v4429_v7, %v4056_v3  ;;  %v4032_v3 = vld [vmem:[%s6962_s6 + $0x2b0] sm:$0xf]  ;;  %v4443_v7 = vld [vmem:[%s6962_s6 + $0x354] sm:$0xf0] }
  0xe3   : > { %v648_v19 = vpack.c.bf16 %v4562_v15, %v4560_v13 }
  0xe4   : > { %1847 = vmatmul.bf16.gmra.mxu0 %v5283_v12  ;;  %4563 = vtanh.f32 %v610_v25  ;;  %1967 = vmatpush.bf16.msra.mxu3 %v4057_v14  ;;  %v4049_v25 = vor.u32 %v4427_v22, %v4048_v21  ;;  %v4113_v22 = vor.u32 %v4443_v7, %v4112_v6  ;;  %v3730_v6 = vld [vmem:[%s6962_s6 + $0x58] sm:$0xf0]  ;;  %v4016_v7 = vld [vmem:[%s6962_s6 + $0x290] sm:$0xf] }
  0xe5   : > { %3681 = vmatmul.msk.bf16.gmra.mxu1 %vm689_vm2, %v648_v19 }
  0xe7   : > { %v5297_v26 = vpop.f32.mrf.mxu3 }
  0xe8   : > { %1968 = vmatpush.bf16.msra.mxu3 %v4049_v25 }
  0xe9   : > { %v611_v27 = vpop.f32.mrf.mxu0 }
  0xea   : > { %v612_v32 = vadd.f32 %v5179_v43, %v611_v27  ;;  %v4564_v51 = vpop.eup %4563  ;;  %v4447_v27 = vld [vmem:[%s6962_s6 + $0x374] sm:$0xf0] }
  0xeb   : > { %v4129_v37 = vor.u32 %v4447_v27, %v4128_v23  ;;  %v4348_v27 = vld [vmem:[%s6962_s6 + $0x64] sm:$0xf] }
  0xec   : > { %4565 = vtanh.f32 %v612_v32  ;;  %1803 = vmatmul.bf16.gmra.mxu3 %v5299_v30  ;;  %v877_v32 = vld [vmem:[%s4933_s2 + $0x310] sm:$0xff] }
  0xed   : > { %2015 = vmatpush.bf16.msra.mxu0 %v4129_v37  ;;  %v5393_v14 = vpack.c.bf16 %v885_v35, %v877_v32  ;;  %v3738_v32 = vld [vmem:[%s6962_s6 + $0x68] sm:$0xf0] }
  0xee   : > { %v892_v35 = vld [vmem:[%s4933_s2 + $0x388] sm:$0xff] }
  0xef   : > { %v5309_v49 = vpop.f32.mrf.mxu3  ;;  %7027 = vst [vmem:[#allocation9_spill] sm:$0xff] %v5393_v14  ;;  %v900_v37 = vld [vmem:[%s4933_s2 + $0x3c8] sm:$0xff] }
  0xf1   : > { %v614_v53 = vpop.f32.mrf.mxu0 }
  0xf2   : > { %v4566_v56 = vpop.eup %4565  ;;  %v615_v13 = vadd.f32 %v5179_v43, %v614_v53  ;;  %v4445_v53 = vld [vmem:[%s6962_s6 + $0x364] sm:$0xf0] }
  0xf3   : > { %v649_v60 = vpack.c.bf16 %v4566_v56, %v4564_v51  ;;  %v4120_v51 = vld [vmem:[%s6962_s6 + $0x360] sm:$0xf]  ;;  %v4041_v56 = vor.u32 %v4425_v42, %v4040_v38  ;;  %v5405_v38 = vpop.f32.mrf.mxu2  ;;  %v3741_v42 = vor.u32 %v4348_v27, %v3738_v32  ;;  %v5447_v27 = vpack.c.bf16 %v900_v37, %v892_v35 }
  0xf4   : > { %1852 = vmatmul.bf16.gmra.mxu0 %v5311_v50  ;;  %4567 = vtanh.f32 %v615_v13  ;;  %v4121_v57 = vor.u32 %v4445_v53, %v4120_v51  ;;  %v3880_v51 = vld [vmem:[%s6962_s6 + $0x180] sm:$0xf]  ;;  %v4385_v53 = vld [vmem:[%s6962_s6 + $0x184] sm:$0xf0] }
  0xf5   : > { %3682 = vmatmul.msk.bf16.gmra.mxu1 %vm689_vm2, %v649_v60  ;;  %v5371_v60 = vpack.c.bf16 %v887_v55, %v879_v54  ;;  %1969 = vmatpush.bf16.msra.mxu3 %v4041_v56  ;;  %v4024_v54 = vld [vmem:[%s6962_s6 + $0x2a0] sm:$0xf]  ;;  %v3881_v55 = vor.u32 %v4385_v53, %v3880_v51  ;;  %v4421_v56 = vld [vmem:[%s6962_s6 + $0x2a4] sm:$0xf0]  ;;  %7028 = vst [vmem:[#allocation10_spill] sm:$0xff] %v5447_v27 }
  0xf6   : > { %2016 = vmatpush.bf16.msra.mxu0 %v4121_v57  ;;  %2114 = vmatpush.bf16.msra.mxu2 %v3741_v42  ;;  %v4104_v57 = vld [vmem:[%s6962_s6 + $0x340] sm:$0xf]  ;;  %v4344_v42 = vld [vmem:[%s6962_s6 + $0x44] sm:$0xf]  ;;  %v3722_v51 = vld [vmem:[%s6962_s6 + $0x48] sm:$0xf0] }
  0xf7   : > { %v5337_v15 = vpop.f32.mrf.mxu3  ;;  %1955 = vmatmul.bf16.gmra.mxu2 %v5371_v60  ;;  %v4105_v4 = vor.u32 %v4441_v61, %v4104_v57  ;;  %1875 = vmatpush.bf16.msrb.mxu1 %v3881_v55  ;;  %v3725_v35 = vor.u32 %v4344_v42, %v3722_v51  ;;  %v4008_v37 = vld [vmem:[%s6962_s6 + $0x280] sm:$0xf]  ;;  %v4417_v57 = vld [vmem:[%s6962_s6 + $0x284] sm:$0xf0] }
  0xf8   : > { %v4088_v55 = vld [vmem:[%s6962_s6 + $0x320] sm:$0xf] }
  0xf9   : > { %v616_v19 = vpop.f32.mrf.mxu0  ;;  %v895_v61 = vld [vmem:[%s4933_s2 + $0x3a0] sm:$0xff] }
  0xfa   : > { %v617_v24 = vadd.f32 %v5179_v43, %v616_v19  ;;  %v4568_v19 = vpop.eup %4567  ;;  %2017 = vmatpush.bf16.msra.mxu0 %v4113_v22 }
  0xfc   : > { %4569 = vtanh.f32 %v617_v24  ;;  %1808 = vmatmul.bf16.gmra.mxu3 %v5339_v20  ;;  %v4033_v24 = vor.u32 %v4423_v5, %v4032_v3  ;;  %v4025_v3 = vor.u32 %v4421_v56, %v4024_v54  ;;  %v4346_v5 = vld [vmem:[%s6962_s6 + $0x54] sm:$0xf]  ;;  %v4437_v56 = vld [vmem:[%s6962_s6 + $0x324] sm:$0xf0] }
  0xfd   : > { %v3733_v22 = vor.u32 %v4346_v5, %v3730_v6  ;;  %v901_v5 = vld [vmem:[%s4933_s2 + $0x3d0] sm:$0xff]  ;;  %v5473_v6 = vpop.f32.mrf.mxu2 }
  0xfe   : > { %1970 = vmatpush.bf16.msra.mxu3 %v4033_v24  ;;  %v4439_v24 = vld [vmem:[%s6962_s6 + $0x334] sm:$0xf0]  ;;  %2018 = vmatpush.bf16.msra.mxu0 %v4105_v4  ;;  %v893_v4 = vld [vmem:[%s4933_s2 + $0x390] sm:$0xff] }
  0xff   : > { %v5391_v13 = vpop.f32.mrf.mxu3  ;;  %2115 = vmatpush.bf16.msra.mxu2 %v3733_v22  ;;  %v4009_v22 = vor.u32 %v4417_v57, %v4008_v37  ;;  %v3706_v57 = vld [vmem:[%s6962_s6 + $0x28] sm:$0xf0] }
 0x101   : > { %v619_v21 = vpop.f32.mrf.mxu0 }
 0x102   : > { %v4570_v23 = vpop.eup %4569  ;;  %v620_v63 = vadd.f32 %v5179_v43, %v619_v21  ;;  %v4419_v21 = vld [vmem:[%s6962_s6 + $0x294] sm:$0xf0]  ;;  %1971 = vmatpush.bf16.msra.mxu3 %v4025_v3  ;;  %v903_v3 = vld [vmem:[%s4933_s2 + $0x3e0] sm:$0xff] }
 0x103   : > { %v650_v25 = vpack.c.bf16 %v4570_v23, %v4568_v19  ;;  %v4096_v23 = vld [vmem:[%s6962_s6 + $0x330] sm:$0xf]  ;;  %v4017_v54 = vor.u32 %v4419_v21, %v4016_v7  ;;  %v4089_v7 = vor.u32 %v4437_v56, %v4088_v55  ;;  %2116 = vmatpush.bf16.msra.mxu2 %v3725_v35  ;;  %v5475_v21 = vpack.c.bf16 %v903_v3, %v895_v61  ;;  %v4340_v56 = vld [vmem:[%s6962_s6 + $0x24] sm:$0xf] }
 0x104   : > { %1857 = vmatmul.bf16.gmra.mxu0 %v5393_v14  ;;  %v4097_v32 = vor.u32 %v4439_v24, %v4096_v23  ;;  %4571 = vtanh.f32 %v620_v63  ;;  %v4342_v63 = vld [vmem:[%s6962_s6 + $0x34] sm:$0xf]  ;;  %v3714_v23 = vld [vmem:[%s6962_s6 + $0x38] sm:$0xf0]  ;;  %v3709_v61 = vor.u32 %v4340_v56, %v3706_v57  ;;  %v4160_v3 = vld [vmem:[%s6962_s6 + $0x3b0] sm:$0xf] }
 0x105   : > { %3683 = vmatmul.msk.bf16.gmra.mxu1 %vm689_vm2, %v650_v25  ;;  %7029 = vst [vmem:[#allocation11_spill] sm:$0xff] %v5475_v21  ;;  %v3717_v42 = vor.u32 %v4342_v63, %v3714_v23  ;;  %v4433_v23 = vld [vmem:[%s6962_s6 + $0x304] sm:$0xf0] }
 0x106   : > { %2019 = vmatpush.bf16.msra.mxu0 %v4097_v32  ;;  %1972 = vmatpush.bf16.msra.mxu3 %v4017_v54  ;;  %v4435_v54 = vld [vmem:[%s6962_s6 + $0x314] sm:$0xf0] }
 0x107   : > { %v5436_v19 = vpop.f32.mrf.mxu3  ;;  %1960 = vmatmul.bf16.gmra.mxu2 %v5475_v21 }
 0x108   : > { %2117 = vmatpush.bf16.msra.mxu2 %v3717_v42 }
 0x109   : > { %v621_v25 = vpop.f32.mrf.mxu0 }
 0x10a   : > { %v622_v53 = vadd.f32 %v5179_v43, %v621_v25  ;;  %v5485_v25 = vpack.c.bf16 %v901_v5, %v893_v4  ;;  %v4572_v32 = vpop.eup %4571  ;;  %2020 = vmatpush.bf16.msra.mxu0 %v4089_v7  ;;  %1973 = vmatpush.bf16.msra.mxu3 %v4009_v22  ;;  %v4455_v4 = vld [vmem:[%s6962_s6 + $0x3b4] sm:$0xf0]  ;;  %v4072_v5 = vld [vmem:[%s6962_s6 + $0x300] sm:$0xf]  ;;  %v784_v7 = vld [vmem:[%s4933_s2 + $0x28] sm:$0xff] }
 0x10b   : > { %v792_v22 = vld [vmem:[%s4933_s2 + $0x68] sm:$0xff]  ;;  %v4161_v63 = vor.u32 %v4455_v4, %v4160_v3  ;;  %v4336_v4 = vld [vmem:[%s6962_s6 + $0x4] sm:$0xf] }
 0x10c   : > { %4573 = vtanh.f32 %v622_v53  ;;  %1813 = vmatmul.bf16.gmra.mxu3 %v5447_v27  ;;  %7030 = vst [vmem:[#allocation12_spill] sm:$0xff] %v5485_v25  ;;  %v4080_v53 = vld [vmem:[%s6962_s6 + $0x310] sm:$0xf]  ;;  %2118 = vmatpush.bf16.msra.mxu2 %v3709_v61  ;;  %v5528_v57 = vpack.c.bf16 %v792_v22, %v784_v7  ;;  %v854_v27 = vld [vmem:[%s4933_s2 + $0x258] sm:$0xff] }
 0x10d   : > { %v4081_v37 = vor.u32 %v4435_v54, %v4080_v53  ;;  %v4073_v53 = vor.u32 %v4433_v23, %v4072_v5  ;;  %v4338_v54 = vld [vmem:[%s6962_s6 + $0x14] sm:$0xf]  ;;  %2068 = vmatpush.bf16.msra.mxu1 %v4161_v63  ;;  %v3690_v5 = vld [vmem:[%s6962_s6 + $0x8] sm:$0xf0] }
 0x10e   : > { %7031 = vst [vmem:[#allocation13_spill] sm:$0xff] %v5528_v57  ;;  %v3693_v63 = vor.u32 %v4336_v4, %v3690_v5  ;;  %v793_v22 = vld [vmem:[%s4933_s2 + $0x70] sm:$0xff]  ;;  %v800_v4 = vld [vmem:[%s4933_s2 + $0xa8] sm:$0xff] }
 0x10f   : > { %v5483_v24 = vpop.f32.mrf.mxu3  ;;  %2021 = vmatpush.bf16.msra.mxu0 %v4081_v37  ;;  %v1091_v37 = vld [vmem:[%s6963_s7] sm:$0x3]  ;;  %v808_v5 = vld [vmem:[%s4933_s2 + $0xe8] sm:$0xff] }
 0x110   : > { %v5531_v3 = vperm.slane %v1091_v37, 0 }
 0x111   : > { %v624_v51 = vpop.f32.mrf.mxu0 }
 0x112   : > { %v4574_v35 = vpop.eup %4573  ;;  %v625_v42 = vadd.f32 %v5179_v43, %v624_v51  ;;  %v1731_v7 = vadd.f32 %v5405_v38, %v5531_v3  ;;  %v1761_v14 = vadd.f32 %v5391_v13, %v5531_v3 }
 0x113   : > { %v651_v55 = vpack.c.bf16 %v4574_v35, %v4572_v32  ;;  %v1735_v32 = vpop.f32.mrf.mxu2  ;;  %v3698_v35 = vld [vmem:[%s6962_s6 + $0x18] sm:$0xf0]  ;;  %2022 = vmatpush.bf16.msra.mxu0 %v4073_v53 }
 0x114   : > { %1862 = vmatmul.bf16.gmra.mxu0 %v5485_v25  ;;  %v3701_v51 = vor.u32 %v4338_v54, %v3698_v35  ;;  %4575 = vtanh.f32 %v625_v42  ;;  %v1741_v25 = vadd.f32 %v5225_v17, %v5531_v3 }
 0x115   : > { %3684 = vmatmul.msk.bf16.gmra.mxu1 %vm689_vm2, %v651_v55 }
 0x116   : > { %2119 = vmatpush.bf16.msra.mxu2 %v3701_v51 }
 0x117   : > { %v5526_v55 = vpop.f32.mrf.mxu3 }
 0x119   : > { %v626_v56 = vpop.f32.mrf.mxu0 }
 0x11a   : > { %v627_v61 = vadd.f32 %v5179_v43, %v626_v56  ;;  %v785_v43 = vld [vmem:[%s4933_s2 + $0x30] sm:$0xff]  ;;  %2120 = vmatpush.bf16.msra.mxu2 %v3693_v63  ;;  %v4576_v53 = vpop.eup %4575 }
 0x11b   : > { %v5544_v42 = vpack.c.bf16 %v793_v22, %v785_v43  ;;  %v1737_v37 = vpop.f32.mrf.mxu2 }
 0x11c   : > { %4577 = vtanh.f32 %v627_v61  ;;  %1974 = vmatmul.bf16.vlgmr.msra.gmra.mxu3 %v5528_v57  ;;  %v1733_v61 = vadd.f32 %v5473_v6, %v5531_v3 }
 0x11d   : > { %7032 = vst [vmem:[#allocation14_spill] sm:$0xff] %v5544_v42  ;;  %2121 = vmatmul.bf16.vlgmr.msra.gmra.mxu2 %v5055_v36  ;;  %v5555_v36 = vpack.c.bf16 %v808_v5, %v800_v4 }
 0x11f   : > { %v1779_v23 = vpop.f32.mrf.mxu3  ;;  %7033 = vst [vmem:[#allocation15_spill] sm:$0xff] %v5555_v36 }
 0x120   : > { %v1780_v54 = vadd.f32 %v1779_v23, %v1731_v7 }
 0x121   : > { %v1828_v35 = vpop.f32.mrf.mxu0 }
 0x122   : > { %v4578_v51 = vpop.eup %4577  ;;  %v5547_v38 = vadd.f32 %v1828_v35, %v1780_v54  ;;  %v801_v54 = vld [vmem:[%s4933_s2 + $0xb0] sm:$0xff] }
 0x123   : > { %v652_v56 = vpack.c.bf16 %v4578_v51, %v4576_v53  ;;  %v5559_v23 = vpop.f32.mrf.mxu2  ;;  %v1736_v53 = vadd.f32 %v1735_v32, %v5531_v3  ;;  %v809_v35 = vld [vmem:[%s4933_s2 + $0xf0] sm:$0xff]  ;;  %v782_v51 = vld [vmem:[%s4933_s2 + $0x18] sm:$0xff]  ;;  %v5577_v32 = vld [vmem:[%s6961_s5] ss:$0 sm:$0xff] }
 0x124   : > { %2023 = vmatmul.bf16.vlgmr.msra.gmra.mxu0 %v5544_v42  ;;  %v5567_v42 = vpack.c.bf16 %v809_v35, %v801_v54  ;;  %v816_v35 = vld [vmem:[%s4933_s2 + $0x128] sm:$0xff] }
 0x125   : > { %3685 = vmatmul.msk.bf16.gmra.mxu1 %vm689_vm2, %v652_v56  ;;  %v790_v56 = vld [vmem:[%s4933_s2 + $0x58] sm:$0xff] }
 0x126   : > { %7034 = vst [vmem:[#allocation16_spill] sm:$0xff] %v5567_v42 }
 0x127   : > { %v1781_v63 = vpop.f32.mrf.mxu3 }
 0x128   : > { %v1782_v7 = vadd.f32 %v1781_v63, %v1733_v61  ;;  %v5569_v61 = vpack.c.bf16 %v790_v56, %v782_v51  ;;  %v824_v51 = vld [vmem:[%s4933_s2 + $0x168] sm:$0xff] }
 0x129   : > { %v1830_v43 = vpop.f32.mrf.mxu0 }
 0x12a   : > { %v5557_v22 = vadd.f32 %v1830_v43, %v1782_v7  ;;  %7035 = vst [vmem:[#allocation17_spill] sm:$0xff] %v5569_v61  ;;  %v1738_v43 = vadd.f32 %v1737_v37, %v5531_v3 }
 0x12b   : > { %v5582_v54 = vpop.f32.mrf.mxu2 }
 0x12c   : > { %1979 = vmatmul.bf16.gmra.mxu3 %v5555_v36 }
 0x12d   : > { %2126 = vmatmul.bf16.gmra.mxu2 %v5125_v11  ;;  %v4453_v11 = vld [vmem:[%s6962_s6 + $0x3a4] sm:$0xf0] }
 0x12f   : > { %v1784_v6 = vpop.f32.mrf.mxu3 }
 0x130   : > { %v1785_v4 = vadd.f32 %v1784_v6, %v1736_v53  ;;  %v4152_v53 = vld [vmem:[%s6962_s6 + $0x3a0] sm:$0xf] }
 0x131   : > { %v1833_v5 = vpop.f32.mrf.mxu0  ;;  %v4153_v56 = vor.u32 %v4453_v11, %v4152_v53  ;;  %v825_v53 = vld [vmem:[%s4933_s2 + $0x170] sm:$0xff]  ;;  %v798_v11 = vld [vmem:[%s4933_s2 + $0x98] sm:$0xff] }
 0x132   : > { %v723_v63 = vpop.f32.mrf.mxu1  ;;  %v5572_v7 = vadd.f32 %v1833_v5, %v1785_v4 }
 0x133   : > { %v724_v6 = vadd.f32 %v5577_v32, %v723_v63  ;;  %2069 = vmatpush.bf16.msra.mxu1 %v4153_v56  ;;  %v817_v63 = vld [vmem:[%s4933_s2 + $0x130] sm:$0xff]  ;;  %v806_v56 = vld [vmem:[%s4933_s2 + $0xd8] sm:$0xff] }
 0x134   : > { %2028 = vmatmul.bf16.gmra.mxu0 %v5567_v42 }
 0x135   : > { %1876 = vmatmul.bf16.vlgmr.msrb.gmra.mxu1 %v5569_v61  ;;  %v5593_v61 = vpack.c.bf16 %v824_v51, %v816_v35  ;;  %4579 = vtanh.f32 %v724_v6  ;;  %v5607_v51 = vpack.c.bf16 %v825_v53, %v817_v63  ;;  %v1743_v63 = vadd.f32 %v5241_v31, %v5531_v3  ;;  %v840_v53 = vld [vmem:[%s4933_s2 + $0x1e8] sm:$0xff] }
 0x137   : > { %v1786_v37 = vpop.f32.mrf.mxu3  ;;  %7036 = vst [vmem:[#allocation18_spill] sm:$0xff] %v5593_v61 }
 0x138   : > { %v1787_v4 = vadd.f32 %v1786_v37, %v1738_v43  ;;  %v5605_v43 = vpop.f32.mrf.mxu2  ;;  %7037 = vst [vmem:[#allocation19_spill] sm:$0xff] %v5607_v51 }
 0x139   : > { %v1835_v5 = vpop.f32.mrf.mxu0 }
 0x13a   : > { %v725_v42 = vpop.f32.mrf.mxu1  ;;  %v5596_v57 = vadd.f32 %v1835_v5, %v1787_v4 }
 0x13b   : > { %v726_v36 = vadd.f32 %v5577_v32, %v725_v42  ;;  %v5609_v42 = vpack.c.bf16 %v806_v56, %v798_v11  ;;  %v5611_v4 = vpop.eup %4579 }
 0x13c   : > { %1984 = vmatmul.bf16.gmra.mxu3 %v5593_v61  ;;  %7039 = vst [vmem:[#allocation21_spill] sm:$0xff] %v5611_v4 }
 0x13d   : > { %4581 = vtanh.f32 %v726_v36  ;;  %7038 = vst [vmem:[#allocation20_spill] sm:$0xff] %v5609_v42  ;;  %2131 = vmatmul.bf16.gmra.mxu2 %v4944_v34 }
 0x13f   : > { %v1789_v35 = vpop.f32.mrf.mxu3 }
 0x140   : > { %v1790_v6 = vadd.f32 %v1789_v35, %v1741_v25  ;;  %v832_v25 = vld [vmem:[%s4933_s2 + $0x1a8] sm:$0xff] }
 0x141   : > { %v1838_v37 = vpop.f32.mrf.mxu0 }
 0x142   : > { %v728_v17 = vpop.f32.mrf.mxu1  ;;  %v5616_v5 = vadd.f32 %v1838_v37, %v1790_v6  ;;  %v5627_v6 = vpop.f32.mrf.mxu2  ;;  %v5629_v37 = vpack.c.bf16 %v840_v53, %v832_v25 }
 0x143   : > { %v5614_v36 = vpop.eup %4581  ;;  %v729_v34 = vadd.f32 %v5577_v32, %v728_v17  ;;  %v833_v17 = vld [vmem:[%s4933_s2 + $0x1b0] sm:$0xff] }
 0x144   : > { %7040 = vst [vmem:[#allocation22_spill] sm:$0xff] %v5614_v36  ;;  %2033 = vmatmul.bf16.gmra.mxu0 %v5607_v51  ;;  %v1746_v36 = vadd.f32 %v5253_v47, %v5531_v3 }
 0x145   : > { %1881 = vmatmul.bf16.gmra.mxu1 %v5609_v42  ;;  %7041 = vst [vmem:[#allocation23_spill] sm:$0xff] %v5629_v37  ;;  %4583 = vtanh.f32 %v729_v34  ;;  %v841_v42 = vld [vmem:[%s4933_s2 + $0x1f0] sm:$0xff] }
 0x146   : > { %v5641_v21 = vpack.c.bf16 %v841_v42, %v833_v17  ;;  %v848_v17 = vld [vmem:[%s4933_s2 + $0x228] sm:$0xff] }
 0x147   : > { %v1791_v11 = vpop.f32.mrf.mxu3 }
 0x148   : > { %v1792_v56 = vadd.f32 %v1791_v11, %v1743_v63  ;;  %v814_v63 = vld [vmem:[%s4933_s2 + $0x118] sm:$0xff]  ;;  %7042 = vst [vmem:[#allocation24_spill] sm:$0xff] %v5641_v21 }
 0x149   : > { %v1840_v35 = vpop.f32.mrf.mxu0  ;;  %v822_v11 = vld [vmem:[%s4933_s2 + $0x158] sm:$0xff] }
 0x14a   : > { %v730_v61 = vpop.f32.mrf.mxu1  ;;  %v5632_v4 = vadd.f32 %v1840_v35, %v1792_v56  ;;  %v5643_v25 = vpack.c.bf16 %v822_v11, %v814_v63  ;;  %v856_v63 = vld [vmem:[%s4933_s2 + $0x268] sm:$0xff] }
 0x14b   : > { %v731_v31 = vadd.f32 %v5577_v32, %v730_v61  ;;  %v5645_v34 = vpop.eup %4583 }
 0x14c   : > { %1989 = vmatmul.bf16.gmra.mxu3 %v5629_v37  ;;  %7043 = vst [vmem:[#allocation25_spill] sm:$0xff] %v5643_v25 }
 0x14d   : > { %4585 = vtanh.f32 %v731_v31  ;;  %7044 = vst [vmem:[#allocation26_spill] sm:$0xff] %v5645_v34  ;;  %2136 = vmatmul.bf16.gmra.mxu2 %v4952_v40  ;;  %v5652_v31 = vpop.f32.mrf.mxu2  ;;  %v4144_v40 = vld [vmem:[%s6962_s6 + $0x390] sm:$0xf]  ;;  %v5669_v34 = vpack.c.bf16 %v856_v63, %v848_v17  ;;  %v838_v17 = vld [vmem:[%s4933_s2 + $0x1d8] sm:$0xff] }
 0x14f   : > { %v1794_v51 = vpop.f32.mrf.mxu3  ;;  %7046 = vst [vmem:[#allocation28_spill] sm:$0xff] %v5669_v34 }
 0x150   : > { %v1795_v61 = vadd.f32 %v1794_v51, %v1746_v36  ;;  %v1748_v51 = vadd.f32 %v5269_v62, %v5531_v3  ;;  %v4451_v36 = vld [vmem:[%s6962_s6 + $0x394] sm:$0xf0] }
 0x151   : > { %v1843_v53 = vpop.f32.mrf.mxu0  ;;  %v4145_v11 = vor.u32 %v4451_v36, %v4144_v40  ;;  %v1751_v40 = vadd.f32 %v5281_v10, %v5531_v3 }
 0x152   : > { %v733_v56 = vpop.f32.mrf.mxu1  ;;  %v5650_v35 = vadd.f32 %v1843_v53, %v1795_v61 }
 0x153   : > { %v5648_v47 = vpop.eup %4585  ;;  %v734_v61 = vadd.f32 %v5577_v32, %v733_v56  ;;  %2070 = vmatpush.bf16.msra.mxu1 %v4145_v11  ;;  %v849_v56 = vld [vmem:[%s4933_s2 + $0x230] sm:$0xff] }
 0x154   : > { %7045 = vst [vmem:[#allocation27_spill] sm:$0xff] %v5648_v47  ;;  %2038 = vmatmul.bf16.gmra.mxu0 %v5641_v21  ;;  %v857_v11 = vld [vmem:[%s4933_s2 + $0x270] sm:$0xff] }
 0x155   : > { %1886 = vmatmul.bf16.gmra.mxu1 %v5643_v25  ;;  %4587 = vtanh.f32 %v734_v61  ;;  %v5676_v36 = vpop.f32.mrf.mxu2 }
 0x157   : > { %v1796_v53 = vpop.f32.mrf.mxu3 }
 0x158   : > { %v1797_v62 = vadd.f32 %v1796_v53, %v1748_v51  ;;  %v830_v51 = vld [vmem:[%s4933_s2 + $0x198] sm:$0xff]  ;;  %v5683_v53 = vpack.c.bf16 %v857_v11, %v849_v56  ;;  %v1753_v56 = vadd.f32 %v5297_v26, %v5531_v3  ;;  %v872_v11 = vld [vmem:[%s4933_s2 + $0x2e8] sm:$0xff] }
 0x159   : > { %v1845_v42 = vpop.f32.mrf.mxu0 }
 0x15a   : > { %v735_v47 = vpop.f32.mrf.mxu1  ;;  %v5672_v21 = vadd.f32 %v1845_v42, %v1797_v62  ;;  %7047 = vst [vmem:[#allocation29_spill] sm:$0xff] %v5683_v53 }
 0x15b   : > { %v736_v25 = vadd.f32 %v5577_v32, %v735_v47  ;;  %v5685_v47 = vpack.c.bf16 %v838_v17, %v830_v51  ;;  %v5687_v62 = vpop.eup %4587 }
 0x15c   : > { %1994 = vmatmul.bf16.gmra.mxu3 %v5669_v34  ;;  %7049 = vst [vmem:[#allocation31_spill] sm:$0xff] %v5687_v62 }
 0x15d   : > { %4589 = vtanh.f32 %v736_v25  ;;  %7048 = vst [vmem:[#allocation30_spill] sm:$0xff] %v5685_v47  ;;  %2141 = vmatmul.bf16.gmra.mxu2 %v4960_v46  ;;  %v5702_v46 = vpop.f32.mrf.mxu2 }
 0x15f   : > { %v1799_v63 = vpop.f32.mrf.mxu3 }
 0x160   : > { %v1800_v42 = vadd.f32 %v1799_v63, %v1751_v40  ;;  %v864_v40 = vld [vmem:[%s4933_s2 + $0x2a8] sm:$0xff] }
 0x161   : > { %v1848_v61 = vpop.f32.mrf.mxu0 }
 0x162   : > { %v738_v10 = vpop.f32.mrf.mxu1  ;;  %v5692_v34 = vadd.f32 %v1848_v61, %v1800_v42  ;;  %v5705_v61 = vpack.c.bf16 %v872_v11, %v864_v40 }
 0x163   : > { %v5690_v25 = vpop.eup %4589  ;;  %v739_v51 = vadd.f32 %v5577_v32, %v738_v10  ;;  %v846_v10 = vld [vmem:[%s4933_s2 + $0x218] sm:$0xff] }
 0x164   : > { %7050 = vst [vmem:[#allocation32_spill] sm:$0xff] %v5690_v25  ;;  %2043 = vmatmul.bf16.gmra.mxu0 %v5683_v53  ;;  %v1756_v25 = vadd.f32 %v5309_v49, %v5531_v3  ;;  %v873_v53 = vld [vmem:[%s4933_s2 + $0x2f0] sm:$0xff]  ;;  %v5719_v40 = vpack.c.bf16 %v854_v27, %v846_v10  ;;  %v1758_v10 = vadd.f32 %v5337_v15, %v5531_v3  ;;  %v3802_v15 = vld [vmem:[%s6962_s6 + $0xe8] sm:$0xf0] }
 0x165   : > { %1891 = vmatmul.bf16.gmra.mxu1 %v5685_v47  ;;  %7051 = vst [vmem:[#allocation33_spill] sm:$0xff] %v5705_v61  ;;  %4591 = vtanh.f32 %v739_v51  ;;  %v865_v47 = vld [vmem:[%s4933_s2 + $0x2b0] sm:$0xff]  ;;  %v3810_v51 = vld [vmem:[%s6962_s6 + $0xf8] sm:$0xf0] }
 0x166   : > { %7053 = vst [vmem:[#allocation35_spill] sm:$0xff] %v5719_v40  ;;  %v4366_v49 = vld [vmem:[%s6962_s6 + $0xf4] sm:$0xf] }
 0x167   : > { %v1801_v17 = vpop.f32.mrf.mxu3  ;;  %v3813_v27 = vor.u32 %v4366_v49, %v3810_v51  ;;  %v888_v49 = vld [vmem:[%s4933_s2 + $0x368] sm:$0xff] }
 0x168   : > { %v1802_v63 = vadd.f32 %v1801_v17, %v1753_v56  ;;  %v5717_v17 = vpack.c.bf16 %v873_v53, %v865_v47 }
 0x169   : > { %v1850_v42 = vpop.f32.mrf.mxu0  ;;  %2162 = vmatpush.bf16.msrb.mxu3 %v3813_v27 }
 0x16a   : > { %v740_v37 = vpop.f32.mrf.mxu1  ;;  %v5708_v62 = vadd.f32 %v1850_v42, %v1802_v63  ;;  %7052 = vst [vmem:[#allocation34_spill] sm:$0xff] %v5717_v17  ;;  %v5721_v63 = vpop.f32.mrf.mxu2 }
 0x16b   : > { %v741_v26 = vadd.f32 %v5577_v32, %v740_v37  ;;  %v5729_v42 = vpop.eup %4591 }
 0x16c   : > { %1999 = vmatmul.bf16.gmra.mxu3 %v5705_v61  ;;  %7054 = vst [vmem:[#allocation36_spill] sm:$0xff] %v5729_v42  ;;  %v889_v61 = vld [vmem:[%s4933_s2 + $0x370] sm:$0xff] }
 0x16d   : > { %4593 = vtanh.f32 %v741_v26  ;;  %2146 = vmatmul.bf16.gmra.mxu2 %v4998_v2  ;;  %v4136_v2 = vld [vmem:[%s6962_s6 + $0x380] sm:$0xf] }
 0x16f   : > { %v1804_v56 = vpop.f32.mrf.mxu3 }
 0x170   : > { %v1805_v11 = vadd.f32 %v1804_v56, %v1756_v25  ;;  %v4449_v56 = vld [vmem:[%s6962_s6 + $0x384] sm:$0xf0] }
 0x171   : > { %v1853_v37 = vpop.f32.mrf.mxu0  ;;  %v4137_v51 = vor.u32 %v4449_v56, %v4136_v2  ;;  %v4362_v2 = vld [vmem:[%s6962_s6 + $0xd4] sm:$0xf]  ;;  %v3794_v56 = vld [vmem:[%s6962_s6 + $0xd8] sm:$0xf0] }
 0x172   : > { %v743_v53 = vpop.f32.mrf.mxu1  ;;  %v5734_v25 = vadd.f32 %v1853_v37, %v1805_v11  ;;  %v4364_v11 = vld [vmem:[%s6962_s6 + $0xe4] sm:$0xf]  ;;  %v880_v37 = vld [vmem:[%s4933_s2 + $0x328] sm:$0xff] }
 0x173   : > { %v5732_v47 = vpop.eup %4593  ;;  %v3805_v27 = vor.u32 %v4364_v11, %v3802_v15  ;;  %v744_v26 = vadd.f32 %v5577_v32, %v743_v53  ;;  %2071 = vmatpush.bf16.msra.mxu1 %v4137_v51  ;;  %v4382_v53 = vld [vmem:[%s6962_s6 + $0x174] sm:$0xf]  ;;  %v3797_v51 = vor.u32 %v4362_v2, %v3794_v56  ;;  %v4360_v2 = vld [vmem:[%s6962_s6 + $0xc4] sm:$0xf]  ;;  %v870_v56 = vld [vmem:[%s4933_s2 + $0x2d8] sm:$0xff] }
 0x174   : > { %7055 = vst [vmem:[#allocation37_spill] sm:$0xff] %v5732_v47  ;;  %2048 = vmatmul.bf16.gmra.mxu0 %v5717_v17  ;;  %v5757_v17 = vpack.c.bf16 %v888_v49, %v880_v37  ;;  %v5774_v49 = vpop.f32.mrf.mxu2 }
 0x175   : > { %7056 = vst [vmem:[#allocation38_spill] sm:$0xff] %v5734_v25  ;;  %1896 = vmatmul.bf16.gmra.mxu1 %v5719_v40  ;;  %2163 = vmatpush.bf16.msrb.mxu3 %v3805_v27  ;;  %4595 = vtanh.f32 %v744_v26  ;;  %v881_v27 = vld [vmem:[%s4933_s2 + $0x330] sm:$0xff]  ;;  %v862_v26 = vld [vmem:[%s4933_s2 + $0x298] sm:$0xff] }
 0x176   : > { %7057 = vst [vmem:[#allocation39_spill] sm:$0xff] %v5757_v17  ;;  %v5803_v25 = vpack.c.bf16 %v870_v56, %v862_v26  ;;  %v3858_v26 = vld [vmem:[%s6962_s6 + $0x158] sm:$0xf0] }
 0x177   : > { %v1806_v42 = vpop.f32.mrf.mxu3 }
 0x178   : > { %v1807_v47 = vadd.f32 %v1806_v42, %v1758_v10  ;;  %v3874_v42 = vld [vmem:[%s6962_s6 + $0x178] sm:$0xf0]  ;;  %7060 = vst [vmem:[#allocation42_spill] sm:$0xff] %v5803_v25 }
 0x179   : > { %v1855_v40 = vpop.f32.mrf.mxu0  ;;  %v3877_v15 = vor.u32 %v4382_v53, %v3874_v42  ;;  %2164 = vmatpush.bf16.msrb.mxu3 %v3797_v51  ;;  %v3866_v53 = vld [vmem:[%s6962_s6 + $0x168] sm:$0xf0]  ;;  %v4414_v42 = vld [vmem:[%s6962_s6 + $0x274] sm:$0xf] }
 0x17a   : > { %v745_v11 = vpop.f32.mrf.mxu1  ;;  %v5772_v37 = vadd.f32 %v1855_v40, %v1807_v47  ;;  %v3786_v40 = vld [vmem:[%s6962_s6 + $0xc8] sm:$0xf0]  ;;  %v4380_v47 = vld [vmem:[%s6962_s6 + $0x164] sm:$0xf] }
 0x17b   : > { %v746_v10 = vadd.f32 %v5577_v32, %v745_v11  ;;  %2211 = vmatpush.bf16.msrb.mxu0 %v3877_v15  ;;  %v3789_v13 = vor.u32 %v4360_v2, %v3786_v40  ;;  %v3869_v11 = vor.u32 %v4380_v47, %v3866_v53  ;;  %v4358_v40 = vld [vmem:[%s6962_s6 + $0xb4] sm:$0xf]  ;;  %v3778_v47 = vld [vmem:[%s6962_s6 + $0xb8] sm:$0xf0] }
 0x17c   : > { %7058 = vst [vmem:[#allocation40_spill] sm:$0xff] %v5772_v37  ;;  %2004 = vmatmul.bf16.gmra.mxu3 %v5757_v17  ;;  %v5801_v17 = vpack.c.bf16 %v889_v61, %v881_v27  ;;  %v4378_v53 = vld [vmem:[%s6962_s6 + $0x154] sm:$0xf]  ;;  %v5814_v61 = vpop.eup %4595 }
 0x17d   : > { %4597 = vtanh.f32 %v746_v10  ;;  %v4002_v10 = vld [vmem:[%s6962_s6 + $0x278] sm:$0xf0]  ;;  %7061 = vst [vmem:[#allocation43_spill] sm:$0xff] %v5814_v61  ;;  %2165 = vmatpush.bf16.msrb.mxu3 %v3789_v13  ;;  %2151 = vmatmul.bf16.gmra.mxu2 %v5048_v28  ;;  %v3994_v28 = vld [vmem:[%s6962_s6 + $0x268] sm:$0xf0] }
 0x17e   : > { %7059 = vst [vmem:[#allocation41_spill] sm:$0xff] %v5801_v17  ;;  %v4005_v37 = vor.u32 %v4414_v42, %v4002_v10  ;;  %v3861_v42 = vor.u32 %v4378_v53, %v3858_v26  ;;  %v4412_v10 = vld [vmem:[%s6962_s6 + $0x264] sm:$0xf]  ;;  %v896_v53 = vld [vmem:[%s4933_s2 + $0x3a8] sm:$0xff] }
 0x17f   : > { %v1809_v15 = vpop.f32.mrf.mxu3  ;;  %2212 = vmatpush.bf16.msrb.mxu0 %v3869_v11  ;;  %v3997_v13 = vor.u32 %v4412_v10, %v3994_v28  ;;  %v904_v26 = vld [vmem:[%s4933_s2 + $0x3e8] sm:$0xff]  ;;  %v4410_v28 = vld [vmem:[%s6962_s6 + $0x254] sm:$0xf] }
 0x180   : > { %v1810_v51 = vadd.f32 %v1809_v15, %v1761_v14  ;;  %v3781_v14 = vor.u32 %v4358_v40, %v3778_v47  ;;  %2309 = vmatpush.bf16.msrb.mxu2 %v4005_v37  ;;  %v5836_v37 = vpop.f32.mrf.mxu2  ;;  %v3770_v40 = vld [vmem:[%s6962_s6 + $0xa8] sm:$0xf0]  ;;  %v4376_v47 = vld [vmem:[%s6962_s6 + $0x144] sm:$0xf]  ;;  %v3986_v15 = vld [vmem:[%s6962_s6 + $0x258] sm:$0xf0] }
 0x181   : > { %v1858_v2 = vpop.f32.mrf.mxu0 }
 0x182   : > { %v748_v27 = vpop.f32.mrf.mxu1  ;;  %v5822_v11 = vadd.f32 %v1858_v2, %v1810_v51  ;;  %v1763_v51 = vadd.f32 %v5436_v19, %v5531_v3  ;;  %v4356_v2 = vld [vmem:[%s6962_s6 + $0xa4] sm:$0xf]  ;;  %2166 = vmatpush.bf16.msrb.mxu3 %v3781_v14 }
 0x183   : > { %v5820_v56 = vpop.eup %4597  ;;  %2213 = vmatpush.bf16.msrb.mxu0 %v3861_v42  ;;  %v3773_v19 = vor.u32 %v4356_v2, %v3770_v40  ;;  %v3850_v42 = vld [vmem:[%s6962_s6 + $0x148] sm:$0xf0]  ;;  %v749_v61 = vadd.f32 %v5577_v32, %v748_v27  ;;  %v5859_v40 = vpack.c.bf16 %v904_v26, %v896_v53  ;;  %v4374_v27 = vld [vmem:[%s6962_s6 + $0x134] sm:$0xf] }
 0x184   : > { %7062 = vst [vmem:[#allocation44_spill] sm:$0xff] %v5820_v56  ;;  %2053 = vmatmul.bf16.gmra.mxu0 %v5801_v17  ;;  %2310 = vmatpush.bf16.msrb.mxu2 %v3997_v13  ;;  %v3853_v10 = vor.u32 %v4376_v47, %v3850_v42  ;;  %v4354_v13 = vld [vmem:[%s6962_s6 + $0x94] sm:$0xf]  ;;  %v3762_v47 = vld [vmem:[%s6962_s6 + $0x98] sm:$0xf0] }
 0x185   : > { %7063 = vst [vmem:[#allocation45_spill] sm:$0xff] %v5822_v11  ;;  %1901 = vmatmul.bf16.gmra.mxu1 %v5803_v25  ;;  %v3989_v25 = vor.u32 %v4410_v28, %v3986_v15  ;;  %4599 = vtanh.f32 %v749_v61  ;;  %v897_v28 = vld [vmem:[%s4933_s2 + $0x3b0] sm:$0xff]  ;;  %v4372_v61 = vld [vmem:[%s6962_s6 + $0x124] sm:$0xf] }
 0x186   : > { %7064 = vst [vmem:[#allocation46_spill] sm:$0xff] %v5859_v40  ;;  %2167 = vmatpush.bf16.msrb.mxu3 %v3773_v19  ;;  %v3978_v19 = vld [vmem:[%s6962_s6 + $0x248] sm:$0xf0] }
 0x187   : > { %v1811_v56 = vpop.f32.mrf.mxu3  ;;  %2214 = vmatpush.bf16.msrb.mxu0 %v3853_v10  ;;  %v4408_v10 = vld [vmem:[%s6962_s6 + $0x244] sm:$0xf] }
 0x188   : > { %v1812_v14 = vadd.f32 %v1811_v56, %v1763_v51  ;;  %v3765_v56 = vor.u32 %v4354_v13, %v3762_v47  ;;  %v3842_v51 = vld [vmem:[%s6962_s6 + $0x138] sm:$0xf0]  ;;  %2311 = vmatpush.bf16.msrb.mxu2 %v3989_v25  ;;  %v905_v13 = vld [vmem:[%s4933_s2 + $0x3f0] sm:$0xff]  ;;  %v3981_v47 = vor.u32 %v4408_v10, %v3978_v19  ;;  %v4352_v25 = vld [vmem:[%s6962_s6 + $0x84] sm:$0xf] }
 0x189   : > { %v1860_v2 = vpop.f32.mrf.mxu0  ;;  %v3845_v42 = vor.u32 %v4374_v27, %v3842_v51  ;;  %v878_v27 = vld [vmem:[%s4933_s2 + $0x318] sm:$0xff]  ;;  %v3834_v51 = vld [vmem:[%s6962_s6 + $0x128] sm:$0xf0]  ;;  %v4406_v10 = vld [vmem:[%s6962_s6 + $0x234] sm:$0xf]  ;;  %v5909_v17 = vpack.c.bf16 %v905_v13, %v897_v28 }
 0x18a   : > { %v750_v15 = vpop.f32.mrf.mxu1  ;;  %v5874_v26 = vadd.f32 %v1860_v2, %v1812_v14  ;;  %v1766_v14 = vadd.f32 %v5483_v24, %v5531_v3  ;;  %v3754_v2 = vld [vmem:[%s6962_s6 + $0x88] sm:$0xf0]  ;;  %2168 = vmatpush.bf16.msrb.mxu3 %v3765_v56  ;;  %v3970_v19 = vld [vmem:[%s6962_s6 + $0x238] sm:$0xf0] }
 0x18b   : > { %v751_v53 = vadd.f32 %v5577_v32, %v750_v15  ;;  %2215 = vmatpush.bf16.msrb.mxu0 %v3845_v42  ;;  %v886_v15 = vld [vmem:[%s4933_s2 + $0x358] sm:$0xff]  ;;  %v3757_v24 = vor.u32 %v4352_v25, %v3754_v2  ;;  %v3837_v42 = vor.u32 %v4372_v61, %v3834_v51  ;;  %v3973_v56 = vor.u32 %v4406_v10, %v3970_v19  ;;  %v5919_v51 = vpop.eup %4599  ;;  %v4368_v10 = vld [vmem:[%s6962_s6 + $0x104] sm:$0xf] }
 0x18c   : > { %7065 = vst [vmem:[#allocation47_spill] sm:$0xff] %v5874_v26  ;;  %2009 = vmatmul.bf16.gmra.mxu3 %v5859_v40  ;;  %2312 = vmatpush.bf16.msrb.mxu2 %v3981_v47  ;;  %v5911_v25 = vpack.c.bf16 %v886_v15, %v878_v27  ;;  %v4370_v47 = vld [vmem:[%s6962_s6 + $0x114] sm:$0xf]  ;;  %v3826_v61 = vld [vmem:[%s6962_s6 + $0x118] sm:$0xf0] }
 0x18d   : > { %4601 = vtanh.f32 %v751_v53  ;;  %v5901_v53 = vpop.f32.mrf.mxu2  ;;  %7066 = vst [vmem:[#allocation48_spill] sm:$0xff] %v5919_v51  ;;  %2156 = vmatmul.bf16.gmra.mxu2 %v5109_v0  ;;  %v3829_v28 = vor.u32 %v4370_v47, %v3826_v61  ;;  %v3962_v27 = vld [vmem:[%s6962_s6 + $0x228] sm:$0xf0]  ;;  %v794_v0 = vld [vmem:[%s4933_s2 + $0x78] sm:$0xff] }
 0x18e   : > { %2169 = vmatpush.bf16.msrb.mxu3 %v3757_v24  ;;  %v1768_v24 = vadd.f32 %v5526_v55, %v5531_v3  ;;  %v3818_v55 = vld [vmem:[%s6962_s6 + $0x108] sm:$0xf0] }
 0x18f   : > { %v1814_v40 = vpop.f32.mrf.mxu3  ;;  %2216 = vmatpush.bf16.msrb.mxu0 %v3837_v42  ;;  %v3938_v42 = vld [vmem:[%s6962_s6 + $0x1f8] sm:$0xf0]  ;;  %v3821_v3 = vor.u32 %v4368_v10, %v3818_v55 }
 0x190   : > { %v1815_v2 = vadd.f32 %v1814_v40, %v1766_v14  ;;  %2313 = vmatpush.bf16.msrb.mxu2 %v3973_v56  ;;  %v4404_v14 = vld [vmem:[%s6962_s6 + $0x224] sm:$0xf]  ;;  %v4402_v56 = vld [vmem:[%s6962_s6 + $0x214] sm:$0xf] }
 0x191   : > { %v1863_v26 = vpop.f32.mrf.mxu0  ;;  %v3965_v15 = vor.u32 %v4404_v14, %v3962_v27 }
 0x192   : > { %v753_v11 = vpop.f32.mrf.mxu1  ;;  %v5924_v40 = vadd.f32 %v1863_v26, %v1815_v2  ;;  %v4398_v26 = vld [vmem:[%s6962_s6 + $0x1f4] sm:$0xf]  ;;  %v3954_v2 = vld [vmem:[%s6962_s6 + $0x218] sm:$0xf0] }
 0x193   : > { %v5922_v13 = vpop.eup %4601  ;;  %2217 = vmatpush.bf16.msrb.mxu0 %v3829_v28  ;;  %v3941_v19 = vor.u32 %v4398_v26, %v3938_v42  ;;  %v754_v47 = vadd.f32 %v5577_v32, %v753_v11  ;;  %v3957_v28 = vor.u32 %v4402_v56, %v3954_v2  ;;  %v4400_v11 = vld [vmem:[%s6962_s6 + $0x204] sm:$0xf] }
 0x194   : > { %7067 = vst [vmem:[#allocation49_spill] sm:$0xff] %v5922_v13  ;;  %2058 = vmatmul.bf16.gmra.mxu0 %v5909_v17  ;;  %2314 = vmatpush.bf16.msrb.mxu2 %v3965_v15 }
 0x195   : > { %1906 = vmatmul.bf16.gmra.mxu1 %v5911_v25  ;;  %v5957_v14 = vpop.f32.mrf.mxu2  ;;  %4603 = vtanh.f32 %v754_v47  ;;  %v4396_v47 = vld [vmem:[%s6962_s6 + $0x1e4] sm:$0xf] }
 0x196   : > { %2260 = vmatpush.bf16.msrb.mxu1 %v3941_v19  ;;  %v3946_v19 = vld [vmem:[%s6962_s6 + $0x208] sm:$0xf0] }
 0x197   : > { %v1816_v61 = vpop.f32.mrf.mxu3  ;;  %2218 = vmatpush.bf16.msrb.mxu0 %v3821_v3  ;;  %v3949_v55 = vor.u32 %v4400_v11, %v3946_v19  ;;  %v902_v3 = vld [vmem:[%s4933_s2 + $0x3d8] sm:$0xff] }
 0x198   : > { %v1817_v27 = vadd.f32 %v1816_v61, %v1768_v24  ;;  %2315 = vmatpush.bf16.msrb.mxu2 %v3957_v28  ;;  %v894_v24 = vld [vmem:[%s4933_s2 + $0x398] sm:$0xff] }
 0x199   : > { %v1865_v15 = vpop.f32.mrf.mxu0  ;;  %v5971_v2 = vpack.c.bf16 %v902_v3, %v894_v24 }
 0x19a   : > { %v755_v26 = vpop.f32.mrf.mxu1  ;;  %v5960_v10 = vadd.f32 %v1865_v15, %v1817_v27 }
 0x19b   : > { %v756_v42 = vadd.f32 %v5577_v32, %v755_v26  ;;  %v5973_v28 = vpop.eup %4603 }
 0x19c   : > { %2170 = vmatmul.bf16.vlgmr.msrb.gmra.mxu3 %v5158_v29  ;;  %2316 = vmatpush.bf16.msrb.mxu2 %v3949_v55  ;;  %7068 = vst [vmem:[#allocation50_spill] sm:$0xff] %v5973_v28  ;;  %v786_v29 = vld [vmem:[%s4933_s2 + $0x38] sm:$0xff] }
 0x19d   : > { %4605 = vtanh.f32 %v756_v42  ;;  %v5978_v26 = vpop.f32.mrf.mxu2 }
 0x19f   : > { %v1975_v56 = vpop.f32.mrf.mxu3  ;;  %2317 = vmatmul.bf16.vlgmr.msrb.gmra.mxu2 %v5171_v39  ;;  %v3930_v39 = vld [vmem:[%s6962_s6 + $0x1e8] sm:$0xf0] }
 0x1a0   : > { %v3933_v42 = vor.u32 %v4396_v47, %v3930_v39 }
 0x1a1   : > { %v2024_v61 = vpop.f32.mrf.mxu0 }
 0x1a2   : > { %v758_v27 = vpop.f32.mrf.mxu1  ;;  %2261 = vmatpush.bf16.msrb.mxu1 %v3933_v42 }
 0x1a3   : > { %v5976_v15 = vpop.eup %4605  ;;  %v759_v11 = vadd.f32 %v5577_v32, %v758_v27 }
 0x1a4   : > { %7069 = vst [vmem:[#allocation51_spill] sm:$0xff] %v5976_v15  ;;  %2219 = vmatmul.bf16.vlgmr.msrb.gmra.mxu0 %v5173_v41  ;;  %v5997_v15 = vpack.c.bf16 %v794_v0, %v786_v29 }
 0x1a5   : > { %1911 = vmatmul.bf16.gmra.mxu1 %v5971_v2  ;;  %4607 = vtanh.f32 %v759_v11  ;;  %v5992_v3 = vpop.f32.mrf.mxu2 }
 0x1a7   : > { %v1977_v19 = vpop.f32.mrf.mxu3 }
 0x1a9   : > { %v2026_v41 = vpop.f32.mrf.mxu0 }
 0x1aa   : > { %v760_v55 = vpop.f32.mrf.mxu1 }
 0x1ab   : > { %v761_v24 = vadd.f32 %v5577_v32, %v760_v55  ;;  %v5999_v39 = vpop.eup %4607 }
 0x1ac   : > { %2175 = vmatmul.bf16.gmra.mxu3 %v5191_v52  ;;  %7070 = vst [vmem:[#allocation52_spill] sm:$0xff] %v5999_v39  ;;  %v802_v39 = vld [vmem:[%s4933_s2 + $0xb8] sm:$0xff] }
 0x1ad   : > { %4609 = vtanh.f32 %v761_v24 }
 0x1af   : > { %v1980_v28 = vpop.f32.mrf.mxu3  ;;  %2322 = vmatmul.bf16.gmra.mxu2 %v5199_v58  ;;  %v4394_v58 = vld [vmem:[%s6962_s6 + $0x1d4] sm:$0xf] }
 0x1b1   : > { %v2029_v47 = vpop.f32.mrf.mxu0 }
 0x1b2   : > { %v1877_v27 = vpop.f32.mrf.mxu1 }
 0x1b3   : > { %v6002_v42 = vpop.eup %4609  ;;  %v1878_v32 = vadd.f32 %v1877_v27, %v5547_v38  ;;  %v3922_v38 = vld [vmem:[%s6962_s6 + $0x1d8] sm:$0xf0] }
 0x1b4   : > { %7071 = vst [vmem:[#allocation53_spill] sm:$0xff] %v6002_v42  ;;  %2224 = vmatmul.bf16.gmra.mxu0 %v5201_v59  ;;  %v3925_v29 = vor.u32 %v4394_v58, %v3922_v38  ;;  %v6017_v59 = vpop.f32.mrf.mxu2  ;;  %v810_v42 = vld [vmem:[%s4933_s2 + $0xf8] sm:$0xff] }
 0x1b5   : > { %4166 = vmatmul.msk.bf16.vlgmr.msra.gmra.mxu1 %vm689_vm2, %v5997_v15  ;;  %v1927_v0 = vadd.f32 %v5559_v23, %v1878_v32 }
 0x1b6   : > { %2262 = vmatpush.bf16.msrb.mxu1 %v3925_v29  ;;  %v818_v29 = vld [vmem:[%s4933_s2 + $0x138] sm:$0xff] }
 0x1b7   : > { %v1976_v11 = vadd.f32 %v1975_v56, %v1927_v0  ;;  %v1982_v55 = vpop.f32.mrf.mxu3  ;;  %v6030_v56 = vpack.c.bf16 %v810_v42, %v802_v39 }
 0x1b9   : > { %v6019_v24 = vadd.f32 %v2024_v61, %v1976_v11  ;;  %v2031_v27 = vpop.f32.mrf.mxu0  ;;  %v826_v11 = vld [vmem:[%s4933_s2 + $0x178] sm:$0xff] }
 0x1ba   : > { %v1879_v52 = vpop.f32.mrf.mxu1 }
 0x1bb   : > { %v1880_v23 = vadd.f32 %v1879_v52, %v5557_v22 }
 0x1bc   : > { %2180 = vmatmul.bf16.gmra.mxu3 %v5215_v9  ;;  %v6026_v58 = vpop.f32.mrf.mxu2 }
 0x1bd   : > { %v1929_v32 = vadd.f32 %v5582_v54, %v1880_v23  ;;  %v4392_v54 = vld [vmem:[%s6962_s6 + $0x1c4] sm:$0xf] }
 0x1bf   : > { %v1978_v51 = vadd.f32 %v1977_v19, %v1929_v32  ;;  %v1985_v13 = vpop.f32.mrf.mxu3  ;;  %2327 = vmatmul.bf16.gmra.mxu2 %v5223_v16 }
 0x1c1   : > { %v6028_v38 = vadd.f32 %v2026_v41, %v1978_v51  ;;  %v2034_v61 = vpop.f32.mrf.mxu0  ;;  %v3914_v51 = vld [vmem:[%s6962_s6 + $0x1c8] sm:$0xf0] }
 0x1c2   : > { %v1882_v0 = vpop.f32.mrf.mxu1  ;;  %v3917_v16 = vor.u32 %v4392_v54, %v3914_v51 }
 0x1c3   : > { %v1883_v22 = vadd.f32 %v1882_v0, %v5572_v7 }
 0x1c4   : > { %2229 = vmatmul.bf16.gmra.mxu0 %v5227_v18  ;;  %2263 = vmatpush.bf16.msrb.mxu1 %v3917_v16  ;;  %v6046_v42 = vpop.f32.mrf.mxu2 }
 0x1c5   : > { %4167 = vmatmul.msk.bf16.gmra.mxu1 %vm689_vm2, %v6030_v56  ;;  %v1932_v9 = vadd.f32 %v5605_v43, %v1883_v22 }
 0x1c7   : > { %v1981_v19 = vadd.f32 %v1980_v28, %v1932_v9  ;;  %v1987_v7 = vpop.f32.mrf.mxu3  ;;  %v6055_v28 = vpack.c.bf16 %v826_v11, %v818_v29 }
 0x1c9   : > { %v6044_v18 = vadd.f32 %v2029_v47, %v1981_v19  ;;  %v2036_v41 = vpop.f32.mrf.mxu0  ;;  %v834_v19 = vld [vmem:[%s4933_s2 + $0x1b8] sm:$0xff] }
 0x1ca   : > { %v1884_v39 = vpop.f32.mrf.mxu1 }
 0x1cb   : > { %v1885_v43 = vadd.f32 %v1884_v39, %v5596_v57  ;;  %v842_v39 = vld [vmem:[%s4933_s2 + $0x1f8] sm:$0xff] }
 0x1cc   : > { %2185 = vmatmul.bf16.gmra.mxu3 %v5243_v33  ;;  %v6060_v57 = vpop.f32.mrf.mxu2 }
 0x1cd   : > { %v1934_v52 = vadd.f32 %v5627_v6, %v1885_v43  ;;  %v4390_v6 = vld [vmem:[%s6962_s6 + $0x1b4] sm:$0xf] }
 0x1cf   : > { %v1983_v23 = vadd.f32 %v1982_v55, %v1934_v52  ;;  %v1990_v32 = vpop.f32.mrf.mxu3  ;;  %2332 = vmatmul.bf16.gmra.mxu2 %v5251_v45  ;;  %v3906_v45 = vld [vmem:[%s6962_s6 + $0x1b8] sm:$0xf0] }
 0x1d1   : > { %v6053_v0 = vadd.f32 %v2031_v27, %v1983_v23  ;;  %v2039_v47 = vpop.f32.mrf.mxu0 }
 0x1d2   : > { %v1887_v22 = vpop.f32.mrf.mxu1 }
 0x1d3   : > { %v1888_v9 = vadd.f32 %v1887_v22, %v5616_v5  ;;  %v3909_v5 = vor.u32 %v4390_v6, %v3906_v45  ;;  %v850_v45 = vld [vmem:[%s4933_s2 + $0x238] sm:$0xff] }
 0x1d4   : > { %2234 = vmatmul.bf16.gmra.mxu0 %v5255_v48  ;;  %v6078_v43 = vpop.f32.mrf.mxu2 }
 0x1d5   : > { %4168 = vmatmul.msk.bf16.gmra.mxu1 %vm689_vm2, %v6055_v28  ;;  %v1937_v33 = vadd.f32 %v5652_v31, %v1888_v9 }
 0x1d6   : > { %2264 = vmatpush.bf16.msrb.mxu1 %v3909_v5  ;;  %v858_v5 = vld [vmem:[%s4933_s2 + $0x278] sm:$0xff] }
 0x1d7   : > { %v1986_v55 = vadd.f32 %v1985_v13, %v1937_v33  ;;  %v1992_v48 = vpop.f32.mrf.mxu3  ;;  %v6082_v13 = vpack.c.bf16 %v842_v39, %v834_v19  ;;  %v4386_v39 = vld [vmem:[%s6962_s6 + $0x194] sm:$0xf] }
 0x1d9   : > { %v6071_v27 = vadd.f32 %v2034_v61, %v1986_v55  ;;  %v2041_v54 = vpop.f32.mrf.mxu0 }
 0x1da   : > { %v1889_v51 = vpop.f32.mrf.mxu1 }
 0x1db   : > { %v1890_v16 = vadd.f32 %v1889_v51, %v5632_v4 }
 0x1dc   : > { %2190 = vmatmul.bf16.gmra.mxu3 %v5271_v1 }
 0x1dd   : > { %v1939_v31 = vadd.f32 %v5676_v36, %v1890_v16  ;;  %v4388_v36 = vld [vmem:[%s6962_s6 + $0x1a4] sm:$0xf]  ;;  %v6109_v16 = vpack.c.bf16 %v858_v5, %v850_v45 }
 0x1df   : > { %v1988_v52 = vadd.f32 %v1987_v7, %v1939_v31  ;;  %v1995_v29 = vpop.f32.mrf.mxu3  ;;  %2337 = vmatmul.bf16.gmra.mxu2 %v5279_v8  ;;  %v3898_v7 = vld [vmem:[%s6962_s6 + $0x1a8] sm:$0xf0] }
 0x1e0   : > { %v3901_v8 = vor.u32 %v4388_v36, %v3898_v7  ;;  %v4426_v7 = vld [vmem:[%s6962_s6 + $0x2d4] sm:$0xf] }
 0x1e1   : > { %v6080_v11 = vadd.f32 %v2036_v41, %v1988_v52  ;;  %v2044_v61 = vpop.f32.mrf.mxu0 }
 0x1e2   : > { %v1892_v23 = vpop.f32.mrf.mxu1  ;;  %2265 = vmatpush.bf16.msrb.mxu1 %v3901_v8  ;;  %v4050_v8 = vld [vmem:[%s6962_s6 + $0x2d8] sm:$0xf0] }
 0x1e3   : > { %v1893_v4 = vadd.f32 %v1892_v23, %v5650_v35 }
 0x1e4   : > { %2239 = vmatmul.bf16.gmra.mxu0 %v5283_v12  ;;  %v6096_v12 = vpop.f32.mrf.mxu2 }
 0x1e5   : > { %4169 = vmatmul.msk.bf16.gmra.mxu1 %vm689_vm2, %v6082_v13  ;;  %v1942_v1 = vadd.f32 %v5702_v46, %v1893_v4 }
 0x1e7   : > { %v1991_v41 = vadd.f32 %v1990_v32, %v1942_v1  ;;  %v1997_v35 = vpop.f32.mrf.mxu3 }
 0x1e9   : > { %v6098_v22 = vadd.f32 %v2039_v47, %v1991_v41  ;;  %v2046_v9 = vpop.f32.mrf.mxu0  ;;  %v4430_v47 = vld [vmem:[%s6962_s6 + $0x2f4] sm:$0xf] }
 0x1ea   : > { %v1894_v33 = vpop.f32.mrf.mxu1 }
 0x1eb   : > { %v1895_v46 = vadd.f32 %v1894_v33, %v5672_v21  ;;  %v4066_v21 = vld [vmem:[%s6962_s6 + $0x2f8] sm:$0xf0] }
 0x1ec   : > { %2195 = vmatmul.bf16.gmra.mxu3 %v5299_v30  ;;  %v4130_v33 = vld [vmem:[%s6962_s6 + $0x378] sm:$0xf0] }
 0x1ed   : > { %v1944_v6 = vadd.f32 %v5721_v63, %v1895_v46  ;;  %v4069_v63 = vor.u32 %v4430_v47, %v4066_v21  ;;  %v4042_v47 = vld [vmem:[%s6962_s6 + $0x2c8] sm:$0xf0]  ;;  %v866_v21 = vld [vmem:[%s4933_s2 + $0x2b8] sm:$0xff] }
 0x1ef   : > { %v1993_v55 = vadd.f32 %v1992_v48, %v1944_v6  ;;  %v6105_v51 = vpop.f32.mrf.mxu3  ;;  %2342 = vmatmul.bf16.gmra.mxu2 %v5307_v44  ;;  %v6120_v48 = vpop.f32.mrf.mxu2  ;;  %2358 = vmatpush.bf16.msra.mxu3 %v4069_v63  ;;  %v3890_v44 = vld [vmem:[%s6962_s6 + $0x198] sm:$0xf0] }
 0x1f0   : > { %v3893_v52 = vor.u32 %v4386_v39, %v3890_v44  ;;  %v4463_v39 = vld [vmem:[%s6964_s8 + $0x38] sm:$0xff] }
 0x1f1   : > { %v6107_v32 = vadd.f32 %v2041_v54, %v1993_v55  ;;  %v6111_v31 = vpop.f32.mrf.mxu0  ;;  %v4424_v55 = vld [vmem:[%s6962_s6 + $0x2c4] sm:$0xf]  ;;  %2685 = vmatpush.bf16.msra.mxu2 %v4463_v39 }
 0x1f2   : > { %v1897_v30 = vpop.f32.mrf.mxu1  ;;  %2266 = vmatpush.bf16.msrb.mxu1 %v3893_v52  ;;  %v4045_v63 = vor.u32 %v4424_v55, %v4042_v47  ;;  %v4026_v47 = vld [vmem:[%s6962_s6 + $0x2a8] sm:$0xf0] }
 0x1f3   : > { %v1898_v54 = vadd.f32 %v1897_v30, %v5692_v34  ;;  %v4428_v34 = vld [vmem:[%s6962_s6 + $0x2e4] sm:$0xf]  ;;  %v874_v30 = vld [vmem:[%s4933_s2 + $0x2f8] sm:$0xff] }
 0x1f4   : > { %2244 = vmatmul.bf16.gmra.mxu0 %v5311_v50  ;;  %v4058_v50 = vld [vmem:[%s6962_s6 + $0x2e8] sm:$0xf0] }
 0x1f5   : > { %4170 = vmatmul.msk.bf16.gmra.mxu1 %vm689_vm2, %v6109_v16  ;;  %v1947_v19 = vadd.f32 %v5774_v49, %v1898_v54  ;;  %v4061_v4 = vor.u32 %v4428_v34, %v4058_v50  ;;  %v6183_v34 = vpack.c.bf16 %v874_v30, %v866_v21  ;;  %v4422_v50 = vld [vmem:[%s6962_s6 + $0x2b4] sm:$0xf] }
 0x1f7   : > { %v1996_v23 = vadd.f32 %v1995_v29, %v1947_v19  ;;  %v6139_v49 = vpop.f32.mrf.mxu3  ;;  %2359 = vmatpush.bf16.msra.mxu3 %v4061_v4  ;;  %v4446_v29 = vld [vmem:[%s6962_s6 + $0x374] sm:$0xf]  ;;  %v6158_v45 = vpop.f32.mrf.mxu2 }
 0x1f8   : > { %v4133_v6 = vor.u32 %v4446_v29, %v4130_v33  ;;  %v4462_v33 = vld [vmem:[%s6964_s8 + $0x30] sm:$0xff] }
 0x1f9   : > { %v6141_v1 = vadd.f32 %v2044_v61, %v1996_v23  ;;  %v6143_v36 = vpop.f32.mrf.mxu0  ;;  %v4053_v61 = vor.u32 %v4426_v7, %v4050_v8  ;;  %v4442_v23 = vld [vmem:[%s6962_s6 + $0x354] sm:$0xf]  ;;  %v4114_v7 = vld [vmem:[%s6962_s6 + $0x358] sm:$0xf0]  ;;  %v7072_v8 = vld [vmem:[#allocation38_spill] sm:$0xff]  ;;  %2686 = vmatpush.bf16.msra.mxu2 %v4462_v33 }
 0x1fa   : > { %v1899_v41 = vpop.f32.mrf.mxu1  ;;  %2407 = vmatpush.bf16.msra.mxu0 %v4133_v6  ;;  %v3882_v6 = vld [vmem:[%s6962_s6 + $0x188] sm:$0xf0] }
 0x1fb   : > { %v1900_v46 = vadd.f32 %v1899_v41, %v5708_v62  ;;  %v4444_v62 = vld [vmem:[%s6962_s6 + $0x364] sm:$0xf]  ;;  %2360 = vmatpush.bf16.msra.mxu3 %v4053_v61  ;;  %v4117_v41 = vor.u32 %v4442_v23, %v4114_v7  ;;  %v4438_v23 = vld [vmem:[%s6962_s6 + $0x334] sm:$0xf]  ;;  %v7074_v7 = vld [vmem:[#allocation40_spill] sm:$0xff] }
 0x1fc   : > { %2200 = vmatmul.bf16.gmra.mxu3 %v5339_v20  ;;  %v4122_v20 = vld [vmem:[%s6962_s6 + $0x368] sm:$0xf0]  ;;  %v7073_v61 = vld [vmem:[#allocation9_spill] sm:$0xff] }
 0x1fd   : > { %v1949_v5 = vadd.f32 %v5836_v37, %v1900_v46  ;;  %v4125_v54 = vor.u32 %v4444_v62, %v4122_v20  ;;  %v4384_v46 = vld [vmem:[%s6962_s6 + $0x184] sm:$0xf]  ;;  %v4106_v62 = vld [vmem:[%s6962_s6 + $0x348] sm:$0xf0] }
 0x1fe   : > { %v3885_v55 = vor.u32 %v4384_v46, %v3882_v6  ;;  %v7075_v33 = vld [vmem:[#allocation10_spill] sm:$0xff]  ;;  %v4436_v6 = vld [vmem:[%s6962_s6 + $0x324] sm:$0xf] }
 0x1ff   : > { %v1998_v37 = vadd.f32 %v1997_v35, %v1949_v5  ;;  %v6176_v19 = vpop.f32.mrf.mxu3  ;;  %2408 = vmatpush.bf16.msra.mxu0 %v4125_v54  ;;  %v4034_v35 = vld [vmem:[%s6962_s6 + $0x2b8] sm:$0xf0]  ;;  %2361 = vmatpush.bf16.msra.mxu3 %v4045_v63  ;;  %v4420_v5 = vld [vmem:[%s6962_s6 + $0x2a4] sm:$0xf]  ;;  %v6226_v21 = vpop.f32.mrf.mxu2  ;;  %v4461_v54 = vld [vmem:[%s6964_s8 + $0x28] sm:$0xff] }
 0x200   : > { %2347 = vmatmul.bf16.gmra.mxu2 %v5371_v60  ;;  %v4029_v63 = vor.u32 %v4420_v5, %v4026_v47  ;;  %2267 = vmatpush.bf16.msrb.mxu1 %v3885_v55  ;;  %v4010_v46 = vld [vmem:[%s6962_s6 + $0x288] sm:$0xf0]  ;;  %v882_v5 = vld [vmem:[%s4933_s2 + $0x338] sm:$0xff] }
 0x201   : > { %v6181_v44 = vadd.f32 %v2046_v9, %v1998_v37  ;;  %v6185_v52 = vpop.f32.mrf.mxu0  ;;  %v4037_v9 = vor.u32 %v4422_v50, %v4034_v35  ;;  %v4018_v35 = vld [vmem:[%s6962_s6 + $0x298] sm:$0xf0]  ;;  %2687 = vmatpush.bf16.msra.mxu2 %v4461_v54 }
 0x202   : > { %v1902_v4 = vpop.f32.mrf.mxu1  ;;  %v890_v55 = vld [vmem:[%s4933_s2 + $0x378] sm:$0xff] }
 0x203   : > { %v1903_v29 = vadd.f32 %v1902_v4, %v7072_v8  ;;  %2409 = vmatpush.bf16.msra.mxu0 %v4117_v41  ;;  %2362 = vmatpush.bf16.msra.mxu3 %v4037_v9  ;;  %v4098_v9 = vld [vmem:[%s6962_s6 + $0x338] sm:$0xf0]  ;;  %v4460_v41 = vld [vmem:[%s6964_s8 + $0x20] sm:$0xff] }
 0x204   : > { %2249 = vmatmul.bf16.gmra.mxu0 %v7073_v61 }
 0x205   : > { %4171 = vmatmul.msk.bf16.gmra.mxu1 %vm689_vm2, %v6183_v34  ;;  %v1952_v60 = vadd.f32 %v5901_v53, %v1903_v29  ;;  %v4440_v53 = vld [vmem:[%s6962_s6 + $0x344] sm:$0xf]  ;;  %v4101_v29 = vor.u32 %v4438_v23, %v4098_v9  ;;  %2688 = vmatpush.bf16.msra.mxu2 %v4460_v41  ;;  %v4082_v23 = vld [vmem:[%s6962_s6 + $0x318] sm:$0xf0] }
 0x206   : > { %v4109_v20 = vor.u32 %v4440_v53, %v4106_v62 }
 0x207   : > { %v2001_v30 = vadd.f32 %v6105_v51, %v1952_v60  ;;  %v6229_v37 = vpop.f32.mrf.mxu3  ;;  %v4418_v51 = vld [vmem:[%s6962_s6 + $0x294] sm:$0xf]  ;;  %2363 = vmatpush.bf16.msra.mxu3 %v4029_v63  ;;  %v4416_v60 = vld [vmem:[%s6962_s6 + $0x284] sm:$0xf]  ;;  %v4459_v63 = vld [vmem:[%s6964_s8 + $0x18] sm:$0xff] }
 0x208   : > { %2410 = vmatpush.bf16.msra.mxu0 %v4109_v20  ;;  %v4013_v47 = vor.u32 %v4416_v60, %v4010_v46  ;;  %v6275_v20 = vpop.f32.mrf.mxu2  ;;  %v4432_v60 = vld [vmem:[%s6962_s6 + $0x304] sm:$0xf] }
 0x209   : > { %v6235_v39 = vadd.f32 %v6111_v31, %v2001_v30  ;;  %v6237_v50 = vpop.f32.mrf.mxu0  ;;  %v4021_v31 = vor.u32 %v4418_v51, %v4018_v35  ;;  %v6280_v51 = vpack.c.bf16 %v890_v55, %v882_v5  ;;  %2689 = vmatpush.bf16.msra.mxu2 %v4459_v63 }
 0x20a   : > { %v1904_v4 = vpop.f32.mrf.mxu1 }
 0x20b   : > { %v1905_v8 = vadd.f32 %v1904_v4, %v7074_v7  ;;  %2364 = vmatpush.bf16.msra.mxu3 %v4021_v31  ;;  %v7076_v31 = vld [vmem:[#allocation11_spill] sm:$0xff]  ;;  %v7077_v7 = vld [vmem:[#allocation45_spill] sm:$0xff] }
 0x20c   : > { %2205 = vmatmul.bf16.gmra.mxu3 %v7075_v33  ;;  %2411 = vmatpush.bf16.msra.mxu0 %v4101_v29  ;;  %v4458_v29 = vld [vmem:[%s6964_s8 + $0x10] sm:$0xff]  ;;  %v4162_v33 = vld [vmem:[%s6962_s6 + $0x3b8] sm:$0xf0] }
 0x20d   : > { %v1954_v61 = vadd.f32 %v5957_v14, %v1905_v8  ;;  %v4090_v14 = vld [vmem:[%s6962_s6 + $0x328] sm:$0xf0]  ;;  %v7078_v8 = vld [vmem:[#allocation12_spill] sm:$0xff]  ;;  %2690 = vmatpush.bf16.msra.mxu2 %v4458_v29 }
 0x20e   : > { %v4093_v62 = vor.u32 %v4436_v6, %v4090_v14  ;;  %v4074_v6 = vld [vmem:[%s6962_s6 + $0x308] sm:$0xf0]  ;;  %v4675_v14 = vld [vmem:[%s6963_s7] sm:$0x3] }
 0x20f   : > { %v2003_v53 = vadd.f32 %v6139_v49, %v1954_v61  ;;  %v2010_v30 = vpop.f32.mrf.mxu3  ;;  %v4434_v49 = vld [vmem:[%s6962_s6 + $0x314] sm:$0xf]  ;;  %2365 = vmatpush.bf16.msra.mxu3 %v4013_v47  ;;  %v4077_v5 = vor.u32 %v4432_v60, %v4074_v6  ;;  %v4457_v47 = vld [vmem:[%s6964_s8 + $0x8] sm:$0xff] }
 0x210   : > { %2412 = vmatpush.bf16.msra.mxu0 %v4093_v62  ;;  %2352 = vmatmul.bf16.gmra.mxu2 %v7076_v31  ;;  %v4085_v9 = vor.u32 %v4434_v49, %v4082_v23  ;;  %v4454_v61 = vld [vmem:[%s6962_s6 + $0x3b4] sm:$0xf]  ;;  %v6321_v49 = vpop.f32.mrf.mxu2  ;;  %v4456_v31 = vld [vmem:[%s6964_s8] sm:$0xff] }
 0x211   : > { %v6278_v54 = vadd.f32 %v6143_v36, %v2003_v53  ;;  %v2059_v35 = vpop.f32.mrf.mxu0  ;;  %v4165_v46 = vor.u32 %v4454_v61, %v4162_v33  ;;  %v6316_v53 = vperm.slane %v4675_v14, 1  ;;  %v7079_v23 = vld [vmem:[#allocation47_spill] sm:$0xff]  ;;  %2691 = vmatpush.bf16.msra.mxu2 %v4457_v47 }
 0x212   : > { %v1907_v4 = vpop.f32.mrf.mxu1 }
 0x213   : > { %v1908_v36 = vadd.f32 %v1907_v4, %v7077_v7  ;;  %2460 = vmatpush.bf16.msra.mxu1 %v4165_v46 }
 0x214   : > { %2254 = vmatmul.bf16.gmra.mxu0 %v7078_v8  ;;  %v906_v8 = vld [vmem:[%s4933_s2 + $0x3f8] sm:$0xff] }
 0x215   : > { %4172 = vmatmul.msk.bf16.gmra.mxu1 %vm689_vm2, %v6280_v51  ;;  %v1957_v41 = vadd.f32 %v5978_v26, %v1908_v36  ;;  %2413 = vmatpush.bf16.msra.mxu0 %v4085_v9  ;;  %v2123_v9 = vadd.f32 %v6046_v42, %v6316_v53  ;;  %v7080_v36 = vld [vmem:[#allocation13_spill] sm:$0xff] }
 0x216   : > { %2692 = vmatpush.bf16.msra.mxu2 %v4456_v31 }
 0x217   : > { %v2006_v26 = vadd.f32 %v6176_v19, %v1957_v41  ;;  %v2012_v55 = vpop.f32.mrf.mxu3 }
 0x219   : > { %v6319_v62 = vadd.f32 %v6185_v52, %v2006_v26  ;;  %v2061_v19 = vpop.f32.mrf.mxu0  ;;  %2414 = vmatpush.bf16.msra.mxu0 %v4077_v5  ;;  %v898_v52 = vld [vmem:[%s4933_s2 + $0x3b8] sm:$0xff]  ;;  %v2125_v5 = vadd.f32 %v6060_v57, %v6316_v53  ;;  %v2128_v57 = vadd.f32 %v6078_v43, %v6316_v53  ;;  %v2130_v43 = vadd.f32 %v6096_v12, %v6316_v53  ;;  %s3566_s2 = scalar_lea.hbm %s6971_s15, %s4488_s0  ;;  %s4696_s0 = scalar_lea.hbm %s6971_s15, 256 }
 0x21a   : > { %v1909_v63 = vpop.f32.mrf.mxu1  ;;  %v6337_v33 = vpack.c.bf16 %v906_v8, %v898_v52  ;;  %s3569_s22 = sshll.u32 %s3566_s2, 4  ;;  %s3570_s22 = int_to_ptr.hbm [resolvable:$true] %s3569_s22 }
 0x21b   : > { %v1910_v4 = vadd.f32 %v1909_v63, %v7079_v23  ;;  %s4690_s16 = sshra.s32 %s3570_s22, 4  ;;  %s4691_s16 = int_to_ptr.hbm [resolvable:$true] %s4690_s16 }
 0x21c   : > { %2366 = vmatmul.bf16.vlgmr.msra.gmra.mxu3 %v7080_v36  ;;  %v7082_v36 = vld [vmem:[#allocation15_spill] sm:$0xff]  ;;  %s4692_s25 = scalar_lea.hbm %s4691_s16, 128  ;;  %p4697_p0 = scmp.lt.s32.totalorder %s4691_s16, %s6971_s15 }
 0x21d   : > { %v1959_v7 = vadd.f32 %v5992_v3, %v1910_v4  ;;  %v7081_v3 = vld [vmem:[#allocation14_spill] sm:$0xff]  ;;  %p4693_p11 = scmp.ne.s32.totalorder %s4691_s16, %s4692_s25  ;;  %p4698_p1 = scmp.lt.s32.totalorder %s4696_s0, %s4692_s25 }
 0x21f   : > { %v2008_v29 = vadd.f32 %v6229_v37, %v1959_v7  ;;  %v2171_v41 = vpop.f32.mrf.mxu3  ;;  %v6345_v37 = vpop.f32.mrf.mxu2  ;;  %p4694_p12 = pnand %p4693_p11, %p4860_p5  ;;  %p4699_p2 = por %p4698_p1, %p4697_p0 }
 0x220   : > { %v2172_v60 = vadd.f32 %v2171_v41, %v2123_v9 }
 0x221   : > { %v6335_v61 = vadd.f32 %v6237_v50, %v2008_v29  ;;  %v2220_v46 = vpop.f32.mrf.mxu0  ;;  %p4695_p13 = pneg %p4694_p12 }
 0x222   : > { %v1912_v6 = vpop.f32.mrf.mxu1  ;;  %v6340_v26 = vadd.f32 %v2220_v46, %v2172_v60  ;;  %v7084_v46 = vld [vmem:[#allocation17_spill] sm:$0xff] }
 0x223   : > { %v1913_v42 = vadd.f32 %v1912_v6, %v5924_v40  ;;  %p4700_p3 = pnand %p4699_p2, %p4695_p13 }
 0x224   : > { %2415 = vmatmul.bf16.vlgmr.msra.gmra.mxu0 %v7081_v3 }
 0x225   : > { %4173 = vmatmul.msk.bf16.gmra.mxu1 %vm689_vm2, %v6337_v33  ;;  %v1962_v50 = vadd.f32 %v6017_v59, %v1913_v42 }
 0x227   : > { %v2011_v47 = vadd.f32 %v2010_v30, %v1962_v50  ;;  %v2173_v14 = vpop.f32.mrf.mxu3  ;;  %v6359_v52 = vpop.f32.mrf.mxu2 }
 0x228   : > { %v2174_v23 = vadd.f32 %v2173_v14, %v2125_v5 }
 0x229   : > { %v6350_v63 = vadd.f32 %v2059_v35, %v2011_v47  ;;  %v2222_v40 = vpop.f32.mrf.mxu0 }
 0x22a   : > { %v1914_v4 = vpop.f32.mrf.mxu1  ;;  %v6353_v9 = vadd.f32 %v2222_v40, %v2174_v23  ;;  %v2133_v23 = vadd.f32 %v6120_v48, %v6316_v53  ;;  %v7087_v48 = vld [vmem:[#allocation20_spill] sm:$0xff] }
 0x22b   : > { %v1915_v31 = vadd.f32 %v1914_v4, %v5960_v10  ;;  %v7083_v10 = vld [vmem:[#allocation16_spill] sm:$0xff] }
 0x22c   : > { %2371 = vmatmul.bf16.gmra.mxu3 %v7082_v36 }
 0x22d   : > { %v1964_v7 = vadd.f32 %v6026_v58, %v1915_v31  ;;  %v4452_v58 = vld [vmem:[%s6962_s6 + $0x3a4] sm:$0xf]  ;;  %v7085_v31 = vld [vmem:[#allocation18_spill] sm:$0xff] }
 0x22f   : > { %v2013_v59 = vadd.f32 %v2012_v55, %v1964_v7  ;;  %v2176_v30 = vpop.f32.mrf.mxu3  ;;  %v4154_v55 = vld [vmem:[%s6962_s6 + $0x3a8] sm:$0xf0]  ;;  %v6375_v42 = vpop.f32.mrf.mxu2 }
 0x230   : > { %v2177_v8 = vadd.f32 %v2176_v30, %v2128_v57 }
 0x231   : > { %v6361_v35 = vadd.f32 %v2061_v19, %v2013_v59  ;;  %v2225_v29 = vpop.f32.mrf.mxu0  ;;  %v4157_v19 = vor.u32 %v4452_v58, %v4154_v55 }
 0x232   : > { %v2073_v41 = vpop.f32.mrf.mxu1  ;;  %v6363_v60 = vadd.f32 %v2225_v29, %v2177_v8  ;;  %v2135_v29 = vadd.f32 %v6158_v45, %v6316_v53  ;;  %v7088_v45 = vld [vmem:[#allocation23_spill] sm:$0xff] }
 0x233   : > { %2461 = vmatpush.bf16.msra.mxu1 %v4157_v19  ;;  %v2074_v3 = vadd.f32 %v2073_v41, %v6019_v24 }
 0x234   : > { %2420 = vmatmul.bf16.gmra.mxu0 %v7083_v10 }
 0x235   : > { %2268 = vmatmul.bf16.vlgmr.msrb.gmra.mxu1 %v7084_v46  ;;  %v2505_v40 = vmax.f32 %v2074_v3, 0.0 }
 0x237   : > { %v2178_v6 = vpop.f32.mrf.mxu3  ;;  %v6384_v30 = vpop.f32.mrf.mxu2 }
 0x238   : > { %v2179_v5 = vadd.f32 %v2178_v6, %v2130_v43  ;;  %v2138_v6 = vadd.f32 %v6226_v21, %v6316_v53  ;;  %v7090_v21 = vld [vmem:[#allocation25_spill] sm:$0xff] }
 0x239   : > { %v2227_v50 = vpop.f32.mrf.mxu0 }
 0x23a   : > { %v2075_v12 = vpop.f32.mrf.mxu1  ;;  %v6379_v14 = vadd.f32 %v2227_v50, %v2179_v5 }
 0x23b   : > { %v2076_v47 = vadd.f32 %v2075_v12, %v6028_v38  ;;  %v7086_v38 = vld [vmem:[#allocation19_spill] sm:$0xff] }
 0x23c   : > { %2376 = vmatmul.bf16.gmra.mxu3 %v7085_v31  ;;  %v2140_v31 = vadd.f32 %v6275_v20, %v6316_v53 }
 0x23d   : > { %v2507_v4 = vmax.f32 %v2076_v47, 0.0 }
 0x23f   : > { %v2537_v57 = vpack.c.bf16 %v2507_v4, %v2505_v40  ;;  %v2181_v7 = vpop.f32.mrf.mxu3  ;;  %v6398_v3 = vpop.f32.mrf.mxu2 }
 0x240   : > { %v2182_v36 = vadd.f32 %v2181_v7, %v2133_v23  ;;  %v4146_v7 = vld [vmem:[%s6962_s6 + $0x398] sm:$0xf0] }
 0x241   : > { %2693 = vmatmul.bf16.vlgmr.msra.gmra.mxu2 %v2537_v57  ;;  %v2230_v59 = vpop.f32.mrf.mxu0  ;;  %v4450_v57 = vld [vmem:[%s6962_s6 + $0x394] sm:$0xf] }
 0x242   : > { %v2078_v24 = vpop.f32.mrf.mxu1  ;;  %v6386_v8 = vadd.f32 %v2230_v59, %v2182_v36  ;;  %v4149_v36 = vor.u32 %v4450_v57, %v4146_v7  ;;  %v2148_v57 = vadd.f32 %v6359_v52, %v6316_v53  ;;  %v4448_v52 = vld [vmem:[%s6962_s6 + $0x384] sm:$0xf] }
 0x243   : > { %v2079_v10 = vadd.f32 %v2078_v24, %v6044_v18 }
 0x244   : > { %2425 = vmatmul.bf16.gmra.mxu0 %v7086_v38  ;;  %2462 = vmatpush.bf16.msra.mxu1 %v4149_v36 }
 0x245   : > { %2273 = vmatmul.bf16.gmra.mxu1 %v7087_v48  ;;  %v2509_v5 = vmax.f32 %v2079_v10, 0.0 }
 0x247   : > { %v2183_v41 = vpop.f32.mrf.mxu3  ;;  %v6413_v59 = vpop.f32.mrf.mxu2 }
 0x248   : > { %v2184_v43 = vadd.f32 %v2183_v41, %v2135_v29 }
 0x249   : > { %v2232_v46 = vpop.f32.mrf.mxu0 }
 0x24a   : > { %v2080_v58 = vpop.f32.mrf.mxu1  ;;  %v6394_v19 = vadd.f32 %v2232_v46, %v2184_v43  ;;  %v2143_v43 = vadd.f32 %v6321_v49, %v6316_v53 }
 0x24b   : > { %v2081_v55 = vadd.f32 %v2080_v58, %v6053_v0  ;;  %v7089_v0 = vld [vmem:[#allocation24_spill] sm:$0xff] }
 0x24c   : > { %2381 = vmatmul.bf16.gmra.mxu3 %v7088_v45 }
 0x24d   : > { %v2511_v50 = vmax.f32 %v2081_v55, 0.0  ;;  %v7091_v55 = vld [vmem:[#allocation28_spill] sm:$0xff] }
 0x24f   : > { %v2539_v12 = vpack.c.bf16 %v2511_v50, %v2509_v5  ;;  %v2186_v47 = vpop.f32.mrf.mxu3  ;;  %v6422_v50 = vpop.f32.mrf.mxu2 }
 0x250   : > { %v2187_v18 = vadd.f32 %v2186_v47, %v2138_v6 }
 0x251   : > { %2698 = vmatmul.bf16.gmra.mxu2 %v2539_v12  ;;  %v2235_v23 = vpop.f32.mrf.mxu0 }
 0x252   : > { %v2083_v40 = vpop.f32.mrf.mxu1  ;;  %v6401_v4 = vadd.f32 %v2235_v23, %v2187_v18  ;;  %v7093_v18 = vld [vmem:[#allocation30_spill] sm:$0xff] }
 0x253   : > { %v2084_v38 = vadd.f32 %v2083_v40, %v6071_v27 }
 0x254   : > { %2430 = vmatmul.bf16.gmra.mxu0 %v7089_v0 }
 0x255   : > { %2278 = vmatmul.bf16.gmra.mxu1 %v7090_v21  ;;  %v2513_v46 = vmax.f32 %v2084_v38, 0.0 }
 0x257   : > { %v2188_v24 = vpop.f32.mrf.mxu3 }
 0x258   : > { %v2189_v29 = vadd.f32 %v2188_v24, %v2140_v31  ;;  %v6433_v31 = vpop.f32.mrf.mxu2  ;;  %v7094_v24 = vld [vmem:[#allocation33_spill] sm:$0xff] }
 0x259   : > { %v2237_v48 = vpop.f32.mrf.mxu0 }
 0x25a   : > { %v2085_v20 = vpop.f32.mrf.mxu1  ;;  %v6417_v10 = vadd.f32 %v2237_v48, %v2189_v29 }
 0x25b   : > { %v2086_v41 = vadd.f32 %v2085_v20, %v6080_v11  ;;  %v7092_v11 = vld [vmem:[#allocation29_spill] sm:$0xff] }
 0x25c   : > { %2386 = vmatmul.bf16.gmra.mxu3 %v7091_v55 }
 0x25d   : > { %v2515_v58 = vmax.f32 %v2086_v41, 0.0 }
 0x25f   : > { %v2541_v6 = vpack.c.bf16 %v2515_v58, %v2513_v46  ;;  %v2191_v5 = vpop.f32.mrf.mxu3  ;;  %v4138_v58 = vld [vmem:[%s6962_s6 + $0x388] sm:$0xf0] }
 0x260   : > { %v2192_v27 = vadd.f32 %v2191_v5, %v2143_v43  ;;  %v7095_v43 = vld [vmem:[#allocation34_spill] sm:$0xff]  ;;  %v6442_v46 = vpop.f32.mrf.mxu2  ;;  %v4141_v55 = vor.u32 %v4448_v52, %v4138_v58  ;;  %v2158_v52 = vadd.f32 %v6413_v59, %v6316_v53 }
 0x261   : > { %2703 = vmatmul.bf16.gmra.mxu2 %v2541_v6  ;;  %v2240_v45 = vpop.f32.mrf.mxu0 }
 0x262   : > { %v2088_v12 = vpop.f32.mrf.mxu1  ;;  %v6424_v47 = vadd.f32 %v2240_v45, %v2192_v27  ;;  %2463 = vmatpush.bf16.msra.mxu1 %v4141_v55 }
 0x263   : > { %v2089_v49 = vadd.f32 %v2088_v12, %v6098_v22 }
 0x264   : > { %2435 = vmatmul.bf16.gmra.mxu0 %v7092_v11  ;;  %v2153_v11 = vadd.f32 %v6384_v30, %v6316_v53 }
 0x265   : > { %2283 = vmatmul.bf16.gmra.mxu1 %v7093_v18  ;;  %v2517_v7 = vmax.f32 %v2089_v49, 0.0 }
 0x267   : > { %v6428_v23 = vpop.f32.mrf.mxu3 }
 0x269   : > { %v6431_v40 = vpop.f32.mrf.mxu0 }
 0x26a   : > { %v2090_v0 = vpop.f32.mrf.mxu1 }
 0x26b   : > { %v2091_v21 = vadd.f32 %v2090_v0, %v6107_v32  ;;  %v7096_v32 = vld [vmem:[#allocation35_spill] sm:$0xff] }
 0x26c   : > { %2391 = vmatmul.bf16.gmra.mxu3 %v7094_v24  ;;  %v7097_v0 = vld [vmem:[#allocation39_spill] sm:$0xff] }
 0x26d   : > { %v2519_v36 = vmax.f32 %v2091_v21, 0.0  ;;  %v6460_v21 = vpop.f32.mrf.mxu2 }
 0x26f   : > { %v2543_v38 = vpack.c.bf16 %v2519_v36, %v2517_v7  ;;  %v2196_v29 = vpop.f32.mrf.mxu3 }
 0x270   : > { %v2197_v48 = vadd.f32 %v2196_v29, %v2148_v57  ;;  %v7098_v29 = vld [vmem:[#allocation41_spill] sm:$0xff] }
 0x271   : > { %2708 = vmatmul.bf16.gmra.mxu2 %v2543_v38  ;;  %v2245_v20 = vpop.f32.mrf.mxu0 }
 0x272   : > { %v2093_v22 = vpop.f32.mrf.mxu1  ;;  %v6439_v41 = vadd.f32 %v2245_v20, %v2197_v48 }
 0x273   : > { %v2094_v5 = vadd.f32 %v2093_v22, %v6141_v1 }
 0x274   : > { %2440 = vmatmul.bf16.gmra.mxu0 %v7095_v43 }
 0x275   : > { %2288 = vmatmul.bf16.gmra.mxu1 %v7096_v32  ;;  %v2521_v18 = vmax.f32 %v2094_v5, 0.0  ;;  %v6468_v30 = vpop.f32.mrf.mxu2  ;;  %v7100_v5 = vld [vmem:[#allocation46_spill] sm:$0xff] }
 0x277   : > { %v6451_v6 = vpop.f32.mrf.mxu3 }
 0x279   : > { %v6454_v27 = vpop.f32.mrf.mxu0 }
 0x27a   : > { %v2095_v45 = vpop.f32.mrf.mxu1 }
 0x27b   : > { %v2096_v12 = vadd.f32 %v2095_v45, %v6181_v44  ;;  %v7099_v44 = vld [vmem:[#allocation42_spill] sm:$0xff] }
 0x27c   : > { %2396 = vmatmul.bf16.gmra.mxu3 %v7097_v0 }
 0x27d   : > { %v2523_v49 = vmax.f32 %v2096_v12, 0.0  ;;  %v6477_v0 = vpop.f32.mrf.mxu2 }
 0x27f   : > { %v2545_v57 = vpack.c.bf16 %v2523_v49, %v2521_v18  ;;  %v2201_v7 = vpop.f32.mrf.mxu3 }
 0x280   : > { %v2202_v36 = vadd.f32 %v2201_v7, %v2153_v11 }
 0x281   : > { %2713 = vmatmul.bf16.gmra.mxu2 %v2545_v57  ;;  %v2250_v24 = vpop.f32.mrf.mxu0 }
 0x282   : > { %v2098_v1 = vpop.f32.mrf.mxu1  ;;  %v6462_v38 = vadd.f32 %v2250_v24, %v2202_v36 }
 0x283   : > { %v2099_v20 = vadd.f32 %v2098_v1, %v6235_v39 }
 0x284   : > { %2445 = vmatmul.bf16.gmra.mxu0 %v7098_v29  ;;  %v4471_v29 = vld [vmem:[%s6964_s8 + $0x78] sm:$0xff] }
 0x285   : > { %2293 = vmatmul.bf16.gmra.mxu1 %v7099_v44  ;;  %v2525_v58 = vmax.f32 %v2099_v20, 0.0  ;;  %v6485_v7 = vpop.f32.mrf.mxu2  ;;  %2734 = vmatpush.bf16.msrb.mxu3 %v4471_v29 }
 0x287   : > { %v6466_v48 = vpop.f32.mrf.mxu3 }
 0x289   : > { %v6471_v22 = vpop.f32.mrf.mxu0 }
 0x28a   : > { %v2100_v43 = vpop.f32.mrf.mxu1 }
 0x28b   : > { %v2101_v32 = vadd.f32 %v2100_v43, %v6278_v54 }
 0x28c   : > { %2401 = vmatmul.bf16.gmra.mxu3 %v7100_v5  ;;  %v4469_v5 = vld [vmem:[%s6964_s8 + $0x68] sm:$0xff] }
 0x28d   : > { %v2527_v55 = vmax.f32 %v2101_v32, 0.0 }
 0x28f   : > { %v2547_v45 = vpack.c.bf16 %v2527_v55, %v2525_v58  ;;  %v2206_v12 = vpop.f32.mrf.mxu3  ;;  %v4470_v58 = vld [vmem:[%s6964_s8 + $0x70] sm:$0xff] }
 0x290   : > { %v2207_v11 = vadd.f32 %v2206_v12, %v2158_v52  ;;  %2735 = vmatpush.bf16.msrb.mxu3 %v4470_v58 }
 0x291   : > { %2718 = vmatmul.bf16.gmra.mxu2 %v2547_v45  ;;  %v2255_v49 = vpop.f32.mrf.mxu0 }
 0x292   : > { %v2103_v18 = vpop.f32.mrf.mxu1  ;;  %v6479_v39 = vadd.f32 %v2255_v49, %v2207_v11 }
 0x293   : > { %v2104_v54 = vadd.f32 %v2103_v18, %v6319_v62 }
 0x294   : > { %2450 = vmatmul.bf16.gmra.mxu0 %v5909_v17  ;;  %v6491_v17 = vpop.f32.mrf.mxu2  ;;  %2736 = vmatpush.bf16.msrb.mxu3 %v4469_v5 }
 0x295   : > { %2298 = vmatmul.bf16.gmra.mxu1 %v5911_v25  ;;  %v2529_v36 = vmax.f32 %v2104_v54, 0.0 }
 0x29a   : > { %v2105_v59 = vpop.f32.mrf.mxu1 }
 0x29b   : > { %v2106_v57 = vadd.f32 %v2105_v59, %v6335_v61 }
 0x29c   : > { %v6495_v52 = vpop.f32.mrf.mxu2 }
 0x29d   : > { %v2531_v24 = vmax.f32 %v2106_v57, 0.0 }
 0x29f   : > { %v2549_v1 = vpack.c.bf16 %v2531_v24, %v2529_v36 }
 0x2a1   : > { %2723 = vmatmul.bf16.gmra.mxu2 %v2549_v1 }
 0x2a2   : > { %v2108_v44 = vpop.f32.mrf.mxu1 }
 0x2a3   : > { %v2109_v25 = vadd.f32 %v2108_v44, %v6350_v63  ;;  %v4464_v44 = vld [vmem:[%s6964_s8 + $0x40] sm:$0xff] }
 0x2a5   : > { %2303 = vmatmul.bf16.gmra.mxu1 %v5971_v2  ;;  %v2533_v20 = vmax.f32 %v2109_v25, 0.0 }
 0x2aa   : > { %v2110_v62 = vpop.f32.mrf.mxu1 }
 0x2ab   : > { %v2111_v61 = vadd.f32 %v2110_v62, %v6361_v35 }
 0x2ad   : > { %v2535_v43 = vmax.f32 %v2111_v61, 0.0 }
 0x2af   : > { %v2551_v32 = vpack.c.bf16 %v2535_v43, %v2533_v20 }
 0x2b1   : > { %2728 = vmatmul.bf16.gmra.mxu2 %v2551_v32 }
 0x2b2   : > { %v2269_v55 = vpop.f32.mrf.mxu1 }
 0x2b3   : > { %v2270_v2 = vadd.f32 %v2269_v55, %v6340_v26 }
 0x2b5   : > { %4174 = vmatmul.msk.bf16.vlgmr.msra.gmra.mxu1 %vm689_vm2, %v5997_v15  ;;  %v4468_v15 = vld [vmem:[%s6964_s8 + $0x60] sm:$0xff]  ;;  %v2319_v5 = vadd.f32 %v6433_v31, %v2270_v2 }
 0x2b6   : > { %2737 = vmatpush.bf16.msrb.mxu3 %v4468_v15 }
 0x2ba   : > { %v2271_v63 = vpop.f32.mrf.mxu1 }
 0x2bb   : > { %v2272_v35 = vadd.f32 %v2271_v63, %v6353_v9 }
 0x2c2   : > { %v2274_v45 = vpop.f32.mrf.mxu1 }
 0x2c3   : > { %v6508_v12 = vadd.f32 %v2274_v45, %v6363_v60 }
 0x2c5   : > { %4175 = vmatmul.msk.bf16.gmra.mxu1 %vm689_vm2, %v6030_v56  ;;  %v4467_v56 = vld [vmem:[%s6964_s8 + $0x58] sm:$0xff] }
 0x2c6   : > { %2738 = vmatpush.bf16.msrb.mxu3 %v4467_v56 }
 0x2ca   : > { %v2276_v26 = vpop.f32.mrf.mxu1 }
 0x2cb   : > { %v6513_v11 = vadd.f32 %v2276_v26, %v6379_v14 }
 0x2d2   : > { %v2279_v9 = vpop.f32.mrf.mxu1 }
 0x2d3   : > { %v6519_v18 = vadd.f32 %v2279_v9, %v6386_v8 }
 0x2d5   : > { %4176 = vmatmul.msk.bf16.gmra.mxu1 %vm689_vm2, %v6055_v28  ;;  %v4466_v28 = vld [vmem:[%s6964_s8 + $0x50] sm:$0xff] }
 0x2d6   : > { %2739 = vmatpush.bf16.msrb.mxu3 %v4466_v28 }
 0x2da   : > { %v2281_v60 = vpop.f32.mrf.mxu1 }
 0x2db   : > { %v6524_v49 = vadd.f32 %v2281_v60, %v6394_v19 }
 0x2e2   : > { %v2284_v14 = vpop.f32.mrf.mxu1 }
 0x2e3   : > { %v6530_v54 = vadd.f32 %v2284_v14, %v6401_v4 }
 0x2e5   : > { %4177 = vmatmul.msk.bf16.gmra.mxu1 %vm689_vm2, %v6082_v13  ;;  %v4465_v13 = vld [vmem:[%s6964_s8 + $0x48] sm:$0xff] }
 0x2e6   : > { %2740 = vmatpush.bf16.msrb.mxu3 %v4465_v13 }
 0x2ea   : > { %v2286_v8 = vpop.f32.mrf.mxu1  ;;  %2741 = vmatpush.bf16.msrb.mxu3 %v4464_v44 }
 0x2eb   : > { %v6535_v59 = vadd.f32 %v2286_v8, %v6417_v10  ;;  %v6550_v10 = vpop.f32.mrf.mxu3 }
 0x2f2   : > { %v2289_v19 = vpop.f32.mrf.mxu1 }
 0x2f3   : > { %v6541_v57 = vadd.f32 %v2289_v19, %v6424_v47  ;;  %v6557_v47 = vpop.f32.mrf.mxu0 }
 0x2f5   : > { %4178 = vmatmul.msk.bf16.gmra.mxu1 %vm689_vm2, %v6109_v16  ;;  %v2367_v16 = vpop.f32.mrf.mxu3 }
 0x2f6   : > { %v2368_v26 = vadd.f32 %v2367_v16, %v2319_v5 }
 0x2fa   : > { %v6545_v4 = vpop.f32.mrf.mxu1 }
 0x2fb   : > { %v2416_v29 = vpop.f32.mrf.mxu0 }
 0x2fc   : > { %v2417_v60 = vadd.f32 %v2416_v29, %v2368_v26 }
 0x302   : > { %v2294_v36 = vpop.f32.mrf.mxu1 }
 0x303   : > { %v6553_v24 = vadd.f32 %v2294_v36, %v6439_v41  ;;  %v2369_v41 = vpop.f32.mrf.mxu3 }
 0x305   : > { %4179 = vmatmul.msk.bf16.gmra.mxu1 %vm689_vm2, %v6183_v34  ;;  %v2418_v34 = vpop.f32.mrf.mxu0 }
 0x30a   : > { %v6559_v1 = vpop.f32.mrf.mxu1 }
 0x30b   : > { %v2372_v20 = vpop.f32.mrf.mxu3 }
 0x30d   : > { %v2421_v58 = vpop.f32.mrf.mxu0 }
 0x312   : > { %v2299_v25 = vpop.f32.mrf.mxu1 }
 0x313   : > { %v6565_v62 = vadd.f32 %v2299_v25, %v6462_v38  ;;  %v2374_v55 = vpop.f32.mrf.mxu3  ;;  %v4478_v25 = vld [vmem:[%s6966_s10 + $0x30] sm:$0xff] }
 0x315   : > { %4180 = vmatmul.msk.bf16.gmra.mxu1 %vm689_vm2, %v6280_v51  ;;  %v2423_v63 = vpop.f32.mrf.mxu0  ;;  %v2321_v51 = vadd.f32 %v6442_v46, %v2272_v35  ;;  %v2324_v46 = vadd.f32 %v6460_v21, %v6508_v12  ;;  %v2326_v35 = vadd.f32 %v6468_v30, %v6513_v11  ;;  %v2329_v30 = vadd.f32 %v6477_v0, %v6519_v18 }
 0x317   : > { %v2370_v9 = vadd.f32 %v2369_v41, %v2321_v51  ;;  %v2373_v29 = vadd.f32 %v2372_v20, %v2324_v46  ;;  %v2375_v44 = vadd.f32 %v2374_v55, %v2326_v35  ;;  %v2338_v20 = vpop.f32.mrf.mxu2  ;;  %v2331_v55 = vadd.f32 %v6485_v7, %v6524_v49 }
 0x318   : > { %v2334_v49 = vadd.f32 %v6491_v17, %v6530_v54 }
 0x319   : > { %v2422_v41 = vadd.f32 %v2421_v58, %v2373_v29 }
 0x31a   : > { %v6569_v61 = vpop.f32.mrf.mxu1 }
 0x31b   : > { %v2377_v15 = vpop.f32.mrf.mxu3 }
 0x31d   : > { %v2426_v56 = vpop.f32.mrf.mxu0 }
 0x31f   : > { %v2340_v18 = vpop.f32.mrf.mxu2 }
 0x322   : > { %v2304_v43 = vpop.f32.mrf.mxu1 }
 0x323   : > { %v6572_v32 = vadd.f32 %v2304_v43, %v6479_v39  ;;  %v4479_v39 = vld [vmem:[%s6966_s10 + $0x38] sm:$0xff]  ;;  %v2379_v31 = vpop.f32.mrf.mxu3  ;;  %v2424_v43 = vadd.f32 %v2423_v63, %v2375_v44  ;;  %v4477_v63 = vld [vmem:[%s6966_s10 + $0x28] sm:$0xff]  ;;  %v4476_v44 = vld [vmem:[%s6966_s10 + $0x20] sm:$0xff] }
 0x324   : > { %2875 = vmatpush.bf16.msrb.mxu0 %v4479_v39  ;;  %v2378_v39 = vadd.f32 %v2377_v15, %v2329_v30 }
 0x325   : > { %4181 = vmatmul.msk.bf16.gmra.mxu1 %vm689_vm2, %v6337_v33  ;;  %v2419_v33 = vadd.f32 %v2418_v34, %v2370_v9  ;;  %v2428_v36 = vpop.f32.mrf.mxu0 }
 0x328   : > { %2876 = vmatpush.bf16.msrb.mxu0 %v4478_v25 }
 0x32a   : > { %v6576_v38 = vpop.f32.mrf.mxu1 }
 0x32b   : > { %v2382_v34 = vpop.f32.mrf.mxu3 }
 0x32c   : > { %2877 = vmatpush.bf16.msrb.mxu0 %v4477_v63 }
 0x32d   : > { %v2431_v12 = vpop.f32.mrf.mxu0 }
 0x330   : > { %2878 = vmatpush.bf16.msrb.mxu0 %v4476_v44 }
 0x332   : > { %v2465_v45 = vpop.f32.mrf.mxu1 }
 0x333   : > { %v2466_v14 = vadd.f32 %v2465_v45, %v2417_v60  ;;  %v2384_v9 = vpop.f32.mrf.mxu3  ;;  %v2380_v60 = vadd.f32 %v2379_v31, %v2331_v55 }
 0x335   : > { %v2506_v19 = vmax.f32 %v2466_v14, 0.0  ;;  %v2427_v14 = vadd.f32 %v2426_v56, %v2378_v39  ;;  %v2145_v56 = vadd.f32 %v6345_v37, %v6316_v53 }
 0x337   : > { %v2194_v17 = vadd.f32 %v6428_v23, %v2145_v56 }
 0x33a   : > { %v2467_v8 = vpop.f32.mrf.mxu1 }
 0x33b   : > { %v2468_v28 = vadd.f32 %v2467_v8, %v2419_v33  ;;  %v2433_v33 = vpop.f32.mrf.mxu0  ;;  %v2429_v8 = vadd.f32 %v2428_v36, %v2380_v60  ;;  %v2383_v36 = vadd.f32 %v2382_v34, %v2334_v49  ;;  %v2155_v49 = vadd.f32 %v6398_v3, %v6316_v53 }
 0x33d   : > { %v2508_v13 = vmax.f32 %v2468_v28, 0.0  ;;  %v2432_v54 = vadd.f32 %v2431_v12, %v2383_v36  ;;  %v2150_v12 = vadd.f32 %v6375_v42, %v6316_v53 }
 0x33f   : > { %v2538_v2 = vpack.c.bf16 %v2508_v13, %v2506_v19  ;;  %v2387_v13 = vpop.f32.mrf.mxu3 }
 0x341   : > { %2742 = vmatmul.bf16.vlgmr.msrb.gmra.mxu3 %v2538_v2  ;;  %v2336_v2 = vadd.f32 %v6495_v52, %v6535_v59 }
 0x342   : > { %v2470_v16 = vpop.f32.mrf.mxu1 }
 0x343   : > { %v2471_v5 = vadd.f32 %v2470_v16, %v2422_v41  ;;  %v2436_v31 = vpop.f32.mrf.mxu0  ;;  %v2343_v16 = vpop.f32.mrf.mxu2  ;;  %v2385_v29 = vadd.f32 %v2384_v9, %v2336_v2 }
 0x345   : > { %v2510_v45 = vmax.f32 %v2471_v5, 0.0  ;;  %v2434_v41 = vadd.f32 %v2433_v33, %v2385_v29  ;;  %v2243_v5 = vadd.f32 %v6431_v40, %v2194_v17  ;;  %v4475_v40 = vld [vmem:[%s6966_s10 + $0x18] sm:$0xff] }
 0x346   : > { %2879 = vmatpush.bf16.msrb.mxu0 %v4475_v40 }
 0x347   : > { %v2389_v25 = vpop.f32.mrf.mxu3  ;;  %v2292_v37 = vadd.f32 %v6545_v4, %v2243_v5  ;;  %v2199_v4 = vadd.f32 %v6451_v6, %v2150_v12 }
 0x349   : > { %v2341_v55 = vadd.f32 %v2340_v18, %v2292_v37 }
 0x34a   : > { %v2472_v51 = vpop.f32.mrf.mxu1 }
 0x34b   : > { %v2473_v21 = vadd.f32 %v2472_v51, %v2424_v43  ;;  %v2438_v52 = vpop.f32.mrf.mxu0  ;;  %v2390_v39 = vadd.f32 %v2389_v25, %v2341_v55 }
 0x34d   : > { %v2512_v26 = vmax.f32 %v2473_v21, 0.0 }
 0x34f   : > { %v2540_v11 = vpack.c.bf16 %v2512_v26, %v2510_v45  ;;  %v2345_v45 = vpop.f32.mrf.mxu2  ;;  %v2339_v26 = vadd.f32 %v2338_v20, %v6541_v57  ;;  %v2439_v20 = vadd.f32 %v2438_v52, %v2390_v39 }
 0x351   : > { %2747 = vmatmul.bf16.gmra.mxu3 %v2540_v11  ;;  %v2392_v11 = vpop.f32.mrf.mxu3  ;;  %v2388_v9 = vadd.f32 %v2387_v13, %v2339_v26  ;;  %v2344_v13 = vadd.f32 %v2343_v16, %v6553_v24 }
 0x352   : > { %v2475_v58 = vpop.f32.mrf.mxu1 }
 0x353   : > { %v2476_v28 = vadd.f32 %v2475_v58, %v2427_v14  ;;  %v2441_v58 = vpop.f32.mrf.mxu0  ;;  %v2437_v60 = vadd.f32 %v2436_v31, %v2388_v9  ;;  %v2393_v31 = vadd.f32 %v2392_v11, %v2344_v13 }
 0x355   : > { %v2514_v46 = vmax.f32 %v2476_v28, 0.0  ;;  %v2442_v56 = vadd.f32 %v2441_v58, %v2393_v31 }
 0x357   : > { %v2348_v57 = vpop.f32.mrf.mxu2 }
 0x358   : > { %v2349_v52 = vadd.f32 %v2348_v57, %v6565_v62 }
 0x359   : > { %v2394_v33 = vpop.f32.mrf.mxu3 }
 0x35a   : > { %v2477_v0 = vpop.f32.mrf.mxu1 }
 0x35b   : > { %v2478_v19 = vadd.f32 %v2477_v0, %v2429_v8  ;;  %v2248_v8 = vadd.f32 %v6454_v27, %v2199_v4  ;;  %v4474_v27 = vld [vmem:[%s6966_s10 + $0x10] sm:$0xff] }
 0x35c   : > { %2880 = vmatpush.bf16.msrb.mxu0 %v4474_v27 }
 0x35d   : > { %v2516_v7 = vmax.f32 %v2478_v19, 0.0  ;;  %v2297_v42 = vadd.f32 %v6559_v1, %v2248_v8  ;;  %v2443_v19 = vpop.f32.mrf.mxu0  ;;  %v2204_v1 = vadd.f32 %v6466_v48, %v2155_v49  ;;  %v4473_v48 = vld [vmem:[%s6966_s10 + $0x8] sm:$0xff] }
 0x35f   : > { %v2542_v15 = vpack.c.bf16 %v2516_v7, %v2514_v46  ;;  %v2346_v7 = vadd.f32 %v2345_v45, %v2297_v42  ;;  %v2253_v44 = vadd.f32 %v6471_v22, %v2204_v1  ;;  %v2160_v22 = vadd.f32 %v6422_v50, %v6316_v53 }
 0x360   : > { %2881 = vmatpush.bf16.msrb.mxu0 %v4473_v48 }
 0x361   : > { %2752 = vmatmul.bf16.gmra.mxu3 %v2542_v15  ;;  %v2350_v15 = vpop.f32.mrf.mxu2  ;;  %v2397_v2 = vpop.f32.mrf.mxu3  ;;  %v2302_v17 = vadd.f32 %v6569_v61, %v2253_v44  ;;  %v4472_v61 = vld [vmem:[%s6966_s10] sm:$0xff]  ;;  %v2209_v62 = vadd.f32 %v6550_v10, %v2160_v22 }
 0x362   : > { %v2480_v35 = vpop.f32.mrf.mxu1 }
 0x363   : > { %v2481_v43 = vadd.f32 %v2480_v35, %v2432_v54  ;;  %v2395_v35 = vadd.f32 %v2394_v33, %v2346_v7  ;;  %v2351_v5 = vadd.f32 %v2350_v15, %v2302_v17  ;;  %v2258_v12 = vadd.f32 %v6557_v47, %v2209_v62 }
 0x364   : > { %2882 = vmatpush.bf16.msrb.mxu0 %v4472_v61 }
 0x365   : > { %v2518_v34 = vmax.f32 %v2481_v43, 0.0  ;;  %v2446_v24 = vpop.f32.mrf.mxu0  ;;  %v2444_v36 = vadd.f32 %v2443_v19, %v2395_v35  ;;  %v2307_v50 = vadd.f32 %v6576_v38, %v2258_v12 }
 0x369   : > { %v2353_v3 = vpop.f32.mrf.mxu2  ;;  %v2399_v43 = vpop.f32.mrf.mxu3 }
 0x36a   : > { %v2482_v59 = vpop.f32.mrf.mxu1  ;;  %v2354_v40 = vadd.f32 %v2353_v3, %v6572_v32 }
 0x36b   : > { %v2483_v51 = vadd.f32 %v2482_v59, %v2434_v41 }
 0x36d   : > { %v2520_v21 = vmax.f32 %v2483_v51, 0.0  ;;  %v2448_v51 = vpop.f32.mrf.mxu0 }
 0x36f   : > { %v2544_v30 = vpack.c.bf16 %v2520_v21, %v2518_v34  ;;  %v2398_v34 = vadd.f32 %v2397_v2, %v2349_v52  ;;  %v2400_v21 = vadd.f32 %v2399_v43, %v2351_v5 }
 0x371   : > { %2757 = vmatmul.bf16.gmra.mxu3 %v2544_v30  ;;  %v2355_v45 = vpop.f32.mrf.mxu2  ;;  %v2447_v26 = vadd.f32 %v2446_v24, %v2398_v34  ;;  %v2402_v30 = vpop.f32.mrf.mxu3  ;;  %v2449_v11 = vadd.f32 %v2448_v51, %v2400_v21 }
 0x372   : > { %v2485_v23 = vpop.f32.mrf.mxu1  ;;  %v2356_v10 = vadd.f32 %v2355_v45, %v2307_v50 }
 0x373   : > { %v2486_v63 = vadd.f32 %v2485_v23, %v2437_v60 }
 0x375   : > { %v2522_v0 = vmax.f32 %v2486_v63, 0.0  ;;  %v2451_v53 = vpop.f32.mrf.mxu0  ;;  %v2403_v63 = vadd.f32 %v2402_v30, %v2354_v40 }
 0x377   : > { %v2452_v8 = vadd.f32 %v2451_v53, %v2403_v63 }
 0x379   : > { %v2694_v60 = vpop.f32.mrf.mxu2  ;;  %v2404_v57 = vpop.f32.mrf.mxu3 }
 0x37a   : > { %v2487_v14 = vpop.f32.mrf.mxu1  ;;  %v2405_v33 = vadd.f32 %v2404_v57, %v2356_v10 }
 0x37b   : > { %v2488_v28 = vadd.f32 %v2487_v14, %v2439_v20 }
 0x37d   : > { %v2524_v18 = vmax.f32 %v2488_v28, 0.0  ;;  %v2453_v14 = vpop.f32.mrf.mxu0 }
 0x37e   : > { %v2454_v28 = vadd.f32 %v2453_v14, %v2405_v33 }
 0x37f   : > { %v2546_v46 = vpack.c.bf16 %v2524_v18, %v2522_v0 }
 0x381   : > { %2762 = vmatmul.bf16.gmra.mxu3 %v2546_v46  ;;  %v2696_v18 = vpop.f32.mrf.mxu2 }
 0x382   : > { %v2490_v6 = vpop.f32.mrf.mxu1 }
 0x383   : > { %v2491_v16 = vadd.f32 %v2490_v6, %v2442_v56  ;;  %v6643_v6 = vld [vmem:[%s6965_s9] ss:$0 sm:$0xff] }
 0x384   : > { %v2695_v49 = vadd.f32 %v6643_v6, %v2694_v60  ;;  %v2697_v31 = vadd.f32 %v6643_v6, %v2696_v18 }
 0x385   : > { %v2526_v54 = vmax.f32 %v2491_v16, 0.0 }
 0x389   : > { %v2699_v32 = vpop.f32.mrf.mxu2 }
 0x38a   : > { %v2492_v29 = vpop.f32.mrf.mxu1 }
 0x38b   : > { %v2493_v25 = vadd.f32 %v2492_v29, %v2444_v36  ;;  %v2700_v29 = vadd.f32 %v6643_v6, %v2699_v32 }
 0x38d   : > { %v2528_v41 = vmax.f32 %v2493_v25, 0.0 }
 0x38f   : > { %v2548_v59 = vpack.c.bf16 %v2528_v41, %v2526_v54 }
 0x391   : > { %2767 = vmatmul.bf16.gmra.mxu3 %v2548_v59  ;;  %v2701_v46 = vpop.f32.mrf.mxu2 }
 0x392   : > { %v2495_v37 = vpop.f32.mrf.mxu1  ;;  %v2702_v44 = vadd.f32 %v6643_v6, %v2701_v46 }
 0x393   : > { %v2496_v55 = vadd.f32 %v2495_v37, %v2447_v26 }
 0x395   : > { %v2530_v58 = vmax.f32 %v2496_v55, 0.0 }
 0x399   : > { %v2704_v15 = vpop.f32.mrf.mxu2 }
 0x39a   : > { %v2497_v23 = vpop.f32.mrf.mxu1  ;;  %v2705_v48 = vadd.f32 %v6643_v6, %v2704_v15 }
 0x39b   : > { %v2498_v9 = vadd.f32 %v2497_v23, %v2449_v11 }
 0x39d   : > { %v2532_v39 = vmax.f32 %v2498_v9, 0.0 }
 0x39f   : > { %v2550_v4 = vpack.c.bf16 %v2532_v39, %v2530_v58 }
 0x3a1   : > { %2772 = vmatmul.bf16.gmra.mxu3 %v2550_v4  ;;  %v2706_v36 = vpop.f32.mrf.mxu2 }
 0x3a2   : > { %v2500_v20 = vpop.f32.mrf.mxu1  ;;  %v2707_v51 = vadd.f32 %v6643_v6, %v2706_v36 }
 0x3a3   : > { %v2501_v47 = vadd.f32 %v2500_v20, %v2452_v8 }
 0x3a5   : > { %v2534_v38 = vmax.f32 %v2501_v47, 0.0 }
 0x3a9   : > { %v2709_v54 = vpop.f32.mrf.mxu2 }
 0x3aa   : > { %v2502_v42 = vpop.f32.mrf.mxu1  ;;  %v2710_v30 = vadd.f32 %v6643_v6, %v2709_v54  ;;  %v4484_v54 = vld [vmem:[%s6969_s13] sm:$0xff] }
 0x3ab   : > { %v2503_v0 = vadd.f32 %v2502_v42, %v2454_v28 }
 0x3ad   : > { %v2536_v19 = vmax.f32 %v2503_v0, 0.0 }
 0x3af   : > { %v2552_v13 = vpack.c.bf16 %v2536_v19, %v2534_v38 }
 0x3b1   : > { %2777 = vmatmul.bf16.gmra.mxu3 %v2552_v13  ;;  %v2711_v5 = vpop.f32.mrf.mxu2 }
 0x3b2   : > { %v2712_v11 = vadd.f32 %v6643_v6, %v2711_v5 }
 0x3b9   : > { %v2714_v45 = vpop.f32.mrf.mxu2 }
 0x3ba   : > { %v2715_v4 = vadd.f32 %v6643_v6, %v2714_v45 }
 0x3c1   : > { %v2716_v23 = vpop.f32.mrf.mxu2 }
 0x3c2   : > { %v2717_v60 = vadd.f32 %v6643_v6, %v2716_v23 }
 0x3c4   : > { %v2743_v7 = vpop.f32.mrf.mxu3 }
 0x3c5   : > { %v2744_v2 = vadd.f32 %v2743_v7, %v2695_v49  ;;  %v4487_v7 = vld [vmem:[%s6969_s13 + $0x18] sm:$0xff] }
 0x3c6   : > { %4497 = vmatpush.bf16.msrb.mxu2 %v4487_v7  ;;  %3024 = vmatpush.bf16.msrb.mxu1 %v4487_v7 }
 0x3c7   : > { %v2783_v1 = vmax.f32 %v2744_v2, 0.0 }
 0x3c9   : > { %v2719_v40 = vpop.f32.mrf.mxu2 }
 0x3ca   : > { %v2720_v47 = vadd.f32 %v6643_v6, %v2719_v40 }
 0x3cc   : > { %v2745_v35 = vpop.f32.mrf.mxu3 }
 0x3cd   : > { %v2746_v27 = vadd.f32 %v2745_v35, %v2697_v31 }
 0x3cf   : > { %v2784_v56 = vmax.f32 %v2746_v27, 0.0 }
 0x3d1   : > { %v2799_v24 = vpack.c.bf16 %v2784_v56, %v2783_v1  ;;  %v2721_v14 = vpop.f32.mrf.mxu2 }
 0x3d2   : > { %v2722_v0 = vadd.f32 %v6643_v6, %v2721_v14 }
 0x3d3   : > { %2883 = vmatmul.bf16.vlgmr.msrb.gmra.mxu0 %v2799_v24 }
 0x3d4   : > { %v2748_v16 = vpop.f32.mrf.mxu3 }
 0x3d5   : > { %v2749_v25 = vadd.f32 %v2748_v16, %v2700_v29  ;;  %v4486_v29 = vld [vmem:[%s6969_s13 + $0x10] sm:$0xff] }
 0x3d6   : > { %3025 = vmatpush.bf16.msrb.mxu1 %v4486_v29  ;;  %4498 = vmatpush.bf16.msrb.mxu2 %v4486_v29 }
 0x3d7   : > { %v2785_v41 = vmax.f32 %v2749_v25, 0.0  ;;  %v4485_v25 = vld [vmem:[%s6969_s13 + $0x8] sm:$0xff] }
 0x3d9   : > { %v2724_v42 = vpop.f32.mrf.mxu2 }
 0x3da   : > { %v2725_v31 = vadd.f32 %v6643_v6, %v2724_v42  ;;  %3026 = vmatpush.bf16.msrb.mxu1 %v4485_v25  ;;  %4499 = vmatpush.bf16.msrb.mxu2 %v4485_v25 }
 0x3dc   : > { %v2750_v3 = vpop.f32.mrf.mxu3 }
 0x3dd   : > { %v2751_v17 = vadd.f32 %v2750_v3, %v2702_v44 }
 0x3de   : > { %3027 = vmatpush.bf16.msrb.mxu1 %v4484_v54  ;;  %4500 = vmatpush.bf16.msrb.mxu2 %v4484_v54 }
 0x3df   : > { %v2786_v43 = vmax.f32 %v2751_v17, 0.0 }
 0x3e1   : > { %v2800_v52 = vpack.c.bf16 %v2786_v43, %v2785_v41  ;;  %v2726_v49 = vpop.f32.mrf.mxu2 }
 0x3e2   : > { %v2727_v2 = vadd.f32 %v6643_v6, %v2726_v49 }
 0x3e3   : > { %2888 = vmatmul.bf16.gmra.mxu0 %v2800_v52 }
 0x3e4   : > { %v2753_v59 = vpop.f32.mrf.mxu3 }
 0x3e5   : > { %v2754_v37 = vadd.f32 %v2753_v59, %v2705_v48 }
 0x3e7   : > { %v2787_v61 = vmax.f32 %v2754_v37, 0.0 }
 0x3e9   : > { %v2729_v56 = vpop.f32.mrf.mxu2 }
 0x3ea   : > { %v2730_v17 = vadd.f32 %v6643_v6, %v2729_v56 }
 0x3ec   : > { %v2755_v22 = vpop.f32.mrf.mxu3 }
 0x3ed   : > { %v2756_v34 = vadd.f32 %v2755_v22, %v2707_v51  ;;  %v6676_v22 = vld [vmem:[%s6967_s11] ss:$0 sm:$0xff] }
 0x3ef   : > { %v2788_v21 = vmax.f32 %v2756_v34, 0.0 }
 0x3f1   : > { %v2801_v62 = vpack.c.bf16 %v2788_v21, %v2787_v61  ;;  %v2731_v3 = vpop.f32.mrf.mxu2 }
 0x3f2   : > { %v2732_v41 = vadd.f32 %v6643_v6, %v2731_v3 }
 0x3f3   : > { %2893 = vmatmul.bf16.gmra.mxu0 %v2801_v62 }
 0x3f4   : > { %v2758_v26 = vpop.f32.mrf.mxu3 }
 0x3f5   : > { %v2759_v55 = vadd.f32 %v2758_v26, %v2710_v30 }
 0x3f7   : > { %v2789_v53 = vmax.f32 %v2759_v55, 0.0 }
 0x3fc   : > { %v2760_v12 = vpop.f32.mrf.mxu3 }
 0x3fd   : > { %v2761_v9 = vadd.f32 %v2760_v12, %v2712_v11 }
 0x3ff   : > { %v2790_v50 = vmax.f32 %v2761_v9, 0.0 }
 0x401   : > { %v2802_v58 = vpack.c.bf16 %v2790_v50, %v2789_v53 }
 0x403   : > { %2898 = vmatmul.bf16.gmra.mxu0 %v2802_v58 }
 0x404   : > { %v2763_v39 = vpop.f32.mrf.mxu3 }
 0x405   : > { %v2764_v10 = vadd.f32 %v2763_v39, %v2715_v4 }
 0x407   : > { %v2791_v63 = vmax.f32 %v2764_v10, 0.0 }
 0x40c   : > { %v2765_v57 = vpop.f32.mrf.mxu3 }
 0x40d   : > { %v2766_v20 = vadd.f32 %v2765_v57, %v2717_v60 }
 0x40f   : > { %v2792_v33 = vmax.f32 %v2766_v20, 0.0 }
 0x411   : > { %v2803_v8 = vpack.c.bf16 %v2792_v33, %v2791_v63 }
 0x413   : > { %2903 = vmatmul.bf16.gmra.mxu0 %v2803_v8 }
 0x414   : > { %v2768_v28 = vpop.f32.mrf.mxu3 }
 0x415   : > { %v2769_v18 = vadd.f32 %v2768_v28, %v2720_v47 }
 0x417   : > { %v2793_v13 = vmax.f32 %v2769_v18, 0.0 }
 0x41c   : > { %v2770_v38 = vpop.f32.mrf.mxu3 }
 0x41d   : > { %v2771_v19 = vadd.f32 %v2770_v38, %v2722_v0 }
 0x41f   : > { %v2794_v32 = vmax.f32 %v2771_v19, 0.0 }
 0x421   : > { %v2804_v46 = vpack.c.bf16 %v2794_v32, %v2793_v13 }
 0x423   : > { %2908 = vmatmul.bf16.gmra.mxu0 %v2804_v46 }
 0x424   : > { %v2773_v15 = vpop.f32.mrf.mxu3 }
 0x425   : > { %v2774_v35 = vadd.f32 %v2773_v15, %v2725_v31 }
 0x427   : > { %v2795_v24 = vmax.f32 %v2774_v35, 0.0 }
 0x42c   : > { %v2775_v27 = vpop.f32.mrf.mxu3 }
 0x42d   : > { %v2776_v1 = vadd.f32 %v2775_v27, %v2727_v2  ;;  %v4483_v2 = vld [vmem:[%s6968_s12 + $0x18] sm:$0xff]  ;;  %v4482_v27 = vld [vmem:[%s6968_s12 + $0x10] sm:$0xff] }
 0x42e   : > { %3121 = vmatpush.bf16.msra.mxu2 %v4483_v2 }
 0x42f   : > { %v2796_v36 = vmax.f32 %v2776_v1, 0.0  ;;  %v4481_v1 = vld [vmem:[%s6968_s12 + $0x8] sm:$0xff] }
 0x431   : > { %v2805_v16 = vpack.c.bf16 %v2796_v36, %v2795_v24  ;;  %v4480_v36 = vld [vmem:[%s6968_s12] sm:$0xff] }
 0x432   : > { %3122 = vmatpush.bf16.msra.mxu2 %v4482_v27 }
 0x433   : > { %2913 = vmatmul.bf16.gmra.mxu0 %v2805_v16 }
 0x434   : > { %v2778_v44 = vpop.f32.mrf.mxu3 }
 0x435   : > { %v2779_v43 = vadd.f32 %v2778_v44, %v2730_v17 }
 0x436   : > { %3123 = vmatpush.bf16.msra.mxu2 %v4481_v1 }
 0x437   : > { %v2797_v5 = vmax.f32 %v2779_v43, 0.0 }
 0x43a   : > { %3124 = vmatpush.bf16.msra.mxu2 %v4480_v36 }
 0x43c   : > { %v2780_v52 = vpop.f32.mrf.mxu3 }
 0x43d   : > { %v2781_v59 = vadd.f32 %v2780_v52, %v2732_v41 }
 0x43f   : > { %v2798_v48 = vmax.f32 %v2781_v59, 0.0 }
 0x441   : > { %v2806_v51 = vpack.c.bf16 %v2798_v48, %v2797_v5  ;;  %v7101_v5 = vld [vmem:[#allocation22_spill] sm:$0xff]  ;;  %v7102_v48 = vld [vmem:[#allocation21_spill] sm:$0xff] }
 0x443   : > { %2918 = vmatmul.bf16.gmra.mxu0 %v2806_v51  ;;  %v7103_v51 = vpack.c.bf16 %v7101_v5, %v7102_v48 }
 0x450   : > { %v2884_v37 = vpop.f32.mrf.mxu0 }
 0x451   : > { %v2885_v34 = vadd.f32 %v6676_v22, %v2884_v37  ;;  %v7104_v37 = vld [vmem:[#allocation27_spill] sm:$0xff] }
 0x453   : > { %v2924_v21 = vmax.f32 %v2885_v34, 0.0  ;;  %v7105_v34 = vld [vmem:[#allocation26_spill] sm:$0xff] }
 0x458   : > { %v2886_v61 = vpop.f32.mrf.mxu0 }
 0x459   : > { %v2887_v6 = vadd.f32 %v6676_v22, %v2886_v61  ;;  %v7106_v61 = vpack.c.bf16 %v7104_v37, %v7105_v34 }
 0x45b   : > { %v2925_v62 = vmax.f32 %v2887_v6, 0.0  ;;  %v7107_v6 = vld [vmem:[#allocation32_spill] sm:$0xff] }
 0x45d   : > { %v2956_v45 = vpack.c.bf16 %v2925_v62, %v2924_v21  ;;  %v7108_v21 = vld [vmem:[#allocation31_spill] sm:$0xff] }
 0x45e   : > { %v7109_v62 = vpack.c.bf16 %v7107_v6, %v7108_v21 }
 0x45f   : > { %4294 = vmatmul.msk.bf16.vlgmr.msrb.gmra.mxu1 %vm689_vm2, %v2956_v45  ;;  %v7111_v45 = vld [vmem:[#allocation36_spill] sm:$0xff] }
 0x460   : > { %v2889_v26 = vpop.f32.mrf.mxu0 }
 0x461   : > { %v2890_v30 = vadd.f32 %v6676_v22, %v2889_v26 }
 0x463   : > { %v2926_v23 = vmax.f32 %v2890_v30, 0.0  ;;  %v7113_v30 = vld [vmem:[#allocation44_spill] sm:$0xff] }
 0x468   : > { %v2891_v11 = vpop.f32.mrf.mxu0 }
 0x469   : > { %v2892_v55 = vadd.f32 %v6676_v22, %v2891_v11  ;;  %v7114_v11 = vld [vmem:[#allocation43_spill] sm:$0xff] }
 0x46b   : > { %v2927_v12 = vmax.f32 %v2892_v55, 0.0  ;;  %v7115_v55 = vpack.c.bf16 %v7113_v30, %v7114_v11 }
 0x46d   : > { %v2957_v9 = vpack.c.bf16 %v2927_v12, %v2926_v23  ;;  %v7116_v23 = vld [vmem:[#allocation49_spill] sm:$0xff]  ;;  %v7117_v12 = vld [vmem:[#allocation48_spill] sm:$0xff] }
 0x46f   : > { %4295 = vmatmul.msk.bf16.gmra.mxu1 %vm689_vm2, %v2957_v9  ;;  %v7118_v9 = vpack.c.bf16 %v7116_v23, %v7117_v12 }
 0x470   : > { %v2894_v53 = vpop.f32.mrf.mxu0 }
 0x471   : > { %v2895_v50 = vadd.f32 %v6676_v22, %v2894_v53  ;;  %v7119_v53 = vld [vmem:[#allocation51_spill] sm:$0xff] }
 0x473   : > { %v2928_v40 = vmax.f32 %v2895_v50, 0.0  ;;  %v7120_v50 = vld [vmem:[#allocation50_spill] sm:$0xff] }
 0x478   : > { %v2896_v58 = vpop.f32.mrf.mxu0 }
 0x479   : > { %v2897_v39 = vadd.f32 %v6676_v22, %v2896_v58  ;;  %v7121_v58 = vpack.c.bf16 %v7119_v53, %v7120_v50 }
 0x47b   : > { %v2929_v4 = vmax.f32 %v2897_v39, 0.0 }
 0x47d   : > { %v2958_v60 = vpack.c.bf16 %v2929_v4, %v2928_v40  ;;  %v7122_v40 = vld [vmem:[#allocation53_spill] sm:$0xff]  ;;  %v7123_v4 = vld [vmem:[#allocation52_spill] sm:$0xff] }
 0x47f   : > { %4296 = vmatmul.msk.bf16.gmra.mxu1 %vm689_vm2, %v2958_v60  ;;  %v7124_v60 = vpack.c.bf16 %v7122_v40, %v7123_v4 }
 0x480   : > { %v2899_v10 = vpop.f32.mrf.mxu0 }
 0x481   : > { %v2900_v57 = vadd.f32 %v6676_v22, %v2899_v10 }
 0x483   : > { %v2930_v33 = vmax.f32 %v2900_v57, 0.0 }
 0x488   : > { %v2901_v20 = vpop.f32.mrf.mxu0 }
 0x489   : > { %v2902_v63 = vadd.f32 %v6676_v22, %v2901_v20 }
 0x48b   : > { %v2931_v14 = vmax.f32 %v2902_v63, 0.0 }
 0x48d   : > { %v2959_v8 = vpack.c.bf16 %v2931_v14, %v2930_v33  ;;  %v6753_v33 = vld [vmem:[%s6970_s14] ss:$0 sm:$0xff] }
 0x48f   : > { %4297 = vmatmul.msk.bf16.gmra.mxu1 %vm689_vm2, %v2959_v8 }
 0x490   : > { %v2904_v28 = vpop.f32.mrf.mxu0 }
 0x491   : > { %v2905_v47 = vadd.f32 %v6676_v22, %v2904_v28 }
 0x493   : > { %v2932_v18 = vmax.f32 %v2905_v47, 0.0 }
 0x498   : > { %v2906_v42 = vpop.f32.mrf.mxu0 }
 0x499   : > { %v2907_v0 = vadd.f32 %v6676_v22, %v2906_v42 }
 0x49b   : > { %v2933_v38 = vmax.f32 %v2907_v0, 0.0 }
 0x49d   : > { %v2960_v19 = vpack.c.bf16 %v2933_v38, %v2932_v18 }
 0x49f   : > { %4298 = vmatmul.msk.bf16.gmra.mxu1 %vm689_vm2, %v2960_v19 }
 0x4a0   : > { %v2909_v13 = vpop.f32.mrf.mxu0 }
 0x4a1   : > { %v2910_v32 = vadd.f32 %v6676_v22, %v2909_v13 }
 0x4a3   : > { %v2934_v49 = vmax.f32 %v2910_v32, 0.0 }
 0x4a8   : > { %v2911_v46 = vpop.f32.mrf.mxu0 }
 0x4a9   : > { %v2912_v7 = vadd.f32 %v6676_v22, %v2911_v46 }
 0x4ab   : > { %v2935_v15 = vmax.f32 %v2912_v7, 0.0 }
 0x4ad   : > { %v2961_v31 = vpack.c.bf16 %v2935_v15, %v2934_v49 }
 0x4af   : > { %4299 = vmatmul.msk.bf16.gmra.mxu1 %vm689_vm2, %v2961_v31 }
 0x4b0   : > { %v2914_v35 = vpop.f32.mrf.mxu0 }
 0x4b1   : > { %v2915_v56 = vadd.f32 %v6676_v22, %v2914_v35 }
 0x4b3   : > { %v2936_v29 = vmax.f32 %v2915_v56, 0.0 }
 0x4b8   : > { %v2916_v24 = vpop.f32.mrf.mxu0 }
 0x4b9   : > { %v2917_v16 = vadd.f32 %v6676_v22, %v2916_v24 }
 0x4bb   : > { %v2937_v44 = vmax.f32 %v2917_v16, 0.0 }
 0x4bd   : > { %v2962_v25 = vpack.c.bf16 %v2937_v44, %v2936_v29 }
 0x4bf   : > { %4300 = vmatmul.msk.bf16.gmra.mxu1 %vm689_vm2, %v2962_v25 }
 0x4c0   : > { %v2919_v3 = vpop.f32.mrf.mxu0 }
 0x4c1   : > { %v2920_v17 = vadd.f32 %v6676_v22, %v2919_v3 }
 0x4c3   : > { %v2938_v43 = vmax.f32 %v2920_v17, 0.0 }
 0x4c8   : > { %v2921_v54 = vpop.f32.mrf.mxu0 }
 0x4c9   : > { %v2922_v41 = vadd.f32 %v6676_v22, %v2921_v54  ;;  %v7110_v22 = vld [vmem:[#allocation37_spill] sm:$0xff] }
 0x4ca   : > { %v7112_v26 = vpack.c.bf16 %v7110_v22, %v7111_v45 }
 0x4cb   : > { %v2939_v52 = vmax.f32 %v2922_v41, 0.0 }
 0x4cd   : > { %v2963_v59 = vpack.c.bf16 %v2939_v52, %v2938_v43 }
 0x4cf   : > { %4301 = vmatmul.msk.bf16.vlgmr.msrb.gmra.mxu2 %vm689_vm2, %v2963_v59 }
 0x4dc   : > { %v3029_v39 = vpop.f32.mrf.mxu1 }
 0x4df   : > { %4318 = vmatmul.msk.bf16.vlgmr.msra.gmra.mxu2 %vm689_vm2, %v7103_v51 }
 0x4e4   : > { %v3031_v10 = vpop.f32.mrf.mxu1 }
 0x4ec   : > { %v3034_v63 = vpop.f32.mrf.mxu1 }
 0x4ef   : > { %4319 = vmatmul.msk.bf16.gmra.mxu2 %vm689_vm2, %v7106_v61 }
 0x4f4   : > { %v3036_v47 = vpop.f32.mrf.mxu1 }
 0x4fc   : > { %v3039_v38 = vpop.f32.mrf.mxu1 }
 0x4ff   : > { %4320 = vmatmul.msk.bf16.gmra.mxu2 %vm689_vm2, %v7109_v62 }
 0x504   : > { %v3041_v46 = vpop.f32.mrf.mxu1 }
 0x50c   : > { %v3044_v35 = vpop.f32.mrf.mxu1 }
 0x50f   : > { %4321 = vmatmul.msk.bf16.gmra.mxu2 %vm689_vm2, %v7112_v26 }
 0x514   : > { %v3046_v36 = vpop.f32.mrf.mxu1 }
 0x51c   : > { %v3049_v25 = vpop.f32.mrf.mxu1 }
 0x51f   : > { %4322 = vmatmul.msk.bf16.gmra.mxu2 %vm689_vm2, %v7115_v55 }
 0x524   : > { %v3051_v41 = vpop.f32.mrf.mxu1 }
 0x52c   : > { %v3054_v51 = vpop.f32.mrf.mxu1 }
 0x52f   : > { %4323 = vmatmul.msk.bf16.gmra.mxu2 %vm689_vm2, %v7118_v9 }
 0x534   : > { %v3056_v21 = vpop.f32.mrf.mxu1 }
 0x53c   : > { %v3059_v26 = vpop.f32.mrf.mxu1 }
 0x53f   : > { %4324 = vmatmul.msk.bf16.gmra.mxu2 %vm689_vm2, %v7121_v58 }
 0x544   : > { %v3061_v23 = vpop.f32.mrf.mxu1 }
 0x54f   : > { %4325 = vmatmul.msk.bf16.gmra.mxu2 %vm689_vm2, %v7124_v60 }
 0x552   : > { %v6746_v57 = vpop.f32.mrf.mxu2 }
 0x55a   : > { %v6748_v20 = vpop.f32.mrf.mxu2 }
 0x562   : > { %v3126_v14 = vpop.f32.mrf.mxu2 }
 0x563   : > { %v3127_v8 = vadd.f32 %v3126_v14, %v3029_v39 }
 0x565   : > { %v6756_v28 = vadd.f32 %v6753_v33, %v3127_v8 }
 0x567   : > { %3186 = vmax.xlane.f32.xlu0 %v6756_v28 }
 0x56a   : > { %v3128_v42 = vpop.f32.mrf.mxu2 }
 0x56b   : > { %v3129_v0 = vadd.f32 %v3128_v42, %v3031_v10 }
 0x56d   : > { %v6760_v18 = vadd.f32 %v6753_v33, %v3129_v0 }
 0x56f   : > { %3188 = vmax.xlane.f32.xlu0 %v6760_v18 }
 0x572   : > { %v3131_v19 = vpop.f32.mrf.mxu2 }
 0x573   : > { %v3132_v13 = vadd.f32 %v3131_v19, %v3034_v63 }
 0x575   : > { %v6764_v32 = vadd.f32 %v6753_v33, %v3132_v13 }
 0x577   : > { %3190 = vmax.xlane.f32.xlu1 %v6764_v32 }
 0x57a   : > { %v3133_v7 = vpop.f32.mrf.mxu2 }
 0x57b   : > { %v3134_v49 = vadd.f32 %v3133_v7, %v3036_v47 }
 0x57d   : > { %v6768_v15 = vadd.f32 %v6753_v33, %v3134_v49 }
 0x57f   : > { %3192 = vmax.xlane.f32.xlu1 %v6768_v15 }
 0x582   : > { %v3136_v31 = vpop.f32.mrf.mxu2 }
 0x583   : > { %v3137_v2 = vadd.f32 %v3136_v31, %v3039_v38 }
 0x585   : > { %v6772_v27 = vadd.f32 %v6753_v33, %v3137_v2 }
 0x587   : > { %3194 = vmax.xlane.f32.xlu2 %v6772_v27 }
 0x58a   : > { %v3138_v1 = vpop.f32.mrf.mxu2 }
 0x58b   : > { %v3139_v56 = vadd.f32 %v3138_v1, %v3041_v46 }
 0x58d   : > { %v6776_v24 = vadd.f32 %v6753_v33, %v3139_v56 }
 0x58f   : > { %3196 = vmax.xlane.f32.xlu2 %v6776_v24 }
 0x592   : > { %v3141_v16 = vpop.f32.mrf.mxu2 }
 0x593   : > { %v3142_v29 = vadd.f32 %v3141_v16, %v3044_v35 }
 0x595   : > { %v6780_v44 = vadd.f32 %v6753_v33, %v3142_v29 }
 0x597   : > { %3198 = vmax.xlane.f32.xlu0 %v6780_v44 }
 0x59a   : > { %v3143_v3 = vpop.f32.mrf.mxu2 }
 0x59b   : > { %v3144_v17 = vadd.f32 %v3143_v3, %v3046_v36 }
 0x59d   : > { %v6784_v54 = vadd.f32 %v6753_v33, %v3144_v17 }
 0x59f   : > { %3200 = vmax.xlane.f32.xlu1 %v6784_v54 }
 0x5a2   : > { %v3146_v43 = vpop.f32.mrf.mxu2 }
 0x5a3   : > { %v3147_v52 = vadd.f32 %v3146_v43, %v3049_v25 }
 0x5a5   : > { %v6788_v59 = vadd.f32 %v6753_v33, %v3147_v52 }
 0x5a7   : > { %3202 = vmax.xlane.f32.xlu2 %v6788_v59 }
 0x5aa   : > { %v3148_v5 = vpop.f32.mrf.mxu2 }
 0x5ab   : > { %v3149_v48 = vadd.f32 %v3148_v5, %v3051_v41 }
 0x5ad   : > { %v6792_v37 = vadd.f32 %v6753_v33, %v3149_v48 }
 0x5af   : > { %3204 = vmax.xlane.f32.xlu0 %v6792_v37 }
 0x5b2   : > { %v3151_v34 = vpop.f32.mrf.mxu2 }
 0x5b3   : > { %v3152_v61 = vadd.f32 %v3151_v34, %v3054_v51 }
 0x5b5   : > { %v6796_v6 = vadd.f32 %v6753_v33, %v3152_v61 }
 0x5b7   : > { %3206 = vmax.xlane.f32.xlu1 %v6796_v6 }
 0x5ba   : > { %v3153_v62 = vpop.f32.mrf.mxu2 }
 0x5bb   : > { %v3154_v22 = vadd.f32 %v3153_v62, %v3056_v21 }
 0x5bd   : > { %v6800_v45 = vadd.f32 %v6753_v33, %v3154_v22 }
 0x5bf   : > { %3208 = vmax.xlane.f32.xlu2 %v6800_v45 }
 0x5c2   : > { %v3156_v30 = vpop.f32.mrf.mxu2 }
 0x5c3   : > { %v3157_v11 = vadd.f32 %v3156_v30, %v3059_v26 }
 0x5c5   : > { %v6804_v55 = vadd.f32 %v6753_v33, %v3157_v11 }
 0x5c7   : > { %3210 = vmax.xlane.f32.xlu0 %v6804_v55 }
 0x5ca   : > { %v3158_v12 = vpop.f32.mrf.mxu2 }
 0x5cb   : > { %v3159_v9 = vadd.f32 %v3158_v12, %v3061_v23 }
 0x5cd   : > { %v6808_v53 = vadd.f32 %v6753_v33, %v3159_v9 }
 0x5cf   : > { %3212 = vmax.xlane.f32.xlu1 %v6808_v53 }
 0x5d2   : > { %v3161_v50 = vpop.f32.mrf.mxu2 }
 0x5d3   : > { %v3162_v58 = vadd.f32 %v3161_v50, %v6746_v57 }
 0x5d5   : > { %v6813_v39 = vadd.f32 %v6753_v33, %v3162_v58 }
 0x5d7   : > { %3214 = vmax.xlane.f32.xlu2 %v6813_v39 }
 0x5da   : > { %v3163_v40 = vpop.f32.mrf.mxu2  ;;  %v3187_v4 = vpop.xlane.xlu0 %3186 }
 0x5db   : > { %v3164_v60 = vadd.f32 %v3163_v40, %v6748_v20  ;;  %v3218_v10 = vsub.f32 %v6756_v28, %v3187_v4 }
 0x5dd   : > { %v3234_v63 = vmul.f32 1.442695, %v3218_v10  ;;  %v6819_v14 = vadd.f32 %v6753_v33, %v3164_v60 }
 0x5df   : > { %4611 = vpow2.f32 %v3234_v63  ;;  %3216 = vmax.xlane.f32.xlu0 %v6819_v14 }
 0x5e2   : > { %v3189_v8 = vpop.xlane.xlu0 %3188 }
 0x5e3   : > { %v3219_v57 = vsub.f32 %v6760_v18, %v3189_v8 }
 0x5e5   : > { %v6823_v47 = vpop.eup %4611  ;;  %v3236_v42 = vmul.f32 1.442695, %v3219_v57 }
 0x5e6   : > { %3266 = vadd.xlane.f32.xlu1 %v6823_v47 }
 0x5e7   : > { %4613 = vpow2.f32 %v3236_v42 }
 0x5ea   : > { %v3191_v0 = vpop.xlane.xlu1 %3190 }
 0x5eb   : > { %v3220_v20 = vsub.f32 %v6764_v32, %v3191_v0 }
 0x5ed   : > { %v6827_v28 = vpop.eup %4613  ;;  %v3238_v38 = vmul.f32 1.442695, %v3220_v20 }
 0x5ee   : > { %3268 = vadd.xlane.f32.xlu2 %v6827_v28 }
 0x5ef   : > { %4615 = vpow2.f32 %v3238_v38 }
 0x5f2   : > { %v3193_v33 = vpop.xlane.xlu1 %3192 }
 0x5f3   : > { %v3221_v19 = vsub.f32 %v6768_v15, %v3193_v33 }
 0x5f5   : > { %v6831_v13 = vpop.eup %4615  ;;  %v3240_v18 = vmul.f32 1.442695, %v3221_v19 }
 0x5f6   : > { %3270 = vadd.xlane.f32.xlu0 %v6831_v13 }
 0x5f7   : > { %4617 = vpow2.f32 %v3240_v18 }
 0x5fa   : > { %v3195_v46 = vpop.xlane.xlu2 %3194 }
 0x5fb   : > { %v3222_v7 = vsub.f32 %v6772_v27, %v3195_v46 }
 0x5fd   : > { %v6835_v49 = vpop.eup %4617  ;;  %v3242_v32 = vmul.f32 1.442695, %v3222_v7 }
 0x5fe   : > { %3272 = vadd.xlane.f32.xlu1 %v6835_v49 }
 0x5ff   : > { %4619 = vpow2.f32 %v3242_v32 }
 0x602   : > { %v3197_v31 = vpop.xlane.xlu2 %3196 }
 0x603   : > { %v3223_v2 = vsub.f32 %v6776_v24, %v3197_v31 }
 0x605   : > { %v6839_v35 = vpop.eup %4619  ;;  %v3244_v15 = vmul.f32 1.442695, %v3223_v2 }
 0x606   : > { %3274 = vadd.xlane.f32.xlu2 %v6839_v35 }
 0x607   : > { %4621 = vpow2.f32 %v3244_v15 }
 0x60a   : > { %v3199_v1 = vpop.xlane.xlu0 %3198 }
 0x60b   : > { %v3224_v56 = vsub.f32 %v6780_v44, %v3199_v1 }
 0x60d   : > { %v6843_v36 = vpop.eup %4621  ;;  %v3246_v27 = vmul.f32 1.442695, %v3224_v56 }
 0x60e   : > { %3276 = vadd.xlane.f32.xlu0 %v6843_v36 }
 0x60f   : > { %4623 = vpow2.f32 %v3246_v27 }
 0x612   : > { %v3201_v16 = vpop.xlane.xlu1 %3200 }
 0x613   : > { %v3225_v29 = vsub.f32 %v6784_v54, %v3201_v16 }
 0x615   : > { %v6847_v25 = vpop.eup %4623  ;;  %v3248_v24 = vmul.f32 1.442695, %v3225_v29 }
 0x616   : > { %3278 = vadd.xlane.f32.xlu1 %v6847_v25 }
 0x617   : > { %4625 = vpow2.f32 %v3248_v24 }
 0x61a   : > { %v3203_v3 = vpop.xlane.xlu2 %3202 }
 0x61b   : > { %v3226_v17 = vsub.f32 %v6788_v59, %v3203_v3 }
 0x61d   : > { %v6851_v41 = vpop.eup %4625  ;;  %v3250_v44 = vmul.f32 1.442695, %v3226_v17 }
 0x61e   : > { %3280 = vadd.xlane.f32.xlu2 %v6851_v41 }
 0x61f   : > { %4627 = vpow2.f32 %v3250_v44 }
 0x622   : > { %v3205_v43 = vpop.xlane.xlu0 %3204 }
 0x623   : > { %v3227_v52 = vsub.f32 %v6792_v37, %v3205_v43 }
 0x625   : > { %v6855_v5 = vpop.eup %4627  ;;  %v3252_v54 = vmul.f32 1.442695, %v3227_v52 }
 0x626   : > { %3282 = vadd.xlane.f32.xlu0 %v6855_v5 }
 0x627   : > { %4629 = vpow2.f32 %v3252_v54 }
 0x62a   : > { %v3207_v48 = vpop.xlane.xlu1 %3206 }
 0x62b   : > { %v3228_v51 = vsub.f32 %v6796_v6, %v3207_v48 }
 0x62d   : > { %v6859_v34 = vpop.eup %4629  ;;  %v3254_v59 = vmul.f32 1.442695, %v3228_v51 }
 0x62e   : > { %3284 = vadd.xlane.f32.xlu1 %v6859_v34 }
 0x62f   : > { %4631 = vpow2.f32 %v3254_v59 }
 0x632   : > { %v3209_v61 = vpop.xlane.xlu2 %3208 }
 0x633   : > { %v3229_v21 = vsub.f32 %v6800_v45, %v3209_v61 }
 0x635   : > { %v6863_v62 = vpop.eup %4631  ;;  %v3256_v37 = vmul.f32 1.442695, %v3229_v21 }
 0x636   : > { %3286 = vadd.xlane.f32.xlu2 %v6863_v62 }
 0x637   : > { %4633 = vpow2.f32 %v3256_v37 }
 0x63a   : > { %v3211_v22 = vpop.xlane.xlu0 %3210 }
 0x63b   : > { %v3230_v26 = vsub.f32 %v6804_v55, %v3211_v22 }
 0x63d   : > { %v6867_v30 = vpop.eup %4633  ;;  %v3258_v6 = vmul.f32 1.442695, %v3230_v26 }
 0x63e   : > { %3288 = vadd.xlane.f32.xlu0 %v6867_v30 }
 0x63f   : > { %4635 = vpow2.f32 %v3258_v6 }
 0x642   : > { %v3213_v11 = vpop.xlane.xlu1 %3212 }
 0x643   : > { %v3231_v23 = vsub.f32 %v6808_v53, %v3213_v11 }
 0x645   : > { %v6871_v12 = vpop.eup %4635  ;;  %v3260_v45 = vmul.f32 1.442695, %v3231_v23 }
 0x646   : > { %3290 = vadd.xlane.f32.xlu1 %v6871_v12 }
 0x647   : > { %4637 = vpow2.f32 %v3260_v45 }
 0x64a   : > { %v3215_v9 = vpop.xlane.xlu2 %3214 }
 0x64b   : > { %v3232_v50 = vsub.f32 %v6813_v39, %v3215_v9 }
 0x64d   : > { %v6875_v58 = vpop.eup %4637  ;;  %v3262_v55 = vmul.f32 1.442695, %v3232_v50 }
 0x64e   : > { %3292 = vadd.xlane.f32.xlu2 %v6875_v58 }
 0x64f   : > { %4639 = vpow2.f32 %v3262_v55 }
 0x652   : > { %v3217_v40 = vpop.xlane.xlu0 %3216 }
 0x653   : > { %v3233_v4 = vsub.f32 %v6819_v14, %v3217_v40 }
 0x655   : > { %v6879_v53 = vpop.eup %4639  ;;  %v3264_v60 = vmul.f32 1.442695, %v3233_v4 }
 0x656   : > { %3294 = vadd.xlane.f32.xlu0 %v6879_v53 }
 0x657   : > { %4641 = vpow2.f32 %v3264_v60 }
 0x659   : > { %v3267_v10 = vpop.xlane.xlu1 %3266 }
 0x65a   : > { %4643 = vrcp.f32 %v3267_v10  ;;  %v3309_v14 = vand.u32 2147483648, %v3267_v10  ;;  %v3307_v20 = vand.u32 2147483647, %v3267_v10  ;;  %vm3303_vm4 = vweird.f32 %v3267_v10 }
 0x65c   : > { %v3310_v19 = vor.u32 1.1754944e-38, %v3309_v14  ;;  %vm3308_vm6 = vcmp.eq.f32.partialorder %v3307_v20, 8.507059e+37 }
 0x65d   : > { %v6882_v39 = vpop.eup %4641 }
 0x65e   : > { %3296 = vadd.xlane.f32.xlu1 %v6882_v39 }
 0x660   : > { %v4644_v63 = vpop.eup %4643 }
 0x661   : > { %v3299_v8 = vmul.f32 %v4644_v63, %v3267_v10  ;;  %v3269_v57 = vpop.xlane.xlu2 %3268  ;;  %vm3304_vm3 = vweird.f32 %v4644_v63 }
 0x662   : > { %4645 = vrcp.f32 %v3269_v57  ;;  %vm3305_vm5 = vmor %vm3303_vm4, %vm3304_vm3  ;;  %v3323_v15 = vand.u32 2147483648, %v3269_v57  ;;  %v3321_v56 = vand.u32 2147483647, %v3269_v57  ;;  %vm3317_vm8 = vweird.f32 %v3269_v57 }
 0x663   : > { %v3300_v42 = vsub.f32 1.0, %v3299_v8 }
 0x664   : > { %v3324_v29 = vor.u32 1.1754944e-38, %v3323_v15  ;;  %vm3322_vm10 = vcmp.eq.f32.partialorder %v3321_v56, 8.507059e+37 }
 0x665   : > { %v3301_v0 = vmul.f32 %v4644_v63, %v3300_v42 }
 0x667   : > { %v3302_v38 = vadd.f32 %v4644_v63, %v3301_v0 }
 0x668   : > { %v4646_v33 = vpop.eup %4645 }
 0x669   : > { %v3306_v18 = vsel %vm3305_vm5, %v4644_v63, %v3302_v38  ;;  %v3313_v46 = vmul.f32 %v4646_v33, %v3269_v57  ;;  %v3271_v7 = vpop.xlane.xlu0 %3270  ;;  %vm3318_vm7 = vweird.f32 %v4646_v33 }
 0x66a   : > { %v3311_v32 = vsel %vm3308_vm6, %v3310_v19, %v3306_v18  ;;  %4647 = vrcp.f32 %v3271_v7  ;;  %vm3319_vm9 = vmor %vm3317_vm8, %vm3318_vm7  ;;  %v3337_v52 = vand.u32 2147483648, %v3271_v7  ;;  %v3335_v48 = vand.u32 2147483647, %v3271_v7 }
 0x66b   : > { %v3522_v31 = vmul.f32 %v6823_v47, %v3311_v32  ;;  %v3314_v2 = vsub.f32 1.0, %v3313_v46  ;;  %vm3331_vm12 = vweird.f32 %v3271_v7 }
 0x66c   : > { %v3338_v61 = vor.u32 1.1754944e-38, %v3337_v52  ;;  %vm3336_vm14 = vcmp.eq.f32.partialorder %v3335_v48, 8.507059e+37 }
 0x66d   : > { %3538 = vst [vmem:[%s6889_s30] sm:$0xff] %v3522_v31  ;;  %v3315_v1 = vmul.f32 %v4646_v33, %v3314_v2 }
 0x66f   : > { %v3316_v27 = vadd.f32 %v4646_v33, %v3315_v1 }
 0x670   : > { %v4648_v16 = vpop.eup %4647 }
 0x671   : > { %v3320_v24 = vsel %vm3319_vm9, %v4646_v33, %v3316_v27  ;;  %v3327_v3 = vmul.f32 %v4648_v16, %v3271_v7  ;;  %v3273_v17 = vpop.xlane.xlu1 %3272  ;;  %vm3332_vm11 = vweird.f32 %v4648_v16 }
 0x672   : > { %v3325_v47 = vsel %vm3322_vm10, %v3324_v29, %v3320_v24  ;;  %4649 = vrcp.f32 %v3273_v17  ;;  %vm3333_vm13 = vmor %vm3331_vm12, %vm3332_vm11  ;;  %v3351_v11 = vand.u32 2147483648, %v3273_v17  ;;  %v3349_v45 = vand.u32 2147483647, %v3273_v17 }
 0x673   : > { %v3523_v44 = vmul.f32 %v6827_v28, %v3325_v47  ;;  %v3328_v43 = vsub.f32 1.0, %v3327_v3  ;;  %vm3345_vm0 = vweird.f32 %v3273_v17 }
 0x674   : > { %v3352_v55 = vor.u32 1.1754944e-38, %v3351_v11  ;;  %vm3350_vm2 = vcmp.eq.f32.partialorder %v3349_v45, 8.507059e+37 }
 0x675   : > { %3539 = vst [vmem:[%s6889_s30 + $0x8] sm:$0xff] %v3523_v44  ;;  %v3329_v54 = vmul.f32 %v4648_v16, %v3328_v43 }
 0x677   : > { %v3330_v51 = vadd.f32 %v4648_v16, %v3329_v54 }
 0x678   : > { %v4650_v59 = vpop.eup %4649 }
 0x679   : > { %v3334_v21 = vsel %vm3333_vm13, %v4648_v16, %v3330_v51  ;;  %v3341_v37 = vmul.f32 %v4650_v59, %v3273_v17  ;;  %v3275_v22 = vpop.xlane.xlu2 %3274  ;;  %vm3346_vm15 = vweird.f32 %v4650_v59 }
 0x67a   : > { %v3339_v26 = vsel %vm3336_vm14, %v3338_v61, %v3334_v21  ;;  %4651 = vrcp.f32 %v3275_v22  ;;  %vm3347_vm1 = vmor %vm3345_vm0, %vm3346_vm15  ;;  %v3365_v8 = vand.u32 2147483648, %v3275_v22  ;;  %v3363_v42 = vand.u32 2147483647, %v3275_v22 }
 0x67b   : > { %v3524_v28 = vmul.f32 %v6831_v13, %v3339_v26  ;;  %v3342_v6 = vsub.f32 1.0, %v3341_v37  ;;  %vm3359_vm4 = vweird.f32 %v3275_v22 }
 0x67c   : > { %v3366_v20 = vor.u32 1.1754944e-38, %v3365_v8  ;;  %vm3364_vm6 = vcmp.eq.f32.partialorder %v3363_v42, 8.507059e+37 }
 0x67d   : > { %3540 = vst [vmem:[%s6889_s30 + $0x10] sm:$0xff] %v3524_v28  ;;  %v3343_v23 = vmul.f32 %v4650_v59, %v3342_v6 }
 0x67f   : > { %v3344_v9 = vadd.f32 %v4650_v59, %v3343_v23 }
 0x680   : > { %v4652_v50 = vpop.eup %4651 }
 0x681   : > { %v3348_v40 = vsel %vm3347_vm1, %v4650_v59, %v3344_v9  ;;  %v3355_v4 = vmul.f32 %v4652_v50, %v3275_v22  ;;  %v3277_v60 = vpop.xlane.xlu0 %3276  ;;  %vm3360_vm3 = vweird.f32 %v4652_v50 }
 0x682   : > { %v3353_v10 = vsel %vm3350_vm2, %v3352_v55, %v3348_v40  ;;  %4653 = vrcp.f32 %v3277_v60  ;;  %vm3361_vm5 = vmor %vm3359_vm4, %vm3360_vm3  ;;  %v3379_v7 = vand.u32 2147483648, %v3277_v60  ;;  %v3377_v31 = vand.u32 2147483647, %v3277_v60 }
 0x683   : > { %v3525_v13 = vmul.f32 %v6835_v49, %v3353_v10  ;;  %v3356_v63 = vsub.f32 1.0, %v3355_v4  ;;  %vm3373_vm8 = vweird.f32 %v3277_v60 }
 0x684   : > { %v3380_v1 = vor.u32 1.1754944e-38, %v3379_v7  ;;  %vm3378_vm10 = vcmp.eq.f32.partialorder %v3377_v31, 8.507059e+37 }
 0x685   : > { %3541 = vst [vmem:[%s6889_s30 + $0x18] sm:$0xff] %v3525_v13  ;;  %v3357_v57 = vmul.f32 %v4652_v50, %v3356_v63 }
 0x687   : > { %v3358_v14 = vadd.f32 %v4652_v50, %v3357_v57 }
 0x688   : > { %v4654_v0 = vpop.eup %4653 }
 0x689   : > { %v3362_v38 = vsel %vm3361_vm5, %v4652_v50, %v3358_v14  ;;  %v3369_v33 = vmul.f32 %v4654_v0, %v3277_v60  ;;  %v3279_v19 = vpop.xlane.xlu1 %3278  ;;  %vm3374_vm7 = vweird.f32 %v4654_v0 }
 0x68a   : > { %v3367_v18 = vsel %vm3364_vm6, %v3366_v20, %v3362_v38  ;;  %4655 = vrcp.f32 %v3279_v19  ;;  %vm3375_vm9 = vmor %vm3373_vm8, %vm3374_vm7  ;;  %v3393_v3 = vand.u32 2147483648, %v3279_v19  ;;  %v3391_v47 = vand.u32 2147483647, %v3279_v19 }
 0x68b   : > { %v3526_v49 = vmul.f32 %v6839_v35, %v3367_v18  ;;  %v3370_v46 = vsub.f32 1.0, %v3369_v33  ;;  %vm3387_vm12 = vweird.f32 %v3279_v19 }
 0x68c   : > { %v3394_v52 = vor.u32 1.1754944e-38, %v3393_v3  ;;  %vm3392_vm14 = vcmp.eq.f32.partialorder %v3391_v47, 8.507059e+37 }
 0x68d   : > { %3542 = vst [vmem:[%s6889_s30 + $0x20] sm:$0xff] %v3526_v49  ;;  %v3371_v32 = vmul.f32 %v4654_v0, %v3370_v46 }
 0x68f   : > { %v3372_v2 = vadd.f32 %v4654_v0, %v3371_v32 }
 0x690   : > { %v4656_v15 = vpop.eup %4655 }
 0x691   : > { %v3376_v56 = vsel %vm3375_vm9, %v4654_v0, %v3372_v2  ;;  %v3383_v27 = vmul.f32 %v4656_v15, %v3279_v19  ;;  %v3281_v16 = vpop.xlane.xlu2 %3280  ;;  %vm3388_vm11 = vweird.f32 %v4656_v15 }
 0x692   : > { %v3381_v29 = vsel %vm3378_vm10, %v3380_v1, %v3376_v56  ;;  %4657 = vrcp.f32 %v3281_v16  ;;  %vm3389_vm13 = vmor %vm3387_vm12, %vm3388_vm11  ;;  %v3407_v21 = vand.u32 2147483648, %v3281_v16  ;;  %v3405_v22 = vand.u32 2147483647, %v3281_v16 }
 0x693   : > { %v3527_v35 = vmul.f32 %v6843_v36, %v3381_v29  ;;  %v3384_v24 = vsub.f32 1.0, %v3383_v27  ;;  %vm3401_vm0 = vweird.f32 %v3281_v16 }
 0x694   : > { %v3408_v6 = vor.u32 1.1754944e-38, %v3407_v21  ;;  %vm3406_vm2 = vcmp.eq.f32.partialorder %v3405_v22, 8.507059e+37 }
 0x695   : > { %3543 = vst [vmem:[%s6889_s30 + $0x28] sm:$0xff] %v3527_v35  ;;  %v3385_v17 = vmul.f32 %v4656_v15, %v3384_v24 }
 0x697   : > { %v3386_v44 = vadd.f32 %v4656_v15, %v3385_v17 }
 0x698   : > { %v4658_v43 = vpop.eup %4657 }
 0x699   : > { %v3390_v54 = vsel %vm3389_vm13, %v4656_v15, %v3386_v44  ;;  %v3397_v48 = vmul.f32 %v4658_v43, %v3281_v16  ;;  %v3283_v51 = vpop.xlane.xlu0 %3282  ;;  %vm3402_vm15 = vweird.f32 %v4658_v43 }
 0x69a   : > { %v3395_v59 = vsel %vm3392_vm14, %v3394_v52, %v3390_v54  ;;  %4659 = vrcp.f32 %v3283_v51  ;;  %vm3403_vm1 = vmor %vm3401_vm0, %vm3402_vm15  ;;  %v3421_v55 = vand.u32 2147483648, %v3283_v51  ;;  %v3419_v4 = vand.u32 2147483647, %v3283_v51 }
 0x69b   : > { %v3528_v36 = vmul.f32 %v6847_v25, %v3395_v59  ;;  %v3398_v61 = vsub.f32 1.0, %v3397_v48  ;;  %vm3415_vm4 = vweird.f32 %v3283_v51 }
 0x69c   : > { %v3422_v13 = vor.u32 1.1754944e-38, %v3421_v55  ;;  %vm3420_vm6 = vcmp.eq.f32.partialorder %v3419_v4, 8.507059e+37 }
 0x69d   : > { %3544 = vst [vmem:[%s6889_s30 + $0x30] sm:$0xff] %v3528_v36  ;;  %v3399_v37 = vmul.f32 %v4658_v43, %v3398_v61 }
 0x69f   : > { %v3400_v26 = vadd.f32 %v4658_v43, %v3399_v37 }
 0x6a0   : > { %v4660_v28 = vpop.eup %4659 }
 0x6a1   : > { %v3404_v11 = vsel %vm3403_vm1, %v4658_v43, %v3400_v26  ;;  %v3411_v23 = vmul.f32 %v4660_v28, %v3283_v51  ;;  %v3285_v45 = vpop.xlane.xlu1 %3284  ;;  %vm3416_vm3 = vweird.f32 %v4660_v28 }
 0x6a2   : > { %v3409_v9 = vsel %vm3406_vm2, %v3408_v6, %v3404_v11  ;;  %4661 = vrcp.f32 %v3285_v45  ;;  %vm3417_vm5 = vmor %vm3415_vm4, %vm3416_vm3  ;;  %v3435_v0 = vand.u32 2147483648, %v3285_v45  ;;  %v3433_v38 = vand.u32 2147483647, %v3285_v45 }
 0x6a3   : > { %v3529_v25 = vmul.f32 %v6851_v41, %v3409_v9  ;;  %v3412_v50 = vsub.f32 1.0, %v3411_v23  ;;  %vm3429_vm8 = vweird.f32 %v3285_v45 }
 0x6a4   : > { %v3436_v18 = vor.u32 1.1754944e-38, %v3435_v0  ;;  %vm3434_vm10 = vcmp.eq.f32.partialorder %v3433_v38, 8.507059e+37 }
 0x6a5   : > { %3545 = vst [vmem:[%s6889_s30 + $0x38] sm:$0xff] %v3529_v25  ;;  %v3413_v40 = vmul.f32 %v4660_v28, %v3412_v50 }
 0x6a7   : > { %v3414_v60 = vadd.f32 %v4660_v28, %v3413_v40 }
 0x6a8   : > { %v4662_v10 = vpop.eup %4661 }
 0x6a9   : > { %v3418_v63 = vsel %vm3417_vm5, %v4660_v28, %v3414_v60  ;;  %v3425_v8 = vmul.f32 %v4662_v10, %v3285_v45  ;;  %v3287_v57 = vpop.xlane.xlu2 %3286  ;;  %vm3430_vm7 = vweird.f32 %v4662_v10 }
 0x6aa   : > { %v3423_v42 = vsel %vm3420_vm6, %v3422_v13, %v3418_v63  ;;  %4663 = vrcp.f32 %v3287_v57  ;;  %vm3431_vm9 = vmor %vm3429_vm8, %vm3430_vm7  ;;  %v3449_v2 = vand.u32 2147483648, %v3287_v57  ;;  %v3447_v1 = vand.u32 2147483647, %v3287_v57 }
 0x6ab   : > { %v3530_v41 = vmul.f32 %v6855_v5, %v3423_v42  ;;  %v3426_v14 = vsub.f32 1.0, %v3425_v8  ;;  %vm3443_vm12 = vweird.f32 %v3287_v57 }
 0x6ac   : > { %v3450_v16 = vor.u32 1.1754944e-38, %v3449_v2  ;;  %vm3448_vm14 = vcmp.eq.f32.partialorder %v3447_v1, 8.507059e+37 }
 0x6ad   : > { %3546 = vst [vmem:[%s6889_s30 + $0x40] sm:$0xff] %v3530_v41  ;;  %v3427_v20 = vmul.f32 %v4662_v10, %v3426_v14 }
 0x6af   : > { %v3428_v33 = vadd.f32 %v4662_v10, %v3427_v20 }
 0x6b0   : > { %v4664_v19 = vpop.eup %4663 }
 0x6b1   : > { %v3432_v49 = vsel %vm3431_vm9, %v4662_v10, %v3428_v33  ;;  %v3439_v46 = vmul.f32 %v4664_v19, %v3287_v57  ;;  %v3289_v7 = vpop.xlane.xlu0 %3288  ;;  %vm3444_vm11 = vweird.f32 %v4664_v19 }
 0x6b2   : > { %v3437_v32 = vsel %vm3434_vm10, %v3436_v18, %v3432_v49  ;;  %4665 = vrcp.f32 %v3289_v7  ;;  %vm3445_vm13 = vmor %vm3443_vm12, %vm3444_vm11  ;;  %v3463_v47 = vand.u32 2147483648, %v3289_v7  ;;  %v3461_v43 = vand.u32 2147483647, %v3289_v7 }
 0x6b3   : > { %v3531_v5 = vmul.f32 %v6859_v34, %v3437_v32  ;;  %v3440_v31 = vsub.f32 1.0, %v3439_v46  ;;  %vm3457_vm0 = vweird.f32 %v3289_v7 }
 0x6b4   : > { %v3464_v48 = vor.u32 1.1754944e-38, %v3463_v47  ;;  %vm3462_vm2 = vcmp.eq.f32.partialorder %v3461_v43, 8.507059e+37 }
 0x6b5   : > { %3547 = vst [vmem:[%s6889_s30 + $0x48] sm:$0xff] %v3531_v5  ;;  %v3441_v15 = vmul.f32 %v4664_v19, %v3440_v31 }
 0x6b7   : > { %v3442_v56 = vadd.f32 %v4664_v19, %v3441_v15 }
 0x6b8   : > { %v4666_v27 = vpop.eup %4665 }
 0x6b9   : > { %v3446_v29 = vsel %vm3445_vm13, %v4664_v19, %v3442_v56  ;;  %v3453_v35 = vmul.f32 %v4666_v27, %v3289_v7  ;;  %v3291_v24 = vpop.xlane.xlu1 %3290  ;;  %vm3458_vm15 = vweird.f32 %v4666_v27 }
 0x6ba   : > { %v3451_v3 = vsel %vm3448_vm14, %v3450_v16, %v3446_v29  ;;  %4667 = vrcp.f32 %v3291_v24  ;;  %vm3459_vm1 = vmor %vm3457_vm0, %vm3458_vm15  ;;  %v3477_v37 = vand.u32 2147483648, %v3291_v24  ;;  %v3475_v26 = vand.u32 2147483647, %v3291_v24 }
 0x6bb   : > { %v3532_v34 = vmul.f32 %v6863_v62, %v3451_v3  ;;  %v3454_v17 = vsub.f32 1.0, %v3453_v35  ;;  %vm3471_vm4 = vweird.f32 %v3291_v24 }
 0x6bc   : > { %v3478_v11 = vor.u32 1.1754944e-38, %v3477_v37  ;;  %vm3476_vm6 = vcmp.eq.f32.partialorder %v3475_v26, 8.507059e+37 }
 0x6bd   : > { %3548 = vst [vmem:[%s6889_s30 + $0x50] sm:$0xff] %v3532_v34  ;;  %v3455_v44 = vmul.f32 %v4666_v27, %v3454_v17 }
 0x6bf   : > { %v3456_v52 = vadd.f32 %v4666_v27, %v3455_v44 }
 0x6c0   : > { %v4668_v54 = vpop.eup %4667 }
 0x6c1   : > { %v3460_v51 = vsel %vm3459_vm1, %v4666_v27, %v3456_v52  ;;  %v3467_v59 = vmul.f32 %v4668_v54, %v3291_v24  ;;  %v3293_v36 = vpop.xlane.xlu2 %3292  ;;  %vm3472_vm3 = vweird.f32 %v4668_v54 }
 0x6c2   : > { %v3465_v61 = vsel %vm3462_vm2, %v3464_v48, %v3460_v51  ;;  %4669 = vrcp.f32 %v3293_v36  ;;  %vm3473_vm5 = vmor %vm3471_vm4, %vm3472_vm3  ;;  %v3491_v55 = vand.u32 2147483648, %v3293_v36  ;;  %v3489_v4 = vand.u32 2147483647, %v3293_v36 }
 0x6c3   : > { %v3533_v62 = vmul.f32 %v6867_v30, %v3465_v61  ;;  %v3468_v21 = vsub.f32 1.0, %v3467_v59  ;;  %vm3485_vm8 = vweird.f32 %v3293_v36 }
 0x6c4   : > { %v3492_v13 = vor.u32 1.1754944e-38, %v3491_v55  ;;  %vm3490_vm10 = vcmp.eq.f32.partialorder %v3489_v4, 8.507059e+37 }
 0x6c5   : > { %3549 = vst [vmem:[%s6889_s30 + $0x58] sm:$0xff] %v3533_v62  ;;  %v3469_v22 = vmul.f32 %v4668_v54, %v3468_v21 }
 0x6c7   : > { %v3470_v28 = vadd.f32 %v4668_v54, %v3469_v22 }
 0x6c8   : > { %v4670_v6 = vpop.eup %4669 }
 0x6c9   : > { %v3474_v23 = vsel %vm3473_vm5, %v4668_v54, %v3470_v28  ;;  %v3481_v45 = vmul.f32 %v4670_v6, %v3293_v36  ;;  %v3295_v9 = vpop.xlane.xlu0 %3294  ;;  %vm3486_vm7 = vweird.f32 %v4670_v6 }
 0x6ca   : > { %v3479_v25 = vsel %vm3476_vm6, %v3478_v11, %v3474_v23  ;;  %4671 = vrcp.f32 %v3295_v9  ;;  %vm3487_vm9 = vmor %vm3485_vm8, %vm3486_vm7  ;;  %v3505_v14 = vand.u32 2147483648, %v3295_v9  ;;  %v3503_v20 = vand.u32 2147483647, %v3295_v9 }
 0x6cb   : > { %v3534_v30 = vmul.f32 %v6871_v12, %v3479_v25  ;;  %v3482_v50 = vsub.f32 1.0, %v3481_v45  ;;  %vm3499_vm12 = vweird.f32 %v3295_v9 }
 0x6cc   : > { %v3506_v19 = vor.u32 1.1754944e-38, %v3505_v14  ;;  %vm3504_vm14 = vcmp.eq.f32.partialorder %v3503_v20, 8.507059e+37 }
 0x6cd   : > { %3550 = vst [vmem:[%s6889_s30 + $0x60] sm:$0xff] %v3534_v30  ;;  %v3483_v40 = vmul.f32 %v4670_v6, %v3482_v50 }
 0x6cf   : > { %v3484_v60 = vadd.f32 %v4670_v6, %v3483_v40 }
 0x6d0   : > { %v4672_v10 = vpop.eup %4671 }
 0x6d1   : > { %v3488_v63 = vsel %vm3487_vm9, %v4670_v6, %v3484_v60  ;;  %v3495_v8 = vmul.f32 %v4672_v10, %v3295_v9  ;;  %v3297_v57 = vpop.xlane.xlu1 %3296  ;;  %vm3500_vm11 = vweird.f32 %v4672_v10 }
 0x6d2   : > { %v3493_v42 = vsel %vm3490_vm10, %v3492_v13, %v3488_v63  ;;  %4673 = vrcp.f32 %v3297_v57  ;;  %vm3501_vm13 = vmor %vm3499_vm12, %vm3500_vm11  ;;  %v3519_v32 = vand.u32 2147483648, %v3297_v57  ;;  %v3517_v31 = vand.u32 2147483647, %v3297_v57 }
 0x6d3   : > { %v3535_v12 = vmul.f32 %v6875_v58, %v3493_v42  ;;  %v3496_v41 = vsub.f32 1.0, %v3495_v8  ;;  %vm3513_vm0 = vweird.f32 %v3297_v57 }
 0x6d4   : > { %v3520_v15 = vor.u32 1.1754944e-38, %v3519_v32  ;;  %vm3518_vm2 = vcmp.eq.f32.partialorder %v3517_v31, 8.507059e+37 }
 0x6d5   : > { %3551 = vst [vmem:[%s6889_s30 + $0x68] sm:$0xff] %v3535_v12  ;;  %v3497_v0 = vmul.f32 %v4672_v10, %v3496_v41 }
 0x6d7   : > { %v3498_v38 = vadd.f32 %v4672_v10, %v3497_v0 }
 0x6d8   : > { %v4674_v33 = vpop.eup %4673 }
 0x6d9   : > { %v3502_v18 = vsel %vm3501_vm13, %v4672_v10, %v3498_v38  ;;  %v3509_v49 = vmul.f32 %v4674_v33, %v3297_v57  ;;  %vm3514_vm15 = vweird.f32 %v4674_v33 }
 0x6da   : > { %v3507_v46 = vsel %vm3504_vm14, %v3506_v19, %v3502_v18  ;;  %vm3515_vm1 = vmor %vm3513_vm0, %vm3514_vm15 }
 0x6db   : > { %v3536_v58 = vmul.f32 %v6879_v53, %v3507_v46  ;;  %v3510_v7 = vsub.f32 1.0, %v3509_v49 }
 0x6dd   : > { %3552 = vst [vmem:[%s6889_s30 + $0x70] sm:$0xff] %v3536_v58  ;;  %v3511_v5 = vmul.f32 %v4674_v33, %v3510_v7 }
 0x6df   : > { %v3512_v2 = vadd.f32 %v4674_v33, %v3511_v5 }
 0x6e1   : > { %v3516_v53 = vsel %vm3515_vm1, %v4674_v33, %v3512_v2 }
 0x6e2   : > { %v3521_v1 = vsel %vm3518_vm2, %v3520_v15, %v3516_v53 }
 0x6e3   : > { %v3537_v56 = vmul.f32 %v6882_v39, %v3521_v1 }
 0x6e5   : > { %3553 = vst [vmem:[%s6889_s30 + $0x78] sm:$0xff] %v3537_v56 }
 0x6e6   : > { %4703 = shalt.err (!%p4700_p3)
}
 0x6e7   : > { %s4740_s23 = smov 128   ;;  %s4741_s30 = smov 8  }
 0x6e8   : > { %4501 = dma.vmem_to_hbm [thread:$0]  (%p4860_p5), %s3568_s20, 2048, %s3570_s22, %s3555_s24, %s4740_s23, %s4740_s23, %s4741_s30  }
 0x6e9 PF: > { %p4507_p4 = scmp.ge.s32.totalorder %s4738_s21, 2  ;;  %s3584_s27 = sand.u32 1, %s4726_s18  }
 0x6ea   : > { %s3585_s26 = scalar_lea.sflag [#allocation3], %s3584_s27 }
 0x6eb   : > { %p4504_p7 = pnand %p4507_p4, %p4864_p6 }
 0x6ed   : > { %p4505_p8 = pneg %p4504_p7 }
 0x6ef   : > { %4721 = dma.done.wait (%p4505_p8), %s3585_s26, 2048  }
 0x6f0   : > { %4723 = vsyncadd (%p4505_p8), %s3585_s26, 4294965248  ;;  %s7126_s21 = sld [smem:[#allocation6_spill]]  ;;  %s7129_s18 = smov %s4730_s19 }
 0x6f1   : > { %s7127_s16 = sld [smem:[#allocation5_spill]] }
 0x6f2   : > { %s7128_s20 = sld [smem:[#allocation7_spill]] }
 0x6f6   : > { %p25_p9 = scmp.ge.s32.totalorder %s7126_s21, 4  }
 0x6f7   : > { %s7130_s19 = smov %s7127_s16 }
 0x6f8   :  { %27 = sbr.rel (!%p25_p9) target bundleno = 6 (0x6), region = 118 }
 0x6fd   :  { %3591 = vsyncpa [#allocation3], 1 }
 0x6fe   :  { %3593 = vsyncpa [#allocation3 + $0x1], 1 }

</bundles_post_ra>
